<compile_context>
chip_gen: v6e
topology: v6e:2x2x1
jax: 0.10.0
libtpu: 0.0.40
codegen_flags: <defaults>
</compile_context>

<pallas_src>
import functools

import jax
import jax.numpy as jnp
from jax.experimental import pallas as pl
from jax.experimental.pallas import tpu as pltpu


def _silu(x):
    return x * jax.nn.sigmoid(x)


# ----------------------------- fused Pallas kernel -----------------------------

def _mbconv_fused_kernel(
        # inputs
        x_ref, w_exp_ref, bn1s_ref, bn1b_ref,
        w_dw_ref, bn2s_ref, bn2b_ref,
        w_se1_ref, w_se2_ref,
        w_proj_ref, bn3s_ref, bn3b_ref,
        # output
        o_ref,
        # scratch
        hp_ref,
        *, H, W, K, use_res_connect):
    """One batch element per grid step; everything stays in VMEM."""
    pad = (K - 1) // 2
    HW = H * W
    Cexp = w_exp_ref.shape[1]

    # ---- 1) expand 1x1 conv (channel matmul on the MXU) + folded BN + SiLU ----
    h = jnp.dot(x_ref[0], w_exp_ref[...], preferred_element_type=jnp.float32)
    h = _silu(h * bn1s_ref[...] + bn1b_ref[...])            # (HW, Cexp) f32

    # ---- 2) depthwise KxK conv (stride 1); halo padding done in VMEM scratch ----
    hp_ref[...] = jnp.zeros(hp_ref.shape, hp_ref.dtype)
    hp_ref[pad:pad + H, pad:pad + W, :] = h.reshape(H, W, Cexp)
    wdw = w_dw_ref[...]                                      # (K*K, Cexp)
    acc = jnp.zeros((H, W, Cexp), jnp.float32)
    for ky in range(K):
        for kx in range(K):
            acc = acc + hp_ref[ky:ky + H, kx:kx + W, :] * wdw[ky * K + kx]
    d = acc.reshape(HW, Cexp)
    d = _silu(d * bn2s_ref[...] + bn2b_ref[...])             # (HW, Cexp)

    # ---- 3) squeeze-excitation, folded in (no extra HBM round trip) ----
    pooled = jnp.sum(d, axis=0, keepdims=True) * (1.0 / HW)  # (1, Cexp)
    s = _silu(jnp.dot(pooled, w_se1_ref[...],
                      preferred_element_type=jnp.float32))
    s = jax.nn.sigmoid(jnp.dot(s, w_se2_ref[...],
                               preferred_element_type=jnp.float32))
    d = d * s                                                # per-channel rescale

    # ---- 4) project 1x1 conv + BN (no activation) + residual ----
    y = jnp.dot(d, w_proj_ref[...], preferred_element_type=jnp.float32)
    y = y * bn3s_ref[...] + bn3b_ref[...]
    if use_res_connect:
        y = y + x_ref[0]
    o_ref[0] = y.astype(o_ref.dtype)


# ----------------------------- pallas_call wrapper -----------------------------

def mbconv_forward(x_nchw, params, *, use_res_connect, kernel_size=3):
    N, Cin, H, W = x_nchw.shape
    Cexp = params["w_expand"].shape[1]
    Csq = params["w_se1"].shape[1]
    Cout = params["w_project"].shape[1]
    K = kernel_size
    pad = (K - 1) // 2
    HW = H * W
    if use_res_connect:
        assert Cin == Cout

    # NCHW -> channels-last (N, H*W, Cin) slab (cheap layout plumbing on
    # sub-MiB tensors; in a full network the graph would stay NHWC).
    x2d = jnp.transpose(x_nchw, (0, 2, 3, 1)).reshape(N, HW, Cin)
    w_dw = params["w_dw"].reshape(K * K, Cexp)

    kern = functools.partial(_mbconv_fused_kernel, H=H, W=W, K=K,
                             use_res_connect=use_res_connect)

    def rep(n):   # weights / BN params: same block every grid step
        return (0, 0)

    out2d = pl.pallas_call(
        kern,
        out_shape=jax.ShapeDtypeStruct((N, HW, Cout), jnp.float32),
        grid_spec=pltpu.PrefetchScalarGridSpec(
            num_scalar_prefetch=0,
            grid=(N,),
            in_specs=[
                pl.BlockSpec((1, HW, Cin), lambda n: (n, 0, 0)),   # x
                pl.BlockSpec((Cin, Cexp), rep),                    # w_expand
                pl.BlockSpec((1, Cexp), rep),                      # bn1 scale
                pl.BlockSpec((1, Cexp), rep),                      # bn1 bias
                pl.BlockSpec((K * K, Cexp), rep),                  # w_dw
                pl.BlockSpec((1, Cexp), rep),                      # bn2 scale
                pl.BlockSpec((1, Cexp), rep),                      # bn2 bias
                pl.BlockSpec((Cexp, Csq), rep),                    # w_se1
                pl.BlockSpec((Csq, Cexp), rep),                    # w_se2
                pl.BlockSpec((Cexp, Cout), rep),                   # w_project
                pl.BlockSpec((1, Cout), rep),                      # bn3 scale
                pl.BlockSpec((1, Cout), rep),                      # bn3 bias
            ],
            out_specs=pl.BlockSpec((1, HW, Cout), lambda n: (n, 0, 0)),
            scratch_shapes=[
                pltpu.VMEM((H + 2 * pad, W + 2 * pad, Cexp), jnp.float32),
            ]),
        compiler_params=pltpu.CompilerParams(
            dimension_semantics=("parallel",)),
    )(x2d, params["w_expand"], params["bn1_scale"], params["bn1_bias"],
      w_dw, params["bn2_scale"], params["bn2_bias"],
      params["w_se1"], params["w_se2"],
      params["w_project"], params["bn3_scale"], params["bn3_bias"])

    out = out2d.reshape(N, H, W, Cout)
    return jnp.transpose(out, (0, 3, 1, 2))  # NHWC -> NCHW


# ----------------------------- params + plain-JAX reference -----------------------------

def make_params(key, cin, cexp, csq, cout, k, eps=1e-3):
    keys = jax.random.split(key, 8)

    def conv_w(kk, shape, fan_in):
        return jax.random.normal(kk, shape, jnp.float32) / jnp.sqrt(float(fan_in))

    def bn(k4, c):
        kg, kb, km, kv = jax.random.split(k4, 4)
        gamma = 1.0 + 0.1 * jax.random.normal(kg, (c,), jnp.float32)
        beta = 0.1 * jax.random.normal(kb, (c,), jnp.float32)
        mean = 0.1 * jax.random.normal(km, (c,), jnp.float32)
        var = 1.0 + 0.1 * jnp.abs(jax.random.normal(kv, (c,), jnp.float32))
        scale = gamma / jnp.sqrt(var + eps)
        bias = beta - mean * scale
        return scale.reshape(1, c), bias.reshape(1, c)

    bn1_scale, bn1_bias = bn(keys[1], cexp)
    bn2_scale, bn2_bias = bn(keys[3], cexp)
    bn3_scale, bn3_bias = bn(keys[7], cout)
    return dict(
        w_expand=conv_w(keys[0], (cin, cexp), cin),
        bn1_scale=bn1_scale, bn1_bias=bn1_bias,
        w_dw=conv_w(keys[2], (k, k, cexp), k * k),
        bn2_scale=bn2_scale, bn2_bias=bn2_bias,
        w_se1=conv_w(keys[4], (cexp, csq), cexp),
        w_se2=conv_w(keys[5], (csq, cexp), csq),
        w_project=conv_w(keys[6], (cexp, cout), cexp),
        bn3_scale=bn3_scale, bn3_bias=bn3_bias,
    )


def mbconv_reference(x_nchw, p, *, use_res_connect, kernel_size=3):
    x = jnp.transpose(x_nchw, (0, 2, 3, 1))
    N, H, W, Cin = x.shape
    h = _silu((x @ p["w_expand"]) * p["bn1_scale"] + p["bn1_bias"])
    pad = (kernel_size - 1) // 2
    hp = jnp.pad(h, ((0, 0), (pad, pad), (pad, pad), (0, 0)))
    acc = jnp.zeros_like(h)
    for ky in range(kernel_size):
        for kx in range(kernel_size):
            acc = acc + hp[:, ky:ky + H, kx:kx + W, :] * p["w_dw"][ky, kx, :]
    h = _silu(acc * p["bn2_scale"] + p["bn2_bias"])
    pooled = jnp.mean(h, axis=(1, 2))                       # (N, Cexp)
    s = _silu(pooled @ p["w_se1"])
    s = jax.nn.sigmoid(s @ p["w_se2"])
    h = h * s[:, None, None, :]
    y = (h @ p["w_project"]) * p["bn3_scale"] + p["bn3_bias"]
    if use_res_connect:
        y = y + x
    return jnp.transpose(y, (0, 3, 1, 2))


if __name__ == "__main__":
    # MBConvConfig(expand_ratio=4, kernel=3, stride=1, input_channels=8,
    #              out_channels=8, ...) -> Cexp=32, Csq=2, residual connection.
    N, Cin, H, W = 2, 8, 16, 16
    Cexp, Csq, Cout, K = 32, 2, 8, 3

    key = jax.random.PRNGKey(0)
    kx, kp = jax.random.split(key)
    x = jax.random.normal(kx, (N, Cin, H, W), jnp.float32)
    params = make_params(kp, Cin, Cexp, Csq, Cout, K)

    fwd = jax.jit(lambda v: mbconv_forward(v, params,
                                           use_res_connect=True,
                                           kernel_size=K))
    out = jax.block_until_ready(fwd(x))

    ref = mbconv_reference(x, params, use_res_connect=True, kernel_size=K)
    assert out.shape == (N, Cout, H, W)
    assert bool(jnp.allclose(out, ref, atol=2e-2, rtol=2e-2)), \
        float(jnp.max(jnp.abs(out - ref)))
    print("KERNEL_OK")
</pallas_src>

<mosaic_0001>
module attributes {stable_mosaic.version = 11 : i64} {
  func.func @_mbconv_fused_kernel(%arg0: i32, %arg1: memref<1x256x8xf32, #tpu.memory_space<vmem>>, %arg2: memref<8x32xf32, #tpu.memory_space<vmem>>, %arg3: memref<1x32xf32, #tpu.memory_space<vmem>>, %arg4: memref<1x32xf32, #tpu.memory_space<vmem>>, %arg5: memref<9x32xf32, #tpu.memory_space<vmem>>, %arg6: memref<1x32xf32, #tpu.memory_space<vmem>>, %arg7: memref<1x32xf32, #tpu.memory_space<vmem>>, %arg8: memref<32x2xf32, #tpu.memory_space<vmem>>, %arg9: memref<2x32xf32, #tpu.memory_space<vmem>>, %arg10: memref<32x8xf32, #tpu.memory_space<vmem>>, %arg11: memref<1x8xf32, #tpu.memory_space<vmem>>, %arg12: memref<1x8xf32, #tpu.memory_space<vmem>>, %arg13: memref<1x256x8xf32, #tpu.memory_space<vmem>>, %arg14: memref<18x18x32xf32, #tpu.memory_space<vmem>>) attributes {dimension_semantics = [#tpu.dimension_semantics<parallel>], iteration_bounds = array<i64: 2>, scalar_prefetch = 0 : i64, scratch_operands = 1 : i64, tpu.core_type = #tpu.core_type<tc>, window_params = [{transform_indices = @transform_0, window_bounds = array<i64: 1, 256, 8>}, {pipeline_mode = #tpu.pipeline_mode<synchronous>, transform_indices = @transform_1, window_bounds = array<i64: 8, 32>}, {pipeline_mode = #tpu.pipeline_mode<synchronous>, transform_indices = @transform_2, window_bounds = array<i64: 1, 32>}, {pipeline_mode = #tpu.pipeline_mode<synchronous>, transform_indices = @transform_3, window_bounds = array<i64: 1, 32>}, {pipeline_mode = #tpu.pipeline_mode<synchronous>, transform_indices = @transform_4, window_bounds = array<i64: 9, 32>}, {pipeline_mode = #tpu.pipeline_mode<synchronous>, transform_indices = @transform_5, window_bounds = array<i64: 1, 32>}, {pipeline_mode = #tpu.pipeline_mode<synchronous>, transform_indices = @transform_6, window_bounds = array<i64: 1, 32>}, {pipeline_mode = #tpu.pipeline_mode<synchronous>, transform_indices = @transform_7, window_bounds = array<i64: 32, 2>}, {pipeline_mode = #tpu.pipeline_mode<synchronous>, transform_indices = @transform_8, window_bounds = array<i64: 2, 32>}, {pipeline_mode = #tpu.pipeline_mode<synchronous>, transform_indices = @transform_9, window_bounds = array<i64: 32, 8>}, {pipeline_mode = #tpu.pipeline_mode<synchronous>, transform_indices = @transform_10, window_bounds = array<i64: 1, 8>}, {pipeline_mode = #tpu.pipeline_mode<synchronous>, transform_indices = @transform_11, window_bounds = array<i64: 1, 8>}, {transform_indices = @transform_12, window_bounds = array<i64: 1, 256, 8>}]} {
    %c0 = arith.constant 0 : index
    %c0_0 = arith.constant 0 : index
    %c0_1 = arith.constant 0 : index
    %0 = vector.load %arg1[%c0, %c0_0, %c0_1] : memref<1x256x8xf32, #tpu.memory_space<vmem>>, vector<1x256x8xf32>
    %1 = vector.shape_cast %0 : vector<1x256x8xf32> to vector<256x8xf32>
    %c0_2 = arith.constant 0 : index
    %c0_3 = arith.constant 0 : index
    %2 = vector.load %arg2[%c0_2, %c0_3] : memref<8x32xf32, #tpu.memory_space<vmem>>, vector<8x32xf32>
    %cst = arith.constant dense<0.000000e+00> : vector<256x32xf32>
    %3 = tpu.matmul %1, %2, %cst {dimension_numbers = #tpu.dot_dimension_numbers<[1], [0], [0], [1], [0, 0, 1, 1], [], []>} : vector<256x8xf32>, vector<8x32xf32>, vector<256x32xf32> -> vector<256x32xf32>
    %c0_4 = arith.constant 0 : index
    %c0_5 = arith.constant 0 : index
    %4 = vector.load %arg3[%c0_4, %c0_5] : memref<1x32xf32, #tpu.memory_space<vmem>>, vector<1x32xf32>
    %5 = vector.broadcast %4 : vector<1x32xf32> to vector<256x32xf32>
    %6 = arith.mulf %3, %5 : vector<256x32xf32>
    %c0_6 = arith.constant 0 : index
    %c0_7 = arith.constant 0 : index
    %7 = vector.load %arg4[%c0_6, %c0_7] : memref<1x32xf32, #tpu.memory_space<vmem>>, vector<1x32xf32>
    %8 = vector.broadcast %7 : vector<1x32xf32> to vector<256x32xf32>
    %9 = arith.addf %6, %8 : vector<256x32xf32>
    %10 = arith.negf %9 : vector<256x32xf32>
    %11 = math.exp %10 : vector<256x32xf32>
    %cst_8 = arith.constant 1.000000e+00 : f32
    %12 = vector.broadcast %cst_8 : f32 to vector<256x32xf32>
    %13 = arith.addf %12, %11 : vector<256x32xf32>
    %14 = arith.divf %12, %13 : vector<256x32xf32>
    %15 = arith.mulf %9, %14 : vector<256x32xf32>
    %cst_9 = arith.constant 0.000000e+00 : f32
    %16 = vector.broadcast %cst_9 : f32 to vector<18x18x32xf32>
    %c0_10 = arith.constant 0 : index
    %c0_11 = arith.constant 0 : index
    %c0_12 = arith.constant 0 : index
    %17 = vector.load %arg14[%c0_10, %c0_11, %c0_12] : memref<18x18x32xf32, #tpu.memory_space<vmem>>, vector<18x18x32xf32>
    tpu.vector_store %arg14[%c0_10, %c0_11, %c0_12], %16 {strides = array<i32>} : memref<18x18x32xf32, #tpu.memory_space<vmem>>, vector<18x18x32xf32>,
    %18 = vector.shape_cast %15 : vector<256x32xf32> to vector<16x16x32xf32>
    %c1 = arith.constant 1 : index
    %c1_13 = arith.constant 1 : index
    %c0_14 = arith.constant 0 : index
    %19 = vector.load %arg14[%c1, %c1_13, %c0_14] : memref<18x18x32xf32, #tpu.memory_space<vmem>>, vector<16x16x32xf32>
    tpu.vector_store %arg14[%c1, %c1_13, %c0_14], %18 {strides = array<i32>} : memref<18x18x32xf32, #tpu.memory_space<vmem>>, vector<16x16x32xf32>,
    %c0_15 = arith.constant 0 : index
    %c0_16 = arith.constant 0 : index
    %20 = vector.load %arg5[%c0_15, %c0_16] : memref<9x32xf32, #tpu.memory_space<vmem>>, vector<9x32xf32>
    %cst_17 = arith.constant 0.000000e+00 : f32
    %21 = vector.broadcast %cst_17 : f32 to vector<16x16x32xf32>
    %c0_18 = arith.constant 0 : index
    %c0_19 = arith.constant 0 : index
    %c0_20 = arith.constant 0 : index
    %22 = vector.load %arg14[%c0_18, %c0_19, %c0_20] : memref<18x18x32xf32, #tpu.memory_space<vmem>>, vector<16x16x32xf32>
    %23 = vector.extract_strided_slice %20 {offsets = [0, 0], sizes = [1, 32], strides = [1, 1]} : vector<9x32xf32> to vector<1x32xf32>
    %24 = vector.shape_cast %23 : vector<1x32xf32> to vector<32xf32>
    %25 = vector.shape_cast %24 : vector<32xf32> to vector<1x1x32xf32>
    %26 = vector.broadcast %25 : vector<1x1x32xf32> to vector<16x16x32xf32>
    %27 = arith.mulf %22, %26 : vector<16x16x32xf32>
    %28 = arith.addf %21, %27 : vector<16x16x32xf32>
    %c0_21 = arith.constant 0 : index
    %c1_22 = arith.constant 1 : index
    %c0_23 = arith.constant 0 : index
    %29 = vector.load %arg14[%c0_21, %c1_22, %c0_23] : memref<18x18x32xf32, #tpu.memory_space<vmem>>, vector<16x16x32xf32>
    %30 = vector.extract_strided_slice %20 {offsets = [1, 0], sizes = [1, 32], strides = [1, 1]} : vector<9x32xf32> to vector<1x32xf32>
    %31 = vector.shape_cast %30 : vector<1x32xf32> to vector<32xf32>
    %32 = vector.shape_cast %31 : vector<32xf32> to vector<1x1x32xf32>
    %33 = vector.broadcast %32 : vector<1x1x32xf32> to vector<16x16x32xf32>
    %34 = arith.mulf %29, %33 : vector<16x16x32xf32>
    %35 = arith.addf %28, %34 : vector<16x16x32xf32>
    %c0_24 = arith.constant 0 : index
    %c2 = arith.constant 2 : index
    %c0_25 = arith.constant 0 : index
    %36 = vector.load %arg14[%c0_24, %c2, %c0_25] : memref<18x18x32xf32, #tpu.memory_space<vmem>>, vector<16x16x32xf32>
    %37 = vector.extract_strided_slice %20 {offsets = [2, 0], sizes = [1, 32], strides = [1, 1]} : vector<9x32xf32> to vector<1x32xf32>
    %38 = vector.shape_cast %37 : vector<1x32xf32> to vector<32xf32>
    %39 = vector.shape_cast %38 : vector<32xf32> to vector<1x1x32xf32>
    %40 = vector.broadcast %39 : vector<1x1x32xf32> to vector<16x16x32xf32>
    %41 = arith.mulf %36, %40 : vector<16x16x32xf32>
    %42 = arith.addf %35, %41 : vector<16x16x32xf32>
    %c1_26 = arith.constant 1 : index
    %c0_27 = arith.constant 0 : index
    %c0_28 = arith.constant 0 : index
    %43 = vector.load %arg14[%c1_26, %c0_27, %c0_28] : memref<18x18x32xf32, #tpu.memory_space<vmem>>, vector<16x16x32xf32>
    %44 = vector.extract_strided_slice %20 {offsets = [3, 0], sizes = [1, 32], strides = [1, 1]} : vector<9x32xf32> to vector<1x32xf32>
    %45 = vector.shape_cast %44 : vector<1x32xf32> to vector<32xf32>
    %46 = vector.shape_cast %45 : vector<32xf32> to vector<1x1x32xf32>
    %47 = vector.broadcast %46 : vector<1x1x32xf32> to vector<16x16x32xf32>
    %48 = arith.mulf %43, %47 : vector<16x16x32xf32>
    %49 = arith.addf %42, %48 : vector<16x16x32xf32>
    %c1_29 = arith.constant 1 : index
    %c1_30 = arith.constant 1 : index
    %c0_31 = arith.constant 0 : index
    %50 = vector.load %arg14[%c1_29, %c1_30, %c0_31] : memref<18x18x32xf32, #tpu.memory_space<vmem>>, vector<16x16x32xf32>
    %51 = vector.extract_strided_slice %20 {offsets = [4, 0], sizes = [1, 32], strides = [1, 1]} : vector<9x32xf32> to vector<1x32xf32>
    %52 = vector.shape_cast %51 : vector<1x32xf32> to vector<32xf32>
    %53 = vector.shape_cast %52 : vector<32xf32> to vector<1x1x32xf32>
    %54 = vector.broadcast %53 : vector<1x1x32xf32> to vector<16x16x32xf32>
    %55 = arith.mulf %50, %54 : vector<16x16x32xf32>
    %56 = arith.addf %49, %55 : vector<16x16x32xf32>
    %c1_32 = arith.constant 1 : index
    %c2_33 = arith.constant 2 : index
    %c0_34 = arith.constant 0 : index
    %57 = vector.load %arg14[%c1_32, %c2_33, %c0_34] : memref<18x18x32xf32, #tpu.memory_space<vmem>>, vector<16x16x32xf32>
    %58 = vector.extract_strided_slice %20 {offsets = [5, 0], sizes = [1, 32], strides = [1, 1]} : vector<9x32xf32> to vector<1x32xf32>
    %59 = vector.shape_cast %58 : vector<1x32xf32> to vector<32xf32>
    %60 = vector.shape_cast %59 : vector<32xf32> to vector<1x1x32xf32>
    %61 = vector.broadcast %60 : vector<1x1x32xf32> to vector<16x16x32xf32>
    %62 = arith.mulf %57, %61 : vector<16x16x32xf32>
    %63 = arith.addf %56, %62 : vector<16x16x32xf32>
    %c2_35 = arith.constant 2 : index
    %c0_36 = arith.constant 0 : index
    %c0_37 = arith.constant 0 : index
    %64 = vector.load %arg14[%c2_35, %c0_36, %c0_37] : memref<18x18x32xf32, #tpu.memory_space<vmem>>, vector<16x16x32xf32>
    %65 = vector.extract_strided_slice %20 {offsets = [6, 0], sizes = [1, 32], strides = [1, 1]} : vector<9x32xf32> to vector<1x32xf32>
    %66 = vector.shape_cast %65 : vector<1x32xf32> to vector<32xf32>
    %67 = vector.shape_cast %66 : vector<32xf32> to vector<1x1x32xf32>
    %68 = vector.broadcast %67 : vector<1x1x32xf32> to vector<16x16x32xf32>
    %69 = arith.mulf %64, %68 : vector<16x16x32xf32>
    %70 = arith.addf %63, %69 : vector<16x16x32xf32>
    %c2_38 = arith.constant 2 : index
    %c1_39 = arith.constant 1 : index
    %c0_40 = arith.constant 0 : index
    %71 = vector.load %arg14[%c2_38, %c1_39, %c0_40] : memref<18x18x32xf32, #tpu.memory_space<vmem>>, vector<16x16x32xf32>
    %72 = vector.extract_strided_slice %20 {offsets = [7, 0], sizes = [1, 32], strides = [1, 1]} : vector<9x32xf32> to vector<1x32xf32>
    %73 = vector.shape_cast %72 : vector<1x32xf32> to vector<32xf32>
    %74 = vector.shape_cast %73 : vector<32xf32> to vector<1x1x32xf32>
    %75 = vector.broadcast %74 : vector<1x1x32xf32> to vector<16x16x32xf32>
    %76 = arith.mulf %71, %75 : vector<16x16x32xf32>
    %77 = arith.addf %70, %76 : vector<16x16x32xf32>
    %c2_41 = arith.constant 2 : index
    %c2_42 = arith.constant 2 : index
    %c0_43 = arith.constant 0 : index
    %78 = vector.load %arg14[%c2_41, %c2_42, %c0_43] : memref<18x18x32xf32, #tpu.memory_space<vmem>>, vector<16x16x32xf32>
    %79 = vector.extract_strided_slice %20 {offsets = [8, 0], sizes = [1, 32], strides = [1, 1]} : vector<9x32xf32> to vector<1x32xf32>
    %80 = vector.shape_cast %79 : vector<1x32xf32> to vector<32xf32>
    %81 = vector.shape_cast %80 : vector<32xf32> to vector<1x1x32xf32>
    %82 = vector.broadcast %81 : vector<1x1x32xf32> to vector<16x16x32xf32>
    %83 = arith.mulf %78, %82 : vector<16x16x32xf32>
    %84 = arith.addf %77, %83 : vector<16x16x32xf32>
    %85 = vector.shape_cast %84 : vector<16x16x32xf32> to vector<256x32xf32>
    %c0_44 = arith.constant 0 : index
    %c0_45 = arith.constant 0 : index
    %86 = vector.load %arg6[%c0_44, %c0_45] : memref<1x32xf32, #tpu.memory_space<vmem>>, vector<1x32xf32>
    %87 = vector.broadcast %86 : vector<1x32xf32> to vector<256x32xf32>
    %88 = arith.mulf %85, %87 : vector<256x32xf32>
    %c0_46 = arith.constant 0 : index
    %c0_47 = arith.constant 0 : index
    %89 = vector.load %arg7[%c0_46, %c0_47] : memref<1x32xf32, #tpu.memory_space<vmem>>, vector<1x32xf32>
    %90 = vector.broadcast %89 : vector<1x32xf32> to vector<256x32xf32>
    %91 = arith.addf %88, %90 : vector<256x32xf32>
    %92 = arith.negf %91 : vector<256x32xf32>
    %93 = math.exp %92 : vector<256x32xf32>
    %cst_48 = arith.constant 1.000000e+00 : f32
    %94 = vector.broadcast %cst_48 : f32 to vector<256x32xf32>
    %95 = arith.addf %94, %93 : vector<256x32xf32>
    %96 = arith.divf %94, %95 : vector<256x32xf32>
    %97 = arith.mulf %91, %96 : vector<256x32xf32>
    %cst_49 = arith.constant dense<0.000000e+00> : vector<32xf32>
    %98 = vector.multi_reduction <add>, %97, %cst_49 [0] : vector<256x32xf32> to vector<32xf32>
    %99 = vector.shape_cast %98 : vector<32xf32> to vector<1x32xf32>
    %cst_50 = arith.constant 3.906250e-03 : f32
    %100 = vector.broadcast %cst_50 : f32 to vector<1x32xf32>
    %101 = arith.mulf %99, %100 : vector<1x32xf32>
    %c0_51 = arith.constant 0 : index
    %c0_52 = arith.constant 0 : index
    %102 = vector.load %arg8[%c0_51, %c0_52] : memref<32x2xf32, #tpu.memory_space<vmem>>, vector<32x2xf32>
    %cst_53 = arith.constant dense<0.000000e+00> : vector<1x2xf32>
    %103 = tpu.matmul %101, %102, %cst_53 {dimension_numbers = #tpu.dot_dimension_numbers<[1], [0], [0], [1], [0, 0, 1, 1], [], []>} : vector<1x32xf32>, vector<32x2xf32>, vector<1x2xf32> -> vector<1x2xf32>
    %104 = arith.negf %103 : vector<1x2xf32>
    %105 = math.exp %104 : vector<1x2xf32>
    %cst_54 = arith.constant 1.000000e+00 : f32
    %106 = vector.broadcast %cst_54 : f32 to vector<1x2xf32>
    %107 = arith.addf %106, %105 : vector<1x2xf32>
    %108 = arith.divf %106, %107 : vector<1x2xf32>
    %109 = arith.mulf %103, %108 : vector<1x2xf32>
    %c0_55 = arith.constant 0 : index
    %c0_56 = arith.constant 0 : index
    %110 = vector.load %arg9[%c0_55, %c0_56] : memref<2x32xf32, #tpu.memory_space<vmem>>, vector<2x32xf32>
    %cst_57 = arith.constant dense<0.000000e+00> : vector<1x32xf32>
    %111 = tpu.matmul %109, %110, %cst_57 {dimension_numbers = #tpu.dot_dimension_numbers<[1], [0], [0], [1], [0, 0, 1, 1], [], []>} : vector<1x2xf32>, vector<2x32xf32>, vector<1x32xf32> -> vector<1x32xf32>
    %112 = arith.negf %111 : vector<1x32xf32>
    %113 = math.exp %112 : vector<1x32xf32>
    %cst_58 = arith.constant 1.000000e+00 : f32
    %114 = vector.broadcast %cst_58 : f32 to vector<1x32xf32>
    %115 = arith.addf %114, %113 : vector<1x32xf32>
    %116 = arith.divf %114, %115 : vector<1x32xf32>
    %117 = vector.broadcast %116 : vector<1x32xf32> to vector<256x32xf32>
    %118 = arith.mulf %97, %117 : vector<256x32xf32>
    %c0_59 = arith.constant 0 : index
    %c0_60 = arith.constant 0 : index
    %119 = vector.load %arg10[%c0_59, %c0_60] : memref<32x8xf32, #tpu.memory_space<vmem>>, vector<32x8xf32>
    %cst_61 = arith.constant dense<0.000000e+00> : vector<256x8xf32>
    %120 = tpu.matmul %118, %119, %cst_61 {dimension_numbers = #tpu.dot_dimension_numbers<[1], [0], [0], [1], [0, 0, 1, 1], [], []>} : vector<256x32xf32>, vector<32x8xf32>, vector<256x8xf32> -> vector<256x8xf32>
    %c0_62 = arith.constant 0 : index
    %c0_63 = arith.constant 0 : index
    %121 = vector.load %arg11[%c0_62, %c0_63] : memref<1x8xf32, #tpu.memory_space<vmem>>, vector<1x8xf32>
    %122 = vector.broadcast %121 : vector<1x8xf32> to vector<256x8xf32>
    %123 = arith.mulf %120, %122 : vector<256x8xf32>
    %c0_64 = arith.constant 0 : index
    %c0_65 = arith.constant 0 : index
    %124 = vector.load %arg12[%c0_64, %c0_65] : memref<1x8xf32, #tpu.memory_space<vmem>>, vector<1x8xf32>
    %125 = vector.broadcast %124 : vector<1x8xf32> to vector<256x8xf32>
    %126 = arith.addf %123, %125 : vector<256x8xf32>
    %c0_66 = arith.constant 0 : index
    %c0_67 = arith.constant 0 : index
    %c0_68 = arith.constant 0 : index
    %127 = vector.load %arg1[%c0_66, %c0_67, %c0_68] : memref<1x256x8xf32, #tpu.memory_space<vmem>>, vector<1x256x8xf32>
    %128 = vector.shape_cast %127 : vector<1x256x8xf32> to vector<256x8xf32>
    %129 = arith.addf %126, %128 : vector<256x8xf32>
    %c0_69 = arith.constant 0 : index
    %c0_70 = arith.constant 0 : index
    %c0_71 = arith.constant 0 : index
    %130 = vector.load %arg13[%c0_69, %c0_70, %c0_71] : memref<1x256x8xf32, #tpu.memory_space<vmem>>, vector<1x256x8xf32>
    %131 = vector.shape_cast %130 : vector<1x256x8xf32> to vector<256x8xf32>
    %132 = vector.shape_cast %129 : vector<256x8xf32> to vector<1x256x8xf32>
    tpu.vector_store %arg13[%c0_69, %c0_70, %c0_71], %132 {strides = array<i32>} : memref<1x256x8xf32, #tpu.memory_space<vmem>>, vector<1x256x8xf32>,
    return
  }
  func.func @transform_0(%arg0: i32) -> (i32, i32, i32) {
    %c0_i32 = arith.constant 0 : i32
    %c0_i32_0 = arith.constant 0 : i32
    %c0_i32_1 = arith.constant 0 : i32
    return %arg0, %c0_i32, %c0_i32_0 : i32, i32, i32
  }
  func.func @transform_1(%arg0: i32) -> (i32, i32) {
    %c0_i32 = arith.constant 0 : i32
    %c0_i32_0 = arith.constant 0 : i32
    %c0_i32_1 = arith.constant 0 : i32
    return %c0_i32, %c0_i32_0 : i32, i32
  }
  func.func @transform_2(%arg0: i32) -> (i32, i32) {
    %c0_i32 = arith.constant 0 : i32
    %c0_i32_0 = arith.constant 0 : i32
    %c0_i32_1 = arith.constant 0 : i32
    return %c0_i32, %c0_i32_0 : i32, i32
  }
  func.func @transform_3(%arg0: i32) -> (i32, i32) {
    %c0_i32 = arith.constant 0 : i32
    %c0_i32_0 = arith.constant 0 : i32
    %c0_i32_1 = arith.constant 0 : i32
    return %c0_i32, %c0_i32_0 : i32, i32
  }
  func.func @transform_4(%arg0: i32) -> (i32, i32) {
    %c0_i32 = arith.constant 0 : i32
    %c0_i32_0 = arith.constant 0 : i32
    %c0_i32_1 = arith.constant 0 : i32
    return %c0_i32, %c0_i32_0 : i32, i32
  }
  func.func @transform_5(%arg0: i32) -> (i32, i32) {
    %c0_i32 = arith.constant 0 : i32
    %c0_i32_0 = arith.constant 0 : i32
    %c0_i32_1 = arith.constant 0 : i32
    return %c0_i32, %c0_i32_0 : i32, i32
  }
  func.func @transform_6(%arg0: i32) -> (i32, i32) {
    %c0_i32 = arith.constant 0 : i32
    %c0_i32_0 = arith.constant 0 : i32
    %c0_i32_1 = arith.constant 0 : i32
    return %c0_i32, %c0_i32_0 : i32, i32
  }
  func.func @transform_7(%arg0: i32) -> (i32, i32) {
    %c0_i32 = arith.constant 0 : i32
    %c0_i32_0 = arith.constant 0 : i32
    %c0_i32_1 = arith.constant 0 : i32
    return %c0_i32, %c0_i32_0 : i32, i32
  }
  func.func @transform_8(%arg0: i32) -> (i32, i32) {
    %c0_i32 = arith.constant 0 : i32
    %c0_i32_0 = arith.constant 0 : i32
    %c0_i32_1 = arith.constant 0 : i32
    return %c0_i32, %c0_i32_0 : i32, i32
  }
  func.func @transform_9(%arg0: i32) -> (i32, i32) {
    %c0_i32 = arith.constant 0 : i32
    %c0_i32_0 = arith.constant 0 : i32
    %c0_i32_1 = arith.constant 0 : i32
    return %c0_i32, %c0_i32_0 : i32, i32
  }
  func.func @transform_10(%arg0: i32) -> (i32, i32) {
    %c0_i32 = arith.constant 0 : i32
    %c0_i32_0 = arith.constant 0 : i32
    %c0_i32_1 = arith.constant 0 : i32
    return %c0_i32, %c0_i32_0 : i32, i32
  }
  func.func @transform_11(%arg0: i32) -> (i32, i32) {
    %c0_i32 = arith.constant 0 : i32
    %c0_i32_0 = arith.constant 0 : i32
    %c0_i32_1 = arith.constant 0 : i32
    return %c0_i32, %c0_i32_0 : i32, i32
  }
  func.func @transform_12(%arg0: i32) -> (i32, i32, i32) {
    %c0_i32 = arith.constant 0 : i32
    %c0_i32_0 = arith.constant 0 : i32
    %c0_i32_1 = arith.constant 0 : i32
    return %arg0, %c0_i32, %c0_i32_0 : i32, i32, i32
  }
}

</mosaic_0001>

<bundles_post_ra>
// kernel: _lambda_.1
= control target key start
LH: loop header
LB: loop body
LE: loop exit
PB: predicated region body
PF: predicated region fallthrough
CT: control target
= control target key end

     0   :  { %s3899_s21 = smov 0   ;;  %s5641_s0 = inlined_call_operand.vmem [shape: f32[2,256,8], index: 0, kind: input, shape index: {}]   ;;  %s5642_s1 = inlined_call_operand.vmem [shape: f32[8,32], index: 1, kind: input, shape index: {}]   ;;  %s5643_s2 = inlined_call_operand.vmem [shape: f32[1,32], index: 2, kind: input, shape index: {}]   ;;  %s5644_s3 = inlined_call_operand.vmem [shape: f32[1,32], index: 3, kind: input, shape index: {}]   ;;  %s5645_s4 = inlined_call_operand.vmem [shape: f32[9,32], index: 4, kind: input, shape index: {}]   ;;  %s5646_s5 = inlined_call_operand.vmem [shape: f32[1,32], index: 5, kind: input, shape index: {}]   ;;  %s5647_s6 = inlined_call_operand.vmem [shape: f32[1,32], index: 6, kind: input, shape index: {}]   ;;  %s5648_s7 = inlined_call_operand.vmem [shape: f32[32,2], index: 7, kind: input, shape index: {}]   ;;  %s5649_s8 = inlined_call_operand.vmem [shape: f32[2,32], index: 8, kind: input, shape index: {}]   ;;  %s5650_s9 = inlined_call_operand.vmem [shape: f32[32,8], index: 9, kind: input, shape index: {}]   ;;  %s5651_s10 = inlined_call_operand.vmem [shape: f32[1,8], index: 10, kind: input, shape index: {}]   ;;  %s5652_s11 = inlined_call_operand.vmem [shape: f32[1,8], index: 11, kind: input, shape index: {}]   ;;  %s5653_s12 = inlined_call_operand.vmem [shape: f32[2,256,8], index: 12, kind: output, shape index: {}]  }
   0x1 LB: > { %s3194_s22 = sadd.s32 4294967295, %s3830_s21   ;;  %p3198_p0 = scmp.ge.s32.totalorder %s3830_s21, 1  ;;  %s3830_s21 = sphi %s3899_s21, %s22_s21  }
   0x2   : > { %p362_p1 = scmp.lt.s32.totalorder %s3830_s21, 3 }
   0x4   : > { %p363_p2 = pnand %p3198_p0, %p362_p1 }
   0x6   : > { %366 = sbr.rel (%p363_p2) target bundleno = 1265 (0x4f1), region = 68 }
   0xb   : > { %v446_v0 = vld [vmem:[%s5642_s1] sm:$0xff]  ;;  %p404_p3 = scmp.lt.s32.totalorder %s3194_s22, 1  ;;  %vm447_vm0 = vcmask 64512   ;;  %vm1071_vm1 = vcmask 261120   ;;  %vm1074_vm2 = vcmask 254976   ;;  %v5655_v33 = vmov 0.0  }
   0xc   : > { %3423 = vmatprep.subr.mxu0 %v446_v0  ;;  %1077 = vst.msk [vmem:[#allocation2 + $0x20] sm:$0xff] %vm1071_vm1, %v5655_v33  ;;  %1072 = vst.msk [vmem:[#allocation2] sm:$0xff] %vm1071_vm1, %v5655_v33  ;;  %3484 = vmatprep.subr.mxu1 %v5655_v33  ;;  %v4097_v34 = vld [vmem:[%s5643_s2] ss:$0 sm:$0xff]  ;;  %vm3833_vm3 = vmmov 0   ;;  %vm2524_vm4 = vcmask 1041408  }
   0xd   : > { %3424 = vmatpush3.msra.mxu0 %v446_v0  ;;  %s5745_s22 = smov (!%p404_p3, %s3194_s22), 1  ;;  %1078 = vst.msk [vmem:[#allocation2 + $0x28] sm:$0x3] %vm1074_vm2, %v5655_v33  ;;  %1075 = vst.msk [vmem:[#allocation2 + $0x10] sm:$0x3] %vm1074_vm2, %v5655_v33  ;;  %vm2520_vm5 = vcmask 15360  }
   0xe   : > { %s3345_s25 = sshll.u32 %s5745_s22, 8  ;;  %1073 = vst.msk [vmem:[#allocation2 + $0x8] sm:$0xff] %vm1071_vm1, %v5655_v33  ;;  %1076 = vst.msk [vmem:[#allocation2 + $0x18] sm:$0xff] %vm1071_vm1, %v5655_v33  ;;  %3473 = vmatprep.subr.mxu0 %v5655_v33  ;;  %v4102_v36 = vld [vmem:[%s5644_s3] ss:$0 sm:$0xff] }
   0xf   : > { %s3918_s28 = scalar_lea.vmem %s5641_s0, %s3345_s25  ;;  %1079 = vst.msk [vmem:[#allocation2 + $0x30] sm:$0xff] %vm1071_vm1, %v5655_v33  ;;  %1080 = vst.msk [vmem:[#allocation2 + $0x38] sm:$0xff] %vm1071_vm1, %v5655_v33  ;;  %s5480_s15 = scalar_lea.vmem %s5653_s12, %s3345_s25 }
  0x10   : > { %v414_v1 = vld [vmem:[%s3918_s28] sm:$0xff]  ;;  %v415_v2 = vld [vmem:[%s3918_s28 + $0x8] sm:$0xff]  ;;  %v416_v3 = vld [vmem:[%s3918_s28 + $0x10] sm:$0xff]  ;;  %1081 = vst.msk [vmem:[#allocation2 + $0x40] sm:$0x3] %vm1074_vm2, %v5655_v33 }
  0x11   : > { %3425 = vmatprep.mubr.msk.f32.mxu0 %vm447_vm0, %v414_v1  ;;  %v417_v4 = vld [vmem:[%s3918_s28 + $0x18] sm:$0xff]  ;;  %v418_v5 = vld [vmem:[%s3918_s28 + $0x20] sm:$0xff]  ;;  %v419_v6 = vld [vmem:[%s3918_s28 + $0x28] sm:$0xff]  ;;  %1082 = vst.msk [vmem:[#allocation2 + $0x48] sm:$0xff] %vm1071_vm1, %v5655_v33 }
  0x12   : > { %3426 = vmatmul.mubr.msk.f32.vlgmr.msra.gmra.mxu0 %vm447_vm0, %v415_v2  ;;  %v420_v7 = vld [vmem:[%s3918_s28 + $0x30] sm:$0xff]  ;;  %v421_v8 = vld [vmem:[%s3918_s28 + $0x38] sm:$0xff]  ;;  %v422_v9 = vld [vmem:[%s3918_s28 + $0x40] sm:$0xff]  ;;  %1083 = vst.msk [vmem:[#allocation2 + $0x50] sm:$0xff] %vm1071_vm1, %v5655_v33 }
  0x13   : > { %3428 = vmatprep.mubr.msk.f32.mxu0 %vm447_vm0, %v416_v3  ;;  %v423_v10 = vld [vmem:[%s3918_s28 + $0x48] sm:$0xff]  ;;  %v424_v11 = vld [vmem:[%s3918_s28 + $0x50] sm:$0xff]  ;;  %v425_v12 = vld [vmem:[%s3918_s28 + $0x58] sm:$0xff]  ;;  %1084 = vst.msk [vmem:[#allocation2 + $0x58] sm:$0x3] %vm1074_vm2, %v5655_v33 }
  0x14   : > { %v426_v13 = vld [vmem:[%s3918_s28 + $0x60] sm:$0xff]  ;;  %v427_v14 = vld [vmem:[%s3918_s28 + $0x68] sm:$0xff]  ;;  %v428_v15 = vld [vmem:[%s3918_s28 + $0x70] sm:$0xff]  ;;  %1085 = vst.msk [vmem:[#allocation2 + $0x60] sm:$0xff] %vm1071_vm1, %v5655_v33 }
  0x15   : > { %v429_v16 = vld [vmem:[%s3918_s28 + $0x78] sm:$0xff]  ;;  %v430_v17 = vld [vmem:[%s3918_s28 + $0x80] sm:$0xff]  ;;  %v431_v18 = vld [vmem:[%s3918_s28 + $0x88] sm:$0xff]  ;;  %1086 = vst.msk [vmem:[#allocation2 + $0x68] sm:$0xff] %vm1071_vm1, %v5655_v33 }
  0x16   : > { %3429 = vmatmul.mubr.msk.f32.gmra.mxu0 %vm447_vm0, %v417_v4  ;;  %v432_v19 = vld [vmem:[%s3918_s28 + $0x90] sm:$0xff]  ;;  %v433_v20 = vld [vmem:[%s3918_s28 + $0x98] sm:$0xff]  ;;  %v434_v21 = vld [vmem:[%s3918_s28 + $0xa0] sm:$0xff]  ;;  %1087 = vst.msk [vmem:[#allocation2 + $0x70] sm:$0x3] %vm1074_vm2, %v5655_v33 }
  0x17   : > { %3431 = vmatprep.mubr.msk.f32.mxu0 %vm447_vm0, %v418_v5  ;;  %v435_v22 = vld [vmem:[%s3918_s28 + $0xa8] sm:$0xff]  ;;  %v436_v23 = vld [vmem:[%s3918_s28 + $0xb0] sm:$0xff]  ;;  %v437_v24 = vld [vmem:[%s3918_s28 + $0xb8] sm:$0xff]  ;;  %1088 = vst.msk [vmem:[#allocation2 + $0x78] sm:$0xff] %vm1071_vm1, %v5655_v33 }
  0x18   : > { %v438_v25 = vld [vmem:[%s3918_s28 + $0xc0] sm:$0xff]  ;;  %v439_v26 = vld [vmem:[%s3918_s28 + $0xc8] sm:$0xff]  ;;  %v440_v27 = vld [vmem:[%s3918_s28 + $0xd0] sm:$0xff]  ;;  %1089 = vst.msk [vmem:[#allocation2 + $0x80] sm:$0xff] %vm1071_vm1, %v5655_v33 }
  0x19   : > { %v441_v28 = vld [vmem:[%s3918_s28 + $0xd8] sm:$0xff]  ;;  %v442_v29 = vld [vmem:[%s3918_s28 + $0xe0] sm:$0xff]  ;;  %v443_v30 = vld [vmem:[%s3918_s28 + $0xe8] sm:$0xff]  ;;  %1090 = vst.msk [vmem:[#allocation2 + $0x88] sm:$0x3] %vm1074_vm2, %v5655_v33 }
  0x1a   : > { %3432 = vmatmul.mubr.msk.f32.gmra.mxu0 %vm447_vm0, %v419_v6  ;;  %v444_v31 = vld [vmem:[%s3918_s28 + $0xf0] sm:$0xff]  ;;  %v445_v32 = vld [vmem:[%s3918_s28 + $0xf8] sm:$0xff]  ;;  %1091 = vst.msk [vmem:[#allocation2 + $0x90] sm:$0xff] %vm1071_vm1, %v5655_v33  ;;  %1092 = vst.msk [vmem:[#allocation2 + $0x98] sm:$0xff] %vm1071_vm1, %v5655_v33 }
  0x1b   : > { %3434 = vmatprep.mubr.msk.f32.mxu0 %vm447_vm0, %v420_v7  ;;  %1093 = vst.msk [vmem:[#allocation2 + $0xa0] sm:$0x3] %vm1074_vm2, %v5655_v33  ;;  %1096 = vst.msk [vmem:[#allocation2 + $0xb8] sm:$0x3] %vm1074_vm2, %v5655_v33 }
  0x1c   : > { %1094 = vst.msk [vmem:[#allocation2 + $0xa8] sm:$0xff] %vm1071_vm1, %v5655_v33  ;;  %1095 = vst.msk [vmem:[#allocation2 + $0xb0] sm:$0xff] %vm1071_vm1, %v5655_v33 }
  0x1d   : > { %1097 = vst.msk [vmem:[#allocation2 + $0xc0] sm:$0xff] %vm1071_vm1, %v5655_v33  ;;  %1098 = vst.msk [vmem:[#allocation2 + $0xc8] sm:$0xff] %vm1071_vm1, %v5655_v33 }
  0x1e   : > { %3435 = vmatmul.mubr.msk.f32.gmra.mxu0 %vm447_vm0, %v421_v8  ;;  %1099 = vst.msk [vmem:[#allocation2 + $0xd0] sm:$0x3] %vm1074_vm2, %v5655_v33  ;;  %1102 = vst.msk [vmem:[#allocation2 + $0xe8] sm:$0x3] %vm1074_vm2, %v5655_v33 }
  0x1f   : > { %3437 = vmatprep.mubr.msk.f32.mxu0 %vm447_vm0, %v422_v9  ;;  %1100 = vst.msk [vmem:[#allocation2 + $0xd8] sm:$0xff] %vm1071_vm1, %v5655_v33  ;;  %1101 = vst.msk [vmem:[#allocation2 + $0xe0] sm:$0xff] %vm1071_vm1, %v5655_v33 }
  0x20   : > { %1103 = vst.msk [vmem:[#allocation2 + $0xf0] sm:$0xff] %vm1071_vm1, %v5655_v33  ;;  %1104 = vst.msk [vmem:[#allocation2 + $0xf8] sm:$0xff] %vm1071_vm1, %v5655_v33 }
  0x21   : > { %1105 = vst.msk [vmem:[#allocation2 + $0x100] sm:$0x3] %vm1074_vm2, %v5655_v33  ;;  %1108 = vst.msk [vmem:[#allocation2 + $0x118] sm:$0x3] %vm1074_vm2, %v5655_v33 }
  0x22   : > { %3438 = vmatmul.mubr.msk.f32.gmra.mxu0 %vm447_vm0, %v423_v10  ;;  %1106 = vst.msk [vmem:[#allocation2 + $0x108] sm:$0xff] %vm1071_vm1, %v5655_v33  ;;  %1107 = vst.msk [vmem:[#allocation2 + $0x110] sm:$0xff] %vm1071_vm1, %v5655_v33 }
  0x23   : > { %3440 = vmatprep.mubr.msk.f32.mxu0 %vm447_vm0, %v424_v11  ;;  %1109 = vst.msk [vmem:[#allocation2 + $0x120] sm:$0xff] %vm1071_vm1, %v5655_v33  ;;  %1110 = vst.msk [vmem:[#allocation2 + $0x128] sm:$0xff] %vm1071_vm1, %v5655_v33 }
  0x24   : > { %1111 = vst.msk [vmem:[#allocation2 + $0x130] sm:$0x3] %vm1074_vm2, %v5655_v33  ;;  %1114 = vst.msk [vmem:[#allocation2 + $0x148] sm:$0x3] %vm1074_vm2, %v5655_v33 }
  0x25   : > { %1112 = vst.msk [vmem:[#allocation2 + $0x138] sm:$0xff] %vm1071_vm1, %v5655_v33  ;;  %1113 = vst.msk [vmem:[#allocation2 + $0x140] sm:$0xff] %vm1071_vm1, %v5655_v33 }
  0x26   : > { %3441 = vmatmul.mubr.msk.f32.gmra.mxu0 %vm447_vm0, %v425_v12  ;;  %1115 = vst.msk [vmem:[#allocation2 + $0x150] sm:$0xff] %vm1071_vm1, %v5655_v33  ;;  %1116 = vst.msk [vmem:[#allocation2 + $0x158] sm:$0xff] %vm1071_vm1, %v5655_v33 }
  0x27   : > { %3443 = vmatprep.mubr.msk.f32.mxu0 %vm447_vm0, %v426_v13  ;;  %1117 = vst.msk [vmem:[#allocation2 + $0x160] sm:$0x3] %vm1074_vm2, %v5655_v33  ;;  %1120 = vst.msk [vmem:[#allocation2 + $0x178] sm:$0x3] %vm1074_vm2, %v5655_v33 }
  0x28   : > { %1118 = vst.msk [vmem:[#allocation2 + $0x168] sm:$0xff] %vm1071_vm1, %v5655_v33  ;;  %1119 = vst.msk [vmem:[#allocation2 + $0x170] sm:$0xff] %vm1071_vm1, %v5655_v33 }
  0x29   : > { %1121 = vst.msk [vmem:[#allocation2 + $0x180] sm:$0xff] %vm1071_vm1, %v5655_v33  ;;  %1122 = vst.msk [vmem:[#allocation2 + $0x188] sm:$0xff] %vm1071_vm1, %v5655_v33 }
  0x2a   : > { %3444 = vmatmul.mubr.msk.f32.gmra.mxu0 %vm447_vm0, %v427_v14  ;;  %1123 = vst.msk [vmem:[#allocation2 + $0x190] sm:$0x3] %vm1074_vm2, %v5655_v33  ;;  %1126 = vst.msk [vmem:[#allocation2 + $0x1a8] sm:$0x3] %vm1074_vm2, %v5655_v33 }
  0x2b   : > { %3446 = vmatprep.mubr.msk.f32.mxu0 %vm447_vm0, %v428_v15  ;;  %1124 = vst.msk [vmem:[#allocation2 + $0x198] sm:$0xff] %vm1071_vm1, %v5655_v33  ;;  %1125 = vst.msk [vmem:[#allocation2 + $0x1a0] sm:$0xff] %vm1071_vm1, %v5655_v33  ;;  %v1194_v15 = vlaneseq }
  0x2e   : > { %3447 = vmatmul.mubr.msk.f32.gmra.mxu0 %vm447_vm0, %v429_v16 }
  0x2f   : > { %3449 = vmatprep.mubr.msk.f32.mxu0 %vm447_vm0, %v430_v17 }
  0x32   : > { %3450 = vmatmul.mubr.msk.f32.gmra.mxu0 %vm447_vm0, %v431_v18 }
  0x33   : > { %3452 = vmatprep.mubr.msk.f32.mxu0 %vm447_vm0, %v432_v19 }
  0x36   : > { %3453 = vmatmul.mubr.msk.f32.gmra.mxu0 %vm447_vm0, %v433_v20 }
  0x37   : > { %3455 = vmatprep.mubr.msk.f32.mxu0 %vm447_vm0, %v434_v21 }
  0x3a   : > { %3456 = vmatmul.mubr.msk.f32.gmra.mxu0 %vm447_vm0, %v435_v22 }
  0x3b   : > { %3458 = vmatprep.mubr.msk.f32.mxu0 %vm447_vm0, %v436_v23 }
  0x3e   : > { %3459 = vmatmul.mubr.msk.f32.gmra.mxu0 %vm447_vm0, %v437_v24 }
  0x3f   : > { %3461 = vmatprep.mubr.msk.f32.mxu0 %vm447_vm0, %v438_v25 }
  0x42   : > { %3462 = vmatmul.mubr.msk.f32.gmra.mxu0 %vm447_vm0, %v439_v26 }
  0x43   : > { %3464 = vmatprep.mubr.msk.f32.mxu0 %vm447_vm0, %v440_v27  ;;  %v4158_v27 = vshrl.u32 %v1194_v15, 7 }
  0x45   : > { %5680 = vst [vmem:[#allocation3_spill] sm:$0xff] %v4158_v27 }
  0x46   : > { %3465 = vmatmul.mubr.msk.f32.gmra.mxu0 %vm447_vm0, %v441_v28 }
  0x47   : > { %3467 = vmatprep.mubr.msk.f32.mxu0 %vm447_vm0, %v442_v29 }
  0x4a   : > { %3468 = vmatmul.mubr.msk.f32.gmra.mxu0 %vm447_vm0, %v443_v30 }
  0x4b   : > { %3470 = vmatprep.mubr.msk.f32.mxu0 %vm447_vm0, %v444_v31 }
  0x4e   : > { %3471 = vmatmul.mubr.msk.f32.gmra.mxu0 %vm447_vm0, %v445_v32 }
  0xd2   : > { %v3427_v35 = vpop.f32.mrf.mxu0 }
  0xd3   : > { %v777_v37 = vmul.f32 %v3427_v35, %v4097_v34 }
  0xd4   : > { %v610_v38 = vpop.f32.mrf.mxu0 }
  0xd5   : > { %v4106_v39 = vadd.f32 %v4102_v36, %v777_v37  ;;  %v776_v40 = vmul.f32 %v4097_v34, %v610_v38 }
  0xd6   : > { %v3430_v41 = vpop.f32.mrf.mxu0 }
  0xd7   : > { %v3238_v42 = vmul.f32 -1.442695, %v4106_v39  ;;  %v4111_v43 = vadd.f32 %v4102_v36, %v776_v40  ;;  %v779_v44 = vmul.f32 %v3430_v41, %v4097_v34  ;;  %v1296_v40 = vsub.s32 1, %v4158_v27 }
  0xd8   : > { %v620_v45 = vpop.f32.mrf.mxu0  ;;  %v5654_v41 = vsub.s32 0, %v4158_v27 }
  0xd9   : > { %3555 = vpow2.f32 %v3238_v42  ;;  %v3237_v46 = vmul.f32 -1.442695, %v4111_v43  ;;  %v4116_v47 = vadd.f32 %v4102_v36, %v779_v44  ;;  %v778_v48 = vmul.f32 %v4097_v34, %v620_v45  ;;  %v4175_v44 = vld [vmem:[%s5645_s4] sm:$0xff] }
  0xda   : > { %v3433_v49 = vpop.f32.mrf.mxu0 }
  0xdb   : > { %3557 = vpow2.f32 %v3237_v46  ;;  %v3240_v50 = vmul.f32 -1.442695, %v4116_v47  ;;  %v4121_v51 = vadd.f32 %v4102_v36, %v778_v48  ;;  %v781_v52 = vmul.f32 %v3433_v49, %v4097_v34 }
  0xdc   : > { %v630_v53 = vpop.f32.mrf.mxu0  ;;  %v4180_v49 = vrot.slane %v4175_v44, %v1296_v40 }
  0xdd   : > { %3559 = vpow2.f32 %v3240_v50  ;;  %v3239_v54 = vmul.f32 -1.442695, %v4121_v51  ;;  %v4126_v55 = vadd.f32 %v4102_v36, %v781_v52  ;;  %v780_v56 = vmul.f32 %v4097_v34, %v630_v53 }
  0xde   : > { %v3436_v57 = vpop.f32.mrf.mxu0  ;;  %v4185_v50 = vrot.slane %v4175_v44, %v5654_v41  ;;  %v1396_v53 = vsub.s32 2, %v4158_v27 }
  0xdf   : > { %3561 = vpow2.f32 %v3239_v54  ;;  %v3242_v58 = vmul.f32 -1.442695, %v4126_v55  ;;  %v4131_v59 = vadd.f32 %v4102_v36, %v780_v56  ;;  %v783_v63 = vmul.f32 %v3436_v57, %v4097_v34  ;;  %v1162_v54 = vld [vmem:[#allocation2] sm:$0xff] }
  0xe0   : > { %v640_v60 = vpop.f32.mrf.mxu0  ;;  %v1262_v56 = vld [vmem:[#allocation2 + $0x1] sm:$0xff] }
  0xe1   : > { %3563 = vpow2.f32 %v3242_v58  ;;  %v3241_v61 = vmul.f32 -1.442695, %v4131_v59  ;;  %v782_v2 = vmul.f32 %v4097_v34, %v640_v60  ;;  %v4137_v6 = vadd.f32 %v4102_v36, %v783_v63  ;;  %v1263_v58 = vld [vmem:[#allocation2 + $0x9] sm:$0xff] }
  0xe2   : > { %v3439_v62 = vpop.f32.mrf.mxu0 }
  0xe3   : > { %3565 = vpow2.f32 %v3241_v61  ;;  %v785_v7 = vmul.f32 %v3439_v62, %v4097_v34  ;;  %v4142_v12 = vadd.f32 %v4102_v36, %v782_v2  ;;  %v3244_v19 = vmul.f32 -1.442695, %v4137_v6 }
  0xe4   : > { %v650_v0 = vpop.f32.mrf.mxu0  ;;  %v1198_v61 = vmul.f32 %v4185_v50, %v1162_v54  ;;  %v1298_v62 = vmul.f32 %v4180_v49, %v1262_v56 }
  0xe5   : > { %v784_v10 = vmul.f32 %v4097_v34, %v650_v0  ;;  %v4148_v20 = vadd.f32 %v4102_v36, %v785_v7  ;;  %v3243_v25 = vmul.f32 -1.442695, %v4142_v12  ;;  %v1363_v7 = vld [vmem:[#allocation2 + $0xa] sm:$0xff] }
  0xe6   : > { %v3556_v1 = vpop.eup %3555  ;;  %v3442_v3 = vpop.f32.mrf.mxu0 }
  0xe7   : > { %v944_v4 = vadd.f32 1.0, %v3556_v1  ;;  %v787_v13 = vmul.f32 %v3442_v3, %v4097_v34  ;;  %v4152_v23 = vadd.f32 %v4102_v36, %v784_v10  ;;  %v3246_v31 = vmul.f32 -1.442695, %v4148_v20 }
  0xe8   : > { %v3558_v5 = vpop.eup %3557  ;;  %v660_v8 = vpop.f32.mrf.mxu0  ;;  %v4195_v1 = vrot.slane %v4175_v44, %v1396_v53  ;;  %v1299_v3 = vmul.f32 %v4180_v49, %v1263_v58  ;;  %v1797_v58 = vsub.s32 6, %v4158_v27 }
  0xe9   : > { %3567 = vrcp.f32 %v944_v4  ;;  %v943_v9 = vadd.f32 1.0, %v3558_v5  ;;  %v786_v17 = vmul.f32 %v4097_v34, %v660_v8  ;;  %v4156_v26 = vadd.f32 %v4102_v36, %v787_v13  ;;  %v1362_v5 = vld [vmem:[#allocation2 + $0x2] sm:$0xff] }
  0xea   : > { %v3560_v11 = vpop.eup %3559  ;;  %v3445_v14 = vpop.f32.mrf.mxu0  ;;  %v3245_v37 = vmul.f32 -1.442695, %v4152_v23  ;;  %v1330_v13 = vadd.f32 %v1298_v62, %v1198_v61 }
  0xeb   : > { %3569 = vrcp.f32 %v943_v9  ;;  %v946_v16 = vadd.f32 1.0, %v3560_v11  ;;  %v789_v21 = vmul.f32 %v3445_v14, %v4097_v34  ;;  %v4161_v29 = vadd.f32 %v4102_v36, %v786_v17 }
  0xec   : > { %v3562_v18 = vpop.eup %3561  ;;  %v3248_v38 = vmul.f32 -1.442695, %v4156_v26  ;;  %v670_v10 = vpop.f32.mrf.mxu0  ;;  %v1596_v11 = vsub.s32 4, %v4158_v27  ;;  %v1398_v17 = vmul.f32 %v4195_v1, %v1362_v5 }
  0xed   : > { %3571 = vrcp.f32 %v946_v16  ;;  %v945_v22 = vadd.f32 1.0, %v3562_v18  ;;  %v4165_v32 = vadd.f32 %v4102_v36, %v789_v21  ;;  %v3247_v42 = vmul.f32 -1.442695, %v4161_v29 }
  0xee   : > { %v3564_v24 = vpop.eup %3563  ;;  %v1399_v18 = vmul.f32 %v4195_v1, %v1363_v7 }
  0xef   : > { %3573 = vrcp.f32 %v945_v22  ;;  %v948_v28 = vadd.f32 1.0, %v3564_v24  ;;  %v3250_v45 = vmul.f32 -1.442695, %v4165_v32  ;;  %v1696_v22 = vsub.s32 5, %v4158_v27 }
  0xf0   : > { %v3566_v30 = vpop.eup %3565  ;;  %3575 = vpow2.f32 %v3244_v19 }
  0xf1   : > { %3577 = vrcp.f32 %v948_v28  ;;  %v947_v35 = vadd.f32 1.0, %v3566_v30 }
  0xf2   : > { %3579 = vpow2.f32 %v3243_v25 }
  0xf3   : > { %3581 = vrcp.f32 %v947_v35 }
  0xf4   : > { %3583 = vpow2.f32 %v3246_v31  ;;  %v3448_v31 = vpop.f32.mrf.mxu0 }
  0xf5   : > { %3585 = vpow2.f32 %v3245_v37  ;;  %v4214_v37 = vrot.slane %v4175_v44, %v1596_v11 }
  0xf6   : > { %v3568_v46 = vpop.eup %3567  ;;  %3587 = vpow2.f32 %v3248_v38 }
  0xf7   : > { %v1040_v48 = vmul.f32 %v3568_v46, %v4106_v39  ;;  %3589 = vpow2.f32 %v3247_v42  ;;  %v1163_v39 = vld [vmem:[#allocation2 + $0x8] sm:$0xff] }
  0xf8   : > { %v3570_v52 = vpop.eup %3569  ;;  %3591 = vpow2.f32 %v3250_v45  ;;  %v1199_v2 = vmul.f32 %v4185_v50, %v1163_v39 }
  0xf9   : > { %1129 = vst.msk [vmem:[#allocation2 + $0x21] sm:$0xff] %vm1071_vm1, %v1040_v48  ;;  %v1039_v57 = vmul.f32 %v3570_v52, %v4111_v43  ;;  %v1496_v43 = vsub.s32 3, %v4158_v27  ;;  %v1430_v48 = vadd.f32 %v1398_v17, %v1330_v13 }
  0xfa   : > { %v3572_v60 = vpop.eup %3571  ;;  %v1331_v16 = vadd.f32 %v1299_v3, %v1199_v2  ;;  %v680_v2 = vpop.f32.mrf.mxu0 }
  0xfb   : > { %1128 = vst.msk [vmem:[#allocation2 + $0x19] sm:$0xff] %vm1071_vm1, %v1039_v57  ;;  %v1042_v63 = vmul.f32 %v3572_v60, %v4116_v47  ;;  %v4208_v19 = vrot.slane %v4175_v44, %v1496_v43 }
  0xfc   : > { %v3574_v0 = vpop.eup %3573  ;;  %v1431_v52 = vadd.f32 %v1399_v18, %v1331_v16  ;;  %v3451_v16 = vpop.f32.mrf.mxu0  ;;  %v4234_v18 = vrot.slane %v4175_v44, %v1696_v22 }
  0xfd   : > { %v3576_v4 = vpop.eup %3575  ;;  %1131 = vst.msk [vmem:[#allocation2 + $0x39] sm:$0xff] %vm1071_vm1, %v1042_v63  ;;  %v1041_v8 = vmul.f32 %v3574_v0, %v4121_v51  ;;  %v788_v0 = vmul.f32 %v4097_v34, %v670_v10 }
  0xfe   : > { %v3578_v9 = vpop.eup %3577  ;;  %v950_v30 = vadd.f32 1.0, %v3576_v4  ;;  %v791_v4 = vmul.f32 %v3448_v31, %v4097_v34 }
  0xff   : > { %v3580_v47 = vpop.eup %3579  ;;  %1130 = vst.msk [vmem:[#allocation2 + $0x31] sm:$0xff] %vm1071_vm1, %v1041_v8  ;;  %v1044_v14 = vmul.f32 %v3578_v9, %v4126_v55 }
 0x100   : > { %v3582_v15 = vpop.eup %3581  ;;  %v949_v42 = vadd.f32 1.0, %v3580_v47  ;;  %v1265_v56 = vld [vmem:[#allocation2 + $0x21] sm:$0xff]  ;;  %3593 = vrcp.f32 %v950_v30 }
 0x101   : > { %v3584_v51 = vpop.eup %3583  ;;  %1133 = vst.msk [vmem:[#allocation2 + $0x51] sm:$0xff] %vm1071_vm1, %v1044_v14  ;;  %v1043_v55 = vmul.f32 %v3582_v15, %v4131_v59  ;;  %v1301_v5 = vmul.f32 %v4180_v49, %v1265_v56  ;;  %v1365_v9 = vld [vmem:[#allocation2 + $0x22] sm:$0xff]  ;;  %v4230_v15 = vadd.f32 %v4102_v36, %v788_v0  ;;  %v1599_v17 = vmul.f32 %v4214_v37, %v1265_v56 }
 0x102   : > { %v3586_v21 = vpop.eup %3585  ;;  %v1164_v24 = vld [vmem:[#allocation2 + $0x18] sm:$0xff]  ;;  %v1165_v25 = vld [vmem:[#allocation2 + $0x20] sm:$0xff]  ;;  %v952_v59 = vadd.f32 1.0, %v3584_v51  ;;  %3595 = vrcp.f32 %v949_v42  ;;  %v1897_v51 = vsub.s32 7, %v4158_v27 }
 0x103   : > { %v1264_v28 = vld [vmem:[#allocation2 + $0x19] sm:$0xff]  ;;  %v3588_v35 = vpop.eup %3587  ;;  %v1200_v38 = vmul.f32 %v4185_v50, %v1164_v24  ;;  %v1498_v53 = vmul.f32 %v4208_v19, %v1164_v24  ;;  %1132 = vst.msk [vmem:[#allocation2 + $0x49] sm:$0xff] %vm1071_vm1, %v1043_v55  ;;  %v1499_v39 = vmul.f32 %v4208_v19, %v1165_v25  ;;  %v951_v60 = vadd.f32 1.0, %v3586_v21 }
 0x104   : > { %v1300_v40 = vmul.f32 %v4180_v49, %v1264_v28  ;;  %v3590_v45 = vpop.eup %3589  ;;  %v1364_v46 = vld [vmem:[#allocation2 + $0x1a] sm:$0xff]  ;;  %v1201_v61 = vmul.f32 %v4185_v50, %v1165_v25  ;;  %v954_v63 = vadd.f32 1.0, %v3588_v35  ;;  %3597 = vrcp.f32 %v952_v59 }
 0x105   : > { %v3592_v54 = vpop.eup %3591  ;;  %v1400_v3 = vmul.f32 %v4195_v1, %v1364_v46  ;;  %v953_v43 = vadd.f32 1.0, %v3590_v45  ;;  %v1530_v7 = vadd.f32 %v1498_v53, %v1430_v48  ;;  %v1531_v11 = vadd.f32 %v1499_v39, %v1431_v52  ;;  %v690_v48 = vpop.f32.mrf.mxu0  ;;  %v1267_v39 = vld [vmem:[#allocation2 + $0x39] sm:$0xff] }
 0x106   : > { %v1332_v57 = vadd.f32 %v1300_v40, %v1200_v38  ;;  %v1166_v62 = vld [vmem:[#allocation2 + $0x30] sm:$0xff]  ;;  %v956_v8 = vadd.f32 1.0, %v3592_v54  ;;  %3599 = vrcp.f32 %v951_v60  ;;  %v1333_v14 = vadd.f32 %v1301_v5, %v1201_v61  ;;  %v1167_v21 = vld [vmem:[#allocation2 + $0x38] sm:$0xff] }
 0x107   : > { %v1500_v13 = vmul.f32 %v4208_v19, %v1166_v62  ;;  %v1598_v10 = vmul.f32 %v4214_v37, %v1264_v28  ;;  %3601 = vrcp.f32 %v954_v63  ;;  %v1401_v24 = vmul.f32 %v4195_v1, %v1365_v9  ;;  %v1266_v55 = vld [vmem:[#allocation2 + $0x31] sm:$0xff] }
 0x108   : > { %v1432_v47 = vadd.f32 %v1400_v3, %v1332_v57  ;;  %3603 = vrcp.f32 %v953_v43  ;;  %v790_v28 = vmul.f32 %v4097_v34, %v680_v2  ;;  %v1631_v30 = vadd.f32 %v1599_v17, %v1531_v11  ;;  %v1366_v54 = vld [vmem:[#allocation2 + $0x32] sm:$0xff]  ;;  %v1367_v43 = vld [vmem:[#allocation2 + $0x3a] sm:$0xff] }
 0x109   : > { %v1630_v25 = vadd.f32 %v1598_v10, %v1530_v7  ;;  %3605 = vrcp.f32 %v956_v8  ;;  %v4240_v35 = vrot.slane %v4175_v44, %v1797_v58  ;;  %v4243_v38 = vadd.f32 %v4102_v36, %v791_v4 }
 0x10a   : > { %v1532_v31 = vadd.f32 %v1500_v13, %v1432_v47  ;;  %v1698_v22 = vmul.f32 %v4234_v18, %v1364_v46  ;;  %v1433_v40 = vadd.f32 %v1401_v24, %v1333_v14  ;;  %v1501_v42 = vmul.f32 %v4208_v19, %v1167_v21  ;;  %v4267_v11 = vld [vmem:[#allocation2 + $0x48] sm:$0xff] }
 0x10b   : > { %v3249_v45 = vmul.f32 -1.442695, %v4230_v15  ;;  %v1699_v52 = vmul.f32 %v4234_v18, %v1365_v9  ;;  %v1600_v53 = vmul.f32 %v4214_v37, %v1266_v55  ;;  %v4251_v56 = vadd.f32 %v4102_v36, %v790_v28 }
 0x10c   : > { %v1730_v59 = vadd.f32 %v1698_v22, %v1630_v25  ;;  %v793_v57 = vmul.f32 %v3451_v16, %v4097_v34  ;;  %v4255_v46 = vrot.slane %v4175_v44, %v1897_v51  ;;  %v792_v61 = vmul.f32 %v4097_v34, %v690_v48 }
 0x10d   : > { %v1632_v58 = vadd.f32 %v1600_v53, %v1532_v31  ;;  %v1731_v60 = vadd.f32 %v1699_v52, %v1631_v30  ;;  %v1533_v63 = vadd.f32 %v1501_v42, %v1433_v40  ;;  %v1799_v0 = vmul.f32 %v4240_v35, %v1166_v62  ;;  %v3594_v3 = vpop.eup %3593 }
 0x10e   : > { %3607 = vpow2.f32 %v3249_v45  ;;  %v4260_v2 = vmul.f32 -1.442695, %v4243_v38  ;;  %v1202_v4 = vmul.f32 %v4185_v50, %v1166_v62  ;;  %v1302_v5 = vmul.f32 %v4180_v49, %v1266_v55  ;;  %v4278_v62 = vld [vmem:[%s5645_s4 + $0x8] ss:$0 sm:$0xff] }
 0x10f   : > { %v1700_v44 = vmul.f32 %v4234_v18, %v1366_v54  ;;  %v1800_v7 = vmul.f32 %v4240_v35, %v1167_v21  ;;  %v3596_v8 = vpop.eup %3595  ;;  %v1601_v9 = vmul.f32 %v4214_v37, %v1267_v39  ;;  %v1831_v47 = vadd.f32 %v1799_v0, %v1730_v59 }
 0x110   : > { %v4270_v13 = vmul.f32 -1.442695, %v4251_v56  ;;  %v4273_v14 = vadd.f32 %v4102_v36, %v793_v57  ;;  %v1203_v16 = vmul.f32 %v4185_v50, %v1167_v21  ;;  %v4282_v24 = vadd.f32 %v4102_v36, %v792_v61  ;;  %v1268_v57 = vld [vmem:[#allocation2 + $0x49] sm:$0xff] }
 0x111   : > { %v3598_v10 = vpop.eup %3597  ;;  %v1732_v17 = vadd.f32 %v1700_v44, %v1632_v58  ;;  %v1832_v51 = vadd.f32 %v1800_v7, %v1731_v60  ;;  %v1303_v28 = vmul.f32 %v4180_v49, %v1267_v39  ;;  %v1403_v30 = vmul.f32 %v4195_v1, %v1367_v43  ;;  %v1169_v44 = vld [vmem:[#allocation2 + $0x50] sm:$0xff] }
 0x112   : > { %v1633_v31 = vadd.f32 %v1601_v9, %v1533_v63  ;;  %v1899_v22 = vmul.f32 %v4255_v46, %v1266_v55  ;;  %v1701_v42 = vmul.f32 %v4234_v18, %v1367_v43  ;;  %v1900_v45 = vmul.f32 %v4255_v46, %v1267_v39 }
 0x113   : > { %v3600_v25 = vpop.eup %3599  ;;  %v1334_v48 = vadd.f32 %v1302_v5, %v1202_v4  ;;  %v1801_v21 = vmul.f32 %v4240_v35, %v4267_v11  ;;  %v2000_v53 = vmul.f32 %v4278_v62, %v1367_v43  ;;  %v1046_v58 = vmul.f32 %v3594_v3, %v4137_v6 }
 0x114   : > { %v3602_v40 = vpop.eup %3601  ;;  %v1931_v59 = vadd.f32 %v1899_v22, %v1831_v47  ;;  %v1045_v60 = vmul.f32 %v3596_v8, %v4142_v12  ;;  %v1335_v55 = vadd.f32 %v1303_v28, %v1203_v16  ;;  %v1402_v63 = vmul.f32 %v4195_v1, %v1366_v54  ;;  %v1368_v47 = vld [vmem:[#allocation2 + $0x4a] sm:$0xff] }
 0x115   : > { %v3604_v52 = vpop.eup %3603  ;;  %v1932_v0 = vadd.f32 %v1900_v45, %v1832_v51  ;;  %v1833_v39 = vadd.f32 %v1801_v21, %v1732_v17  ;;  %v1999_v4 = vmul.f32 %v4278_v62, %v1366_v54  ;;  %v1733_v5 = vadd.f32 %v1701_v42, %v1633_v31  ;;  %1135 = vst.msk [vmem:[#allocation2 + $0x69] sm:$0xff] %vm1071_vm1, %v1046_v58  ;;  %v1369_v21 = vld [vmem:[#allocation2 + $0x52] sm:$0xff] }
 0x116   : > { %v3606_v61 = vpop.eup %3605  ;;  %1134 = vst.msk [vmem:[#allocation2 + $0x61] sm:$0xff] %vm1071_vm1, %v1045_v60  ;;  %v1048_v43 = vmul.f32 %v3598_v10, %v4148_v20  ;;  %v1047_v6 = vmul.f32 %v3600_v25, %v4152_v23  ;;  %v1434_v3 = vadd.f32 %v1402_v63, %v1334_v48  ;;  %v1901_v12 = vmul.f32 %v4255_v46, %v1268_v57  ;;  %v4329_v48 = vld [vmem:[%s5647_s6] ss:$0 sm:$0xff] }
 0x117   : > { %v1050_v7 = vmul.f32 %v3602_v40, %v4156_v26  ;;  %v1049_v8 = vmul.f32 %v3604_v52, %v4161_v29  ;;  %v2031_v9 = vadd.f32 %v1999_v4, %v1931_v59  ;;  %v1502_v54 = vmul.f32 %v4208_v19, %v4267_v11  ;;  %v4312_v26 = vld [vmem:[%s5646_s5] ss:$0 sm:$0xff]  ;;  %v1269_v29 = vld [vmem:[#allocation2 + $0x51] sm:$0xff] }
 0x118   : > { %v1802_v16 = vmul.f32 %v4240_v35, %v1169_v44  ;;  %1137 = vst.msk [vmem:[#allocation2 + $0x81] sm:$0xff] %vm1071_vm1, %v1048_v43  ;;  %1136 = vst.msk [vmem:[#allocation2 + $0x79] sm:$0xff] %vm1071_vm1, %v1047_v6  ;;  %v1052_v20 = vmul.f32 %v3606_v61, %v4165_v32  ;;  %v2032_v23 = vadd.f32 %v2000_v53, %v1932_v0  ;;  %v3254_v17 = vmul.f32 -1.442695, %v4273_v14 }
 0x119   : > { %v1933_v10 = vadd.f32 %v1901_v12, %v1833_v39  ;;  %1139 = vst.msk [vmem:[#allocation2 + $0x99] sm:$0xff] %vm1071_vm1, %v1050_v7  ;;  %1138 = vst.msk [vmem:[#allocation2 + $0x91] sm:$0xff] %vm1071_vm1, %v1049_v8  ;;  %v1435_v51 = vadd.f32 %v1403_v30, %v1335_v55  ;;  %v1503_v25 = vmul.f32 %v4208_v19, %v1169_v44  ;;  %3609 = vpow2.f32 %v4260_v2 }
 0x11a   : > { %v1834_v28 = vadd.f32 %v1802_v16, %v1733_v5  ;;  %1141 = vst.msk [vmem:[#allocation2 + $0xb1] sm:$0xff] %vm1071_vm1, %v1052_v20  ;;  %v2001_v31 = vmul.f32 %v4278_v62, %v1368_v47  ;;  %v3253_v22 = vmul.f32 -1.442695, %v4282_v24  ;;  %v2070_v40 = vmul.f32 %v4312_v26, %v2031_v9  ;;  %v3454_v9 = vpop.f32.mrf.mxu0 }
 0x11b   : > { %v3608_v32 = vpop.eup %3607  ;;  %v1902_v42 = vmul.f32 %v4255_v46, %v1269_v29  ;;  %v1534_v45 = vadd.f32 %v1502_v54, %v1434_v3  ;;  %3611 = vpow2.f32 %v4270_v13  ;;  %v2071_v30 = vmul.f32 %v4312_v26, %v2032_v23 }
 0x11c   : > { %v2033_v52 = vadd.f32 %v2001_v31, %v1933_v10  ;;  %3613 = vpow2.f32 %v3254_v17  ;;  %v1535_v2 = vadd.f32 %v1503_v25, %v1435_v51  ;;  %v1602_v53 = vmul.f32 %v4214_v37, %v1268_v57 }
 0x11d   : > { %v1934_v59 = vadd.f32 %v1902_v42, %v1834_v28  ;;  %v1603_v58 = vmul.f32 %v4214_v37, %v1269_v29  ;;  %v1204_v60 = vmul.f32 %v4185_v50, %v4267_v11  ;;  %v1304_v13 = vmul.f32 %v4180_v49, %v1268_v57  ;;  %v1170_v3 = vld [vmem:[#allocation2 + $0x60] sm:$0xff]  ;;  %v1171_v23 = vld [vmem:[#allocation2 + $0x68] sm:$0xff] }
 0x11e   : > { %3615 = vpow2.f32 %v3253_v22  ;;  %v4337_v61 = vadd.f32 %v4329_v48, %v2070_v40  ;;  %v2002_v55 = vmul.f32 %v4278_v62, %v1369_v21  ;;  %v1205_v63 = vmul.f32 %v4185_v50, %v1169_v44  ;;  %v1270_v17 = vld [vmem:[#allocation2 + $0x61] sm:$0xff] }
 0x11f   : > { %v1634_v0 = vadd.f32 %v1602_v53, %v1534_v45  ;;  %v4342_v39 = vadd.f32 %v4329_v48, %v2071_v30  ;;  %v2072_v4 = vmul.f32 %v4312_v26, %v2033_v52  ;;  %v1305_v5 = vmul.f32 %v4180_v49, %v1269_v29 }
 0x120   : > { %v1635_v43 = vadd.f32 %v1603_v58, %v1535_v2  ;;  %v1702_v11 = vmul.f32 %v4234_v18, %v1368_v47  ;;  %v2034_v57 = vadd.f32 %v2002_v55, %v1934_v59  ;;  %v1336_v6 = vadd.f32 %v1304_v13, %v1204_v60  ;;  %v1271_v2 = vld [vmem:[#allocation2 + $0x69] sm:$0xff] }
 0x121   : > { %v3272_v12 = vmul.f32 -1.442695, %v4337_v61  ;;  %v1703_v7 = vmul.f32 %v4234_v18, %v1369_v21  ;;  %v1337_v8 = vadd.f32 %v1305_v5, %v1205_v63  ;;  %v3273_v54 = vmul.f32 -1.442695, %v4342_v39  ;;  %v1370_v63 = vld [vmem:[#allocation2 + $0x62] sm:$0xff] }
 0x122   : > { %v1734_v44 = vadd.f32 %v1702_v11, %v1634_v0  ;;  %v1404_v16 = vmul.f32 %v4195_v1, %v1368_v47  ;;  %v4352_v20 = vadd.f32 %v4329_v48, %v2072_v4  ;;  %v1405_v29 = vmul.f32 %v4195_v1, %v1369_v21 }
 0x123   : > { %v2073_v10 = vmul.f32 %v4312_v26, %v2034_v57  ;;  %v1735_v51 = vadd.f32 %v1703_v7, %v1635_v43  ;;  %v1803_v25 = vmul.f32 %v4240_v35, %v1170_v3  ;;  %v1504_v31 = vmul.f32 %v4208_v19, %v1170_v3 }
 0x124   : > { %v1436_v28 = vadd.f32 %v1404_v16, %v1336_v6  ;;  %v955_v22 = vadd.f32 1.0, %v3608_v32  ;;  %v795_v40 = vmul.f32 %v3454_v9, %v4097_v34  ;;  %3617 = vpow2.f32 %v3272_v12  ;;  %v1371_v12 = vld [vmem:[#allocation2 + $0x6a] sm:$0xff] }
 0x125   : > { %v1437_v47 = vadd.f32 %v1405_v29, %v1337_v8  ;;  %v1804_v45 = vmul.f32 %v4240_v35, %v1171_v23  ;;  %v1835_v30 = vadd.f32 %v1803_v25, %v1734_v44  ;;  %3619 = vpow2.f32 %v3273_v54  ;;  %v4374_v29 = vld [vmem:[#allocation2 + $0x78] sm:$0xff] }
 0x126   : > { %v3610_v42 = vpop.eup %3609  ;;  %v3274_v21 = vmul.f32 -1.442695, %v4352_v20  ;;  %v1206_v53 = vmul.f32 %v4185_v50, %v1170_v3  ;;  %v1306_v59 = vmul.f32 %v4180_v49, %v1270_v17  ;;  %v4364_v32 = vadd.f32 %v4329_v48, %v2073_v10 }
 0x127   : > { %v1207_v60 = vmul.f32 %v4185_v50, %v1171_v23  ;;  %v1836_v13 = vadd.f32 %v1804_v45, %v1735_v51  ;;  %v1903_v55 = vmul.f32 %v4255_v46, %v1270_v17  ;;  %v1505_v0 = vmul.f32 %v4208_v19, %v1171_v23 }
 0x128   : > { %v3612_v52 = vpop.eup %3611  ;;  %v1536_v4 = vadd.f32 %v1504_v31, %v1436_v28  ;;  %3621 = vrcp.f32 %v955_v22  ;;  %v958_v5 = vadd.f32 1.0, %v3610_v42  ;;  %v1307_v11 = vmul.f32 %v4180_v49, %v1271_v2  ;;  %v4377_v28 = vld [vmem:[#allocation2 + $0x80] sm:$0xff] }
 0x129   : > { %v3614_v58 = vpop.eup %3613  ;;  %v1904_v57 = vmul.f32 %v4255_v46, %v1271_v2  ;;  %v1935_v6 = vadd.f32 %v1903_v55, %v1835_v30  ;;  %v957_v3 = vadd.f32 1.0, %v3612_v52  ;;  %3623 = vpow2.f32 %v3274_v21  ;;  %v4388_v55 = vld [vmem:[#allocation2 + $0x79] sm:$0xff] }
 0x12a   : > { %v1338_v7 = vadd.f32 %v1306_v59, %v1206_v53  ;;  %v1604_v8 = vmul.f32 %v4214_v37, %v1270_v17  ;;  %v960_v44 = vadd.f32 1.0, %v3614_v58  ;;  %v3275_v9 = vmul.f32 -1.442695, %v4364_v32 }
 0x12b   : > { %v3616_v43 = vpop.eup %3615  ;;  %v1339_v54 = vadd.f32 %v1307_v11, %v1207_v60  ;;  %v1936_v16 = vadd.f32 %v1904_v57, %v1836_v13  ;;  %v2003_v23 = vmul.f32 %v4278_v62, %v1370_v63  ;;  %v1406_v10 = vmul.f32 %v4195_v1, %v1370_v63 }
 0x12c   : > { %v1537_v51 = vadd.f32 %v1505_v0, %v1437_v47  ;;  %v1636_v25 = vadd.f32 %v1604_v8, %v1536_v4  ;;  %v959_v31 = vadd.f32 1.0, %v3616_v43  ;;  %v1407_v22 = vmul.f32 %v4195_v1, %v1371_v12  ;;  %v4394_v4 = vld [vmem:[#allocation2 + $0x81] sm:$0xff] }
 0x12d   : > { %v2004_v17 = vmul.f32 %v4278_v62, %v1371_v12  ;;  %v2035_v42 = vadd.f32 %v2003_v23, %v1935_v6  ;;  %3625 = vrcp.f32 %v958_v5  ;;  %v1605_v45 = vmul.f32 %v4214_v37, %v1271_v2  ;;  %v4409_v23 = vld [vmem:[#allocation2 + $0x82] sm:$0xff] }
 0x12e   : > { %v1438_v30 = vadd.f32 %v1406_v10, %v1338_v7  ;;  %v1704_v52 = vmul.f32 %v4234_v18, %v1370_v63  ;;  %v1506_v21 = vmul.f32 %v4208_v19, %v4374_v29  ;;  %3627 = vpow2.f32 %v3275_v9  ;;  %v4406_v9 = vld [vmem:[#allocation2 + $0x7a] sm:$0xff] }
 0x12f   : > { %v2036_v47 = vadd.f32 %v2004_v17, %v1936_v16  ;;  %v1439_v53 = vadd.f32 %v1407_v22, %v1339_v54  ;;  %v1507_v59 = vmul.f32 %v4208_v19, %v4377_v28  ;;  %v1637_v58 = vadd.f32 %v1605_v45, %v1537_v51  ;;  %v700_v16 = vpop.f32.mrf.mxu0 }
 0x130   : > { %v1736_v60 = vadd.f32 %v1704_v52, %v1636_v25  ;;  %3629 = vrcp.f32 %v957_v3  ;;  %v2074_v13 = vmul.f32 %v4312_v26, %v2035_v42  ;;  %v4391_v2 = vadd.f32 %v4102_v36, %v795_v40 }
 0x131   : > { %3631 = vrcp.f32 %v960_v44  ;;  %v3618_v63 = vpop.eup %3617  ;;  %v1705_v0 = vmul.f32 %v4234_v18, %v1371_v12  ;;  %v1538_v5 = vadd.f32 %v1506_v21, %v1438_v30  ;;  %v1805_v43 = vmul.f32 %v4240_v35, %v4374_v29 }
 0x132   : > { %3633 = vrcp.f32 %v959_v31  ;;  %v3620_v11 = vpop.eup %3619  ;;  %v2075_v57 = vmul.f32 %v4312_v26, %v2036_v47  ;;  %v1539_v6 = vadd.f32 %v1507_v59, %v1439_v53  ;;  %v1606_v3 = vmul.f32 %v4214_v37, %v4388_v55  ;;  %v4423_v59 = vld [vmem:[#allocation2 + $0x90] sm:$0xff] }
 0x133   : > { %v1737_v7 = vadd.f32 %v1705_v0, %v1637_v58  ;;  %v1837_v40 = vadd.f32 %v1805_v43, %v1736_v60  ;;  %v4402_v44 = vadd.f32 %v4329_v48, %v2074_v13  ;;  %v1607_v12 = vmul.f32 %v4214_v37, %v4394_v4  ;;  %v3457_v58 = vpop.f32.mrf.mxu0  ;;  %v4429_v43 = vld [vmem:[#allocation2 + $0x98] sm:$0xff] }
 0x134   : > { %v3256_v54 = vmul.f32 -1.442695, %v4391_v2  ;;  %v1638_v10 = vadd.f32 %v1606_v3, %v1538_v5  ;;  %v1806_v51 = vmul.f32 %v4240_v35, %v4377_v28  ;;  %v1905_v25 = vmul.f32 %v4255_v46, %v4388_v55 }
 0x135   : > { %v3622_v8 = vpop.eup %3621  ;;  %v2237_v22 = vadd.f32 1.0, %v3618_v63  ;;  %v4416_v17 = vadd.f32 %v4329_v48, %v2075_v57  ;;  %v1639_v42 = vadd.f32 %v1607_v12, %v1539_v6  ;;  %v2238_v45 = vadd.f32 1.0, %v3620_v11 }
 0x136   : > { %v3624_v31 = vpop.eup %3623  ;;  %v1706_v30 = vmul.f32 %v4234_v18, %v4406_v9  ;;  %v1838_v52 = vadd.f32 %v1806_v51, %v1737_v7  ;;  %v1937_v21 = vadd.f32 %v1905_v25, %v1837_v40  ;;  %v3276_v47 = vmul.f32 -1.442695, %v4402_v44  ;;  %v710_v51 = vpop.f32.mrf.mxu0 }
 0x137   : > { %v1707_v53 = vmul.f32 %v4234_v18, %v4409_v23  ;;  %3635 = vpow2.f32 %v3256_v54  ;;  %v2239_v13 = vadd.f32 1.0, %v3624_v31  ;;  %v1906_v63 = vmul.f32 %v4255_v46, %v4394_v4  ;;  %v4434_v54 = vld [vmem:[#allocation2 + $0x91] sm:$0xff] }
 0x138   : > { %v1738_v0 = vadd.f32 %v1706_v30, %v1638_v10  ;;  %v2005_v5 = vmul.f32 %v4278_v62, %v4406_v9  ;;  %3637 = vrcp.f32 %v2237_v22  ;;  %v3277_v11 = vmul.f32 -1.442695, %v4416_v17  ;;  %v4440_v22 = vld [vmem:[#allocation2 + $0x99] sm:$0xff] }
 0x139   : > { %v1739_v57 = vadd.f32 %v1707_v53, %v1639_v42  ;;  %3639 = vrcp.f32 %v2238_v45  ;;  %v1938_v3 = vadd.f32 %v1906_v63, %v1838_v52  ;;  %v1807_v40 = vmul.f32 %v4240_v35, %v4423_v59 }
 0x13a   : > { %v3626_v60 = vpop.eup %3625  ;;  %v2037_v7 = vadd.f32 %v2005_v5, %v1937_v21  ;;  %3641 = vpow2.f32 %v3276_v47  ;;  %v1808_v10 = vmul.f32 %v4240_v35, %v4429_v43  ;;  %v2006_v31 = vmul.f32 %v4278_v62, %v4409_v23 }
 0x13b   : > { %v3628_v6 = vpop.eup %3627  ;;  %3643 = vrcp.f32 %v2239_v13  ;;  %v1839_v42 = vadd.f32 %v1807_v40, %v1738_v0  ;;  %v794_v45 = vmul.f32 %v4097_v34, %v700_v16  ;;  %v797_v47 = vmul.f32 %v3457_v58, %v4097_v34  ;;  %v4450_v0 = vld [vmem:[#allocation2 + $0x92] sm:$0xff]  ;;  %v3460_v58 = vpop.f32.mrf.mxu0 }
 0x13c   : > { %v2240_v52 = vadd.f32 1.0, %v3628_v6  ;;  %3645 = vpow2.f32 %v3277_v11  ;;  %v1840_v21 = vadd.f32 %v1808_v10, %v1739_v57  ;;  %v2038_v53 = vadd.f32 %v2006_v31, %v1938_v3  ;;  %v4455_v6 = vld [vmem:[#allocation2 + $0x9a] sm:$0xff] }
 0x13d   : > { %v3630_v12 = vpop.eup %3629  ;;  %v2076_v63 = vmul.f32 %v4312_v26, %v2037_v7  ;;  %v1907_v13 = vmul.f32 %v4255_v46, %v4434_v54  ;;  %v1051_v5 = vmul.f32 %v3622_v8, %v4230_v15  ;;  %v1908_v41 = vmul.f32 %v4255_v46, %v4440_v22 }
 0x13e   : > { %v3632_v25 = vpop.eup %3631  ;;  %v1054_v16 = vmul.f32 %v3626_v60, %v4243_v38  ;;  %v1053_v11 = vmul.f32 %v3630_v12, %v4251_v56  ;;  %v796_v15 = vmul.f32 %v4097_v34, %v710_v51  ;;  %v1208_v8 = vmul.f32 %v4185_v50, %v4374_v29  ;;  %v720_v12 = vpop.f32.mrf.mxu0 }
 0x13f   : > { %v3634_v30 = vpop.eup %3633  ;;  %v1056_v57 = vmul.f32 %v3632_v25, %v4273_v14  ;;  %v1939_v3 = vadd.f32 %v1907_v13, %v1839_v42  ;;  %1140 = vst.msk [vmem:[#allocation2 + $0xa9] sm:$0xff] %vm1071_vm1, %v1051_v5  ;;  %v1308_v38 = vmul.f32 %v4180_v49, %v4388_v55  ;;  %v1940_v60 = vadd.f32 %v1908_v41, %v1840_v21 }
 0x140   : > { %v1055_v7 = vmul.f32 %v3634_v30, %v4282_v24  ;;  %1143 = vst.msk [vmem:[#allocation2 + $0xc9] sm:$0xff] %vm1071_vm1, %v1054_v16  ;;  %1142 = vst.msk [vmem:[#allocation2 + $0xc1] sm:$0xff] %vm1071_vm1, %v1053_v11  ;;  %3647 = vrcp.f32 %v2240_v52  ;;  %v2077_v56 = vmul.f32 %v4312_v26, %v2038_v53  ;;  %v4469_v14 = vadd.f32 %v4329_v48, %v2076_v63 }
 0x141   : > { %1145 = vst.msk [vmem:[#allocation2 + $0xe1] sm:$0xff] %vm1071_vm1, %v1056_v57  ;;  %v2007_v24 = vmul.f32 %v4278_v62, %v4450_v0  ;;  %v1209_v41 = vmul.f32 %v4185_v50, %v4377_v28  ;;  %v2008_v29 = vmul.f32 %v4278_v62, %v4455_v6  ;;  %v4479_v55 = vadd.f32 %v4102_v36, %v794_v45 }
 0x142   : > { %1144 = vst.msk [vmem:[#allocation2 + $0xd9] sm:$0xff] %vm1071_vm1, %v1055_v7  ;;  %v4482_v40 = vadd.f32 %v4102_v36, %v797_v47  ;;  %v4485_v25 = vadd.f32 %v4102_v36, %v796_v15  ;;  %v799_v31 = vmul.f32 %v3460_v58, %v4097_v34  ;;  %v1309_v28 = vmul.f32 %v4180_v49, %v4394_v4  ;;  %v3463_v4 = vpop.f32.mrf.mxu0 }
 0x143   : > { %v2039_v51 = vadd.f32 %v2007_v24, %v1939_v3  ;;  %v1340_v42 = vadd.f32 %v1308_v38, %v1208_v8  ;;  %v2040_v30 = vadd.f32 %v2008_v29, %v1940_v60  ;;  %v4491_v45 = vadd.f32 %v4329_v48, %v2077_v56 }
 0x144   : > { %v3636_v10 = vpop.eup %3635  ;;  %v3278_v21 = vmul.f32 -1.442695, %v4469_v14  ;;  %v1341_v53 = vadd.f32 %v1309_v28, %v1209_v41  ;;  %v1408_v63 = vmul.f32 %v4195_v1, %v4406_v9  ;;  %v4497_v13 = vmul.f32 -1.442695, %v4479_v55 }
 0x145   : > { %v3638_v52 = vpop.eup %3637  ;;  %v4500_v5 = vmul.f32 -1.442695, %v4482_v40  ;;  %v2078_v11 = vmul.f32 %v4312_v26, %v2039_v51  ;;  %v4504_v57 = vmul.f32 -1.442695, %v4485_v25  ;;  %v4507_v58 = vadd.f32 %v4102_v36, %v799_v31  ;;  %v4537_v31 = vld [vmem:[%s5643_s2] ss:$0 sm:$0xff] }
 0x146   : > { %v3640_v47 = vpop.eup %3639  ;;  %v798_v3 = vmul.f32 %v4097_v34, %v720_v12  ;;  %v1409_v9 = vmul.f32 %v4195_v1, %v4409_v23  ;;  %v1440_v15 = vadd.f32 %v1408_v63, %v1340_v42  ;;  %v1508_v8 = vmul.f32 %v4208_v19, %v4423_v59  ;;  %v730_v12 = vpop.f32.mrf.mxu0 }
 0x147   : > { %v3642_v16 = vpop.eup %3641  ;;  %v2079_v38 = vmul.f32 %v4312_v26, %v2040_v30  ;;  %v4516_v56 = vmul.f32 %v3638_v52, %v4337_v61  ;;  %v4519_v24 = vmul.f32 %v3640_v47, %v4342_v39  ;;  %3649 = vpow2.f32 %v3278_v21 }
 0x148   : > { %v3644_v7 = vpop.eup %3643  ;;  %v3279_v34 = vmul.f32 -1.442695, %v4491_v45  ;;  %v2241_v36 = vadd.f32 1.0, %v3642_v16  ;;  %v1441_v41 = vadd.f32 %v1409_v9, %v1341_v53  ;;  %v1509_v23 = vmul.f32 %v4208_v19, %v4429_v43 }
 0x149   : > { %v3646_v60 = vpop.eup %3645  ;;  %5681 = vst [vmem:[#allocation4_spill] sm:$0xff] %v4516_v56  ;;  %5682 = vst [vmem:[#allocation5_spill] sm:$0xff] %v4519_v24  ;;  %v4524_v29 = vadd.f32 1.0, %v3636_v10  ;;  %v1210_v51 = vmul.f32 %v4185_v50, %v4423_v59  ;;  %v4529_v61 = vadd.f32 %v4329_v48, %v2078_v11  ;;  %v4532_v39 = vmul.f32 -1.442695, %v4507_v58  ;;  %v2438_v10 = vld [vmem:[%s5648_s7 + $0x18] sm:$0xff] }
 0x14a   : > { %v801_v28 = vmul.f32 %v4537_v31, %v3463_v4  ;;  %v2437_v59 = vld [vmem:[%s5648_s7 + $0x10] sm:$0xff]  ;;  %v4547_v42 = vmul.f32 %v3644_v7, %v4352_v20  ;;  %v1310_v30 = vmul.f32 %v4180_v49, %v4434_v54  ;;  %v1540_v52 = vadd.f32 %v1508_v8, %v1440_v15  ;;  %3474 = vmatpush3.msra.mxu0 %v2438_v10  ;;  %v4561_v20 = vld [vmem:[%s5644_s3] ss:$0 sm:$0xff]  ;;  %v2436_v4 = vld [vmem:[%s5648_s7 + $0x8] sm:$0xff]  ;;  %v4572_v15 = vpop.f32.mrf.mxu0 }
 0x14b   : > { %v4552_v21 = vadd.f32 %v4329_v48, %v2079_v38  ;;  %v2365_v47 = vsel %vm1071_vm1, %v4516_v56, 0.0  ;;  %v2366_v53 = vsel %vm1071_vm1, %v4519_v24, 0.0  ;;  %3651 = vpow2.f32 %v3279_v34  ;;  %3475 = vmatprep.subr.mxu0 %v5655_v33 }
 0x14c   : > { %5683 = vst [vmem:[#allocation6_spill] sm:$0xff] %v4547_v42  ;;  %v4564_v63 = vadd.f32 %v4561_v20, %v798_v3  ;;  %v2242_v11 = vadd.f32 1.0, %v3646_v60  ;;  %3653 = vrcp.f32 %v2241_v36  ;;  %v1541_v7 = vadd.f32 %v1509_v23, %v1441_v41  ;;  %3476 = vmatpush3.msra.mxu0 %v2437_v59  ;;  %v2435_v60 = vld [vmem:[%s5648_s7] sm:$0xff] }
 0x14d   : > { %v3648_v16 = vpop.eup %3647  ;;  %v1608_v9 = vmul.f32 %v4214_v37, %v4434_v54  ;;  %v1609_v3 = vmul.f32 %v4214_v37, %v4440_v22  ;;  %v1211_v8 = vmul.f32 %v4185_v50, %v4429_v43  ;;  %v3280_v38 = vmul.f32 -1.442695, %v4529_v61  ;;  %3477 = vmatprep.subr.mxu0 %v5655_v33 }
 0x14e   : > { %v800_v34 = vmul.f32 %v4537_v31, %v730_v12  ;;  %v2368_v54 = vsel %vm1071_vm1, %v4547_v42, 0.0  ;;  %v1342_v36 = vadd.f32 %v1310_v30, %v1210_v51  ;;  %v3281_v23 = vmul.f32 -1.442695, %v4552_v21  ;;  %3478 = vmatpush3.msra.mxu0 %v2436_v4 }
 0x14f   : > { %v1640_v41 = vadd.f32 %v1608_v9, %v1540_v52  ;;  %v2367_v10 = vadd.f32 %v2366_v53, %v2365_v47  ;;  %v4588_v43 = vmul.f32 %v3648_v16, %v4364_v32  ;;  %v1311_v12 = vmul.f32 %v4180_v49, %v4440_v22  ;;  %3479 = vmatprep.subr.mxu0 %v5655_v33  ;;  %v1277_v47 = vld [vmem:[#allocation2 + $0xb1] sm:$0xff]  ;;  %v740_v32 = vpop.f32.mrf.mxu0  ;;  %v1176_v16 = vld [vmem:[#allocation2 + $0xa8] sm:$0xff] }
 0x150   : > { %v4593_v59 = vadd.f32 %v4561_v20, %v801_v28  ;;  %3655 = vrcp.f32 %v2242_v11  ;;  %v1410_v51 = vmul.f32 %v4195_v1, %v4450_v0  ;;  %v1641_v30 = vadd.f32 %v1609_v3, %v1541_v7  ;;  %v1377_v53 = vld [vmem:[#allocation2 + $0xb2] sm:$0xff]  ;;  %3480 = vmatpush3.msra.mxu0 %v2435_v60 }
 0x151   : > { %5684 = vst [vmem:[#allocation7_spill] sm:$0xff] %v4588_v43  ;;  %v1708_v52 = vmul.f32 %v4234_v18, %v4450_v0  ;;  %v2369_v4 = vadd.f32 %v2368_v54, %v2367_v10  ;;  %v1411_v22 = vmul.f32 %v4195_v1, %v4455_v6  ;;  %v1709_v28 = vmul.f32 %v4234_v18, %v4455_v6  ;;  %v1177_v54 = vld [vmem:[#allocation2 + $0xb0] sm:$0xff] }
 0x152   : > { %5685 = vst [vmem:[#allocation8_spill] sm:$0xff] %v4593_v59  ;;  %3657 = vpow2.f32 %v3280_v38  ;;  %v1343_v11 = vadd.f32 %v1311_v12, %v1211_v8  ;;  %v1442_v9 = vadd.f32 %v1410_v51, %v1342_v36  ;;  %v2370_v0 = vsel %vm1071_vm1, %v4588_v43, 0.0  ;;  %v1276_v8 = vld [vmem:[#allocation2 + $0xa9] sm:$0xff] }
 0x153   : > { %v1740_v33 = vadd.f32 %v1708_v52, %v1640_v41  ;;  %3659 = vpow2.f32 %v3281_v23  ;;  %v4607_v7 = vmul.f32 %v4180_v49, %v1277_v47  ;;  %v4610_v3 = vmul.f32 %v4195_v1, %v1377_v53  ;;  %v3469_v23 = vpop.f32.mrf.mxu0 }
 0x154   : > { %v4613_v60 = vmul.f32 %v4214_v37, %v1277_v47  ;;  %v3650_v6 = vpop.eup %3649  ;;  %v4616_v38 = vmul.f32 %v4234_v18, %v1377_v53  ;;  %v1741_v36 = vadd.f32 %v1709_v28, %v1641_v30  ;;  %v1809_v41 = vmul.f32 %v4240_v35, %v1176_v16 }
 0x155   : > { %3661 = vrcp.f32 %v4524_v29  ;;  %v4620_v10 = vadd.f32 %v2370_v0, %v2369_v4  ;;  %v1910_v12 = vmul.f32 %v4255_v46, %v1277_v47  ;;  %v3259_v51 = vmul.f32 -1.442695, %v4564_v63 }
 0x156   : > { %3663 = vpow2.f32 %v4497_v13  ;;  %v1810_v52 = vmul.f32 %v4240_v35, %v1177_v54  ;;  %v1841_v43 = vadd.f32 %v1809_v41, %v1740_v33  ;;  %v4628_v30 = vadd.f32 %v4561_v20, %v800_v34  ;;  %v750_v33 = vpop.f32.mrf.mxu0  ;;  %v1376_v41 = vld [vmem:[#allocation2 + $0xaa] sm:$0xff] }
 0x157   : > { %3665 = vpow2.f32 %v4500_v5  ;;  %v2243_v28 = vadd.f32 1.0, %v3650_v6  ;;  %v1212_v29 = vmul.f32 %v4185_v50, %v1176_v16  ;;  %v1312_v4 = vmul.f32 %v4180_v49, %v1276_v8 }
 0x158   : > { %3667 = vpow2.f32 %v4504_v57  ;;  %v3652_v47 = vpop.eup %3651  ;;  %v1510_v13 = vmul.f32 %v4208_v19, %v1176_v16  ;;  %v1842_v0 = vadd.f32 %v1810_v52, %v1741_v36  ;;  %v1909_v42 = vmul.f32 %v4255_v46, %v1276_v8 }
 0x159   : > { %3669 = vpow2.f32 %v4532_v39  ;;  %v3654_v5 = vpop.eup %3653  ;;  %v2010_v34 = vmul.f32 %v4278_v62, %v1377_v53  ;;  %v1443_v6 = vadd.f32 %v1411_v22, %v1343_v11  ;;  %v4638_v24 = vmul.f32 -1.442695, %v4593_v59  ;;  %v4651_v59 = vld [vmem:[#allocation2 + $0xc0] sm:$0xff] }
 0x15a   : > { %3671 = vpow2.f32 %v3259_v51  ;;  %v1511_v57 = vmul.f32 %v4208_v19, %v1177_v54  ;;  %v1941_v56 = vadd.f32 %v1909_v42, %v1841_v43  ;;  %v803_v16 = vmul.f32 %v4537_v31, %v4572_v15  ;;  %v3472_v42 = vpop.f32.mrf.mxu0 }
 0x15b   : > { %v802_v36 = vmul.f32 %v4537_v31, %v740_v32  ;;  %v2244_v52 = vadd.f32 1.0, %v3652_v47  ;;  %3673 = vrcp.f32 %v2243_v28  ;;  %v1344_v39 = vadd.f32 %v1312_v4, %v1212_v29 }
 0x15c   : > { %v4645_v27 = vmul.f32 -1.442695, %v4628_v30  ;;  %v4648_v53 = vmul.f32 %v3654_v5, %v4402_v44  ;;  %v1542_v22 = vadd.f32 %v1510_v13, %v1442_v9  ;;  %v1942_v11 = vadd.f32 %v1910_v12, %v1842_v0 }
 0x15d   : > { %v2009_v51 = vmul.f32 %v4278_v62, %v1376_v41  ;;  %v3656_v43 = vpop.eup %3655  ;;  %v1213_v15 = vmul.f32 %v4185_v50, %v1177_v54  ;;  %v1412_v32 = vmul.f32 %v4195_v1, %v1376_v41  ;;  %v805_v28 = vmul.f32 %v4537_v31, %v3469_v23 }
 0x15e   : > { %5686 = vst [vmem:[#allocation9_spill] sm:$0xff] %v4648_v53  ;;  %v804_v29 = vmul.f32 %v4537_v31, %v750_v33  ;;  %v1543_v47 = vadd.f32 %v1511_v57, %v1443_v6  ;;  %v1610_v44 = vmul.f32 %v4214_v37, %v1276_v8  ;;  %v4659_v12 = vadd.f32 %v4561_v20, %v803_v16  ;;  %v760_v6 = vpop.f32.mrf.mxu0 }
 0x15f   : > { %v3658_v4 = vpop.eup %3657  ;;  %v2041_v9 = vadd.f32 %v2009_v51, %v1941_v56  ;;  %3675 = vrcp.f32 %v2244_v52  ;;  %v1444_v0 = vadd.f32 %v1412_v32, %v1344_v39  ;;  %v1512_v54 = vmul.f32 %v4208_v19, %v4651_v59 }
 0x160   : > { %v3660_v13 = vpop.eup %3659  ;;  %v4664_v5 = vadd.f32 %v4561_v20, %v802_v36  ;;  %v4667_v23 = vmul.f32 %v3656_v43, %v4416_v17  ;;  %v2372_v33 = vsel %vm1071_vm1, %v4648_v53, 0.0  ;;  %v1642_v8 = vadd.f32 %v1610_v44, %v1542_v22 }
 0x161   : > { %v2042_v56 = vadd.f32 %v2010_v34, %v1942_v11  ;;  %v2245_v16 = vadd.f32 1.0, %v3658_v4  ;;  %v1345_v52 = vadd.f32 %v4607_v7, %v1213_v15  ;;  %v4673_v39 = vadd.f32 %v4561_v20, %v805_v28  ;;  %v4681_v34 = vld [vmem:[#allocation2 + $0xc9] sm:$0xff]  ;;  %v1278_v11 = vld [vmem:[#allocation2 + $0xc1] sm:$0xff] }
 0x162   : > { %5687 = vst [vmem:[#allocation10_spill] sm:$0xff] %v4667_v23  ;;  %v3662_v57 = vpop.eup %3661  ;;  %v4676_v51 = vmul.f32 %v4537_v31, %v3472_v42  ;;  %v2246_v32 = vadd.f32 1.0, %v3660_v13  ;;  %v1643_v17 = vadd.f32 %v4613_v60, %v1543_v47  ;;  %v1710_v43 = vmul.f32 %v4234_v18, %v1376_v41 }
 0x163   : > { %v3664_v36 = vpop.eup %3663  ;;  %v2080_v22 = vmul.f32 %v4312_v26, %v2041_v9  ;;  %v2373_v7 = vadd.f32 %v2372_v33, %v4620_v10  ;;  %v1544_v15 = vadd.f32 %v1512_v54, %v1444_v0  ;;  %v4685_v28 = vadd.f32 %v4561_v20, %v804_v29  ;;  %v1179_v9 = vld [vmem:[#allocation2 + $0xc8] sm:$0xff] }
 0x164   : > { %v3666_v4 = vpop.eup %3665  ;;  %v4688_v42 = vmul.f32 %v4537_v31, %v760_v6  ;;  %v2374_v60 = vsel %vm1071_vm1, %v4667_v23, 0.0  ;;  %v1742_v41 = vadd.f32 %v1710_v43, %v1642_v8  ;;  %v2081_v47 = vmul.f32 %v4312_v26, %v2042_v56  ;;  %v1378_v33 = vld [vmem:[#allocation2 + $0xc2] sm:$0xff] }
 0x165   : > { %v3668_v44 = vpop.eup %3667  ;;  %v1058_v13 = vmul.f32 %v3662_v57, %v4391_v2  ;;  %3677 = vrcp.f32 %v2245_v16  ;;  %v1912_v10 = vmul.f32 %v4255_v46, %v4681_v34  ;;  %v1612_v29 = vmul.f32 %v4214_v37, %v1278_v11 }
 0x166   : > { %v3670_v53 = vpop.eup %3669  ;;  %v961_v0 = vadd.f32 1.0, %v3664_v36  ;;  %3679 = vrcp.f32 %v2246_v32  ;;  %v4698_v54 = vadd.f32 %v4329_v48, %v2080_v22  ;;  %v1445_v8 = vadd.f32 %v4610_v3, %v1345_v52 }
 0x167   : > { %v3672_v31 = vpop.eup %3671  ;;  %v1743_v56 = vadd.f32 %v4616_v38, %v1643_v17  ;;  %1147 = vst.msk [vmem:[#allocation2 + $0xf9] sm:$0xff] %vm1071_vm1, %v1058_v13  ;;  %v1513_v2 = vmul.f32 %v4208_v19, %v1179_v9  ;;  %v1644_v6 = vadd.f32 %v1612_v29, %v1544_v15  ;;  %v1811_v57 = vmul.f32 %v4240_v35, %v4651_v59 }
 0x168   : > { %v964_v16 = vadd.f32 1.0, %v3666_v4  ;;  %v3674_v36 = vpop.eup %3673  ;;  %v4707_v32 = vadd.f32 %v4329_v48, %v2081_v47  ;;  %v1812_v43 = vmul.f32 %v4240_v35, %v1179_v9  ;;  %v963_v22 = vadd.f32 1.0, %v3668_v44  ;;  %v4714_v4 = vld [vmem:[#allocation2 + $0xd8] sm:$0xff] }
 0x169   : > { %v966_v23 = vadd.f32 1.0, %v3670_v53  ;;  %v1712_v3 = vmul.f32 %v4234_v18, %v1378_v33  ;;  %v1843_v38 = vadd.f32 %v1811_v57, %v1742_v41  ;;  %3681 = vrcp.f32 %v961_v0 }
 0x16a   : > { %v965_v52 = vadd.f32 1.0, %v3672_v31  ;;  %v3282_v17 = vmul.f32 -1.442695, %v4698_v54  ;;  %v1214_v15 = vmul.f32 %v4185_v50, %v4651_v59  ;;  %v1844_v13 = vadd.f32 %v1812_v43, %v1743_v56  ;;  %v1379_v59 = vld [vmem:[#allocation2 + $0xca] sm:$0xff] }
 0x16b   : > { %3683 = vrcp.f32 %v964_v16  ;;  %v1744_v47 = vadd.f32 %v1712_v3, %v1644_v6  ;;  %v1911_v29 = vmul.f32 %v4255_v46, %v1278_v11  ;;  %v4718_v53 = vmul.f32 %v3674_v36, %v4469_v14 }
 0x16c   : > { %3685 = vrcp.f32 %v963_v22  ;;  %v3676_v44 = vpop.eup %3675  ;;  %v3283_v41 = vmul.f32 -1.442695, %v4707_v32  ;;  %v1314_v0 = vmul.f32 %v4180_v49, %v1278_v11  ;;  %v5689_v31 = vmov 0.0  }
 0x16d   : > { %5688 = vst [vmem:[#allocation11_spill] sm:$0xff] %v4718_v53  ;;  %3687 = vrcp.f32 %v966_v23  ;;  %3481 = vmatprep.mubr.msk.f32.mxu0 %vm3833_vm3, %v5689_v31  ;;  %3486 = vmatprep.mubr.msk.f32.mxu1 %vm3833_vm3, %v5689_v31  ;;  %v1545_v56 = vadd.f32 %v1513_v2, %v1445_v8  ;;  %v1943_v6 = vadd.f32 %v1911_v29, %v1843_v38  ;;  %v4729_v23 = vld [vmem:[#allocation2 + $0xd9] sm:$0xff] }
 0x16e   : > { %v1813_v57 = vmul.f32 %v4240_v35, %v4714_v4  ;;  %3689 = vrcp.f32 %v965_v52  ;;  %v2375_v16 = vadd.f32 %v2374_v60, %v2373_v7  ;;  %v1315_v14 = vmul.f32 %v4180_v49, %v4681_v34  ;;  %v1181_v29 = vld [vmem:[#allocation2 + $0xe0] sm:$0xff] }
 0x16f   : > { %v1215_v36 = vmul.f32 %v4185_v50, %v1179_v9  ;;  %v1944_v11 = vadd.f32 %v1912_v10, %v1844_v13  ;;  %3691 = vpow2.f32 %v3282_v17  ;;  %v1613_v43 = vmul.f32 %v4214_v37, %v4681_v34 }
 0x170   : > { %v2011_v8 = vmul.f32 %v4278_v62, %v1378_v33  ;;  %v1845_v2 = vadd.f32 %v1813_v57, %v1744_v47  ;;  %v4735_v22 = vmul.f32 %v3676_v44, %v4491_v45  ;;  %3693 = vpow2.f32 %v3283_v41  ;;  %v4743_v47 = vld [vmem:[#allocation2 + $0xda] sm:$0xff] }
 0x171   : > { %v2012_v7 = vmul.f32 %v4278_v62, %v1379_v59  ;;  %v1346_v60 = vadd.f32 %v1314_v0, %v1214_v15  ;;  %v2376_v9 = vsel %vm1071_vm1, %v4718_v53, 0.0  ;;  %v1645_v10 = vadd.f32 %v1613_v43, %v1545_v56  ;;  %v4766_v43 = vld [vmem:[%s5645_s4 + $0x8] ss:$0 sm:$0xff] }
 0x172   : > { %5690 = vst [vmem:[#allocation12_spill] sm:$0xff] %v4735_v22  ;;  %v2043_v3 = vadd.f32 %v2011_v8, %v1943_v6  ;;  %v1913_v38 = vmul.f32 %v4255_v46, %v4729_v23  ;;  %v3678_v52 = vpop.eup %3677  ;;  %v1347_v34 = vadd.f32 %v1315_v14, %v1215_v36  ;;  %v1414_v17 = vmul.f32 %v4195_v1, %v1378_v33  ;;  %v1281_v36 = vld [vmem:[#allocation2 + $0xe1] sm:$0xff] }
 0x173   : > { %v2044_v13 = vadd.f32 %v2012_v7, %v1944_v11  ;;  %v4746_v45 = vmul.f32 -1.442695, %v4659_v12  ;;  %v3680_v62 = vpop.eup %3679  ;;  %v1713_v15 = vmul.f32 %v4234_v18, %v1379_v59  ;;  %v4750_v41 = vmul.f32 -1.442695, %v4664_v5 }
 0x174   : > { %v1945_v44 = vadd.f32 %v1913_v38, %v1845_v2  ;;  %v4753_v0 = vmul.f32 -1.442695, %v4673_v39  ;;  %v2377_v31 = vadd.f32 %v2376_v9, %v2375_v16  ;;  %v1415_v33 = vmul.f32 %v4195_v1, %v1379_v59 }
 0x175   : > { %v1446_v56 = vadd.f32 %v1414_v17, %v1346_v60  ;;  %v4758_v6 = vadd.f32 %v4561_v20, %v4676_v51  ;;  %v2378_v57 = vsel %vm1071_vm1, %v4735_v22, 0.0  ;;  %v2082_v14 = vmul.f32 %v4312_v26, %v2043_v3 }
 0x176   : > { %v1745_v11 = vadd.f32 %v1713_v15, %v1645_v10  ;;  %v2013_v59 = vmul.f32 %v4766_v43, %v4743_v47  ;;  %v3682_v16 = vpop.eup %3681  ;;  %v2083_v8 = vmul.f32 %v4312_v26, %v2044_v13  ;;  %v1447_v51 = vadd.f32 %v1415_v33, %v1347_v34 }
 0x177   : > { %v1514_v2 = vmul.f32 %v4208_v19, %v4714_v4  ;;  %v1515_v7 = vmul.f32 %v4208_v19, %v1181_v29  ;;  %v4775_v9 = vmul.f32 %v3678_v52, %v4529_v61  ;;  %v1814_v10 = vmul.f32 %v4240_v35, %v1181_v29  ;;  %v1381_v61 = vld [vmem:[#allocation2 + $0xe2] sm:$0xff] }
 0x178   : > { %v3684_v60 = vpop.eup %3683  ;;  %v2045_v3 = vadd.f32 %v2013_v59, %v1945_v44  ;;  %v1057_v38 = vmul.f32 %v3682_v16, %v4479_v55  ;;  %v2379_v15 = vadd.f32 %v2378_v57, %v2377_v31  ;;  %v1914_v22 = vmul.f32 %v4255_v46, %v1281_v36 }
 0x179   : > { %5691 = vst [vmem:[#allocation13_spill] sm:$0xff] %v4775_v9  ;;  %v3686_v17 = vpop.eup %3685  ;;  %v1216_v26 = vmul.f32 %v4185_v50, %v4714_v4  ;;  %v1060_v34 = vmul.f32 %v3684_v60, %v4482_v40  ;;  %v4784_v33 = vadd.f32 %v4329_v48, %v2082_v14  ;;  %v1316_v52 = vmul.f32 %v4180_v49, %v4729_v23 }
 0x17a   : > { %v3688_v13 = vpop.eup %3687  ;;  %v1846_v44 = vadd.f32 %v1814_v10, %v1745_v11  ;;  %1146 = vst.msk [vmem:[#allocation2 + $0xf1] sm:$0xff] %vm1071_vm1, %v1057_v38  ;;  %v1059_v55 = vmul.f32 %v3686_v17, %v4485_v25  ;;  %v4791_v57 = vadd.f32 %v4329_v48, %v2083_v8  ;;  %v1217_v4 = vmul.f32 %v4185_v50, %v1181_v29  ;;  %v4801_v11 = vld [vmem:[%s5646_s5] ss:$0 sm:$0xff] }
 0x17b   : > { %v3690_v31 = vpop.eup %3689  ;;  %v1546_v40 = vadd.f32 %v1514_v2, %v1446_v56  ;;  %1149 = vst.msk [vmem:[#allocation2 + $0x111] sm:$0xff] %vm1071_vm1, %v1060_v34  ;;  %v1062_v14 = vmul.f32 %v3688_v13, %v4507_v58  ;;  %v2380_v59 = vsel %vm1071_vm1, %v4775_v9, 0.0  ;;  %v1547_v16 = vadd.f32 %v1515_v7, %v1447_v51 }
 0x17c   : > { %v2084_v25 = vmul.f32 %v4801_v11, %v2045_v3  ;;  %1148 = vst.msk [vmem:[#allocation2 + $0x109] sm:$0xff] %vm1071_vm1, %v1059_v55  ;;  %v1061_v48 = vmul.f32 %v3690_v31, %v4564_v63  ;;  %v3692_v29 = vpop.eup %3691  ;;  %v1317_v56 = vmul.f32 %v4180_v49, %v1281_v36  ;;  %v1615_v58 = vmul.f32 %v4214_v37, %v1281_v36 }
 0x17d   : > { %v2014_v8 = vmul.f32 %v4766_v43, %v1381_v61  ;;  %v1614_v51 = vmul.f32 %v4214_v37, %v4729_v23  ;;  %1151 = vst.msk [vmem:[#allocation2 + $0x129] sm:$0xff] %vm1071_vm1, %v1062_v14  ;;  %v3694_v2 = vpop.eup %3693  ;;  %v4813_v7 = vmul.f32 %v3680_v62, %v4552_v21  ;;  %v3284_v60 = vmul.f32 -1.442695, %v4784_v33  ;;  %v4823_v21 = vld [vmem:[%s5647_s6] ss:$0 sm:$0xff] }
 0x17e   : > { %v1348_v10 = vadd.f32 %v1316_v52, %v1216_v26  ;;  %v1946_v63 = vadd.f32 %v1914_v22, %v1846_v44  ;;  %1150 = vst.msk [vmem:[#allocation2 + $0x121] sm:$0xff] %vm1071_vm1, %v1061_v48  ;;  %v2381_v3 = vadd.f32 %v2380_v59, %v2379_v15  ;;  %v3285_v36 = vmul.f32 -1.442695, %v4791_v57  ;;  %v1283_v48 = vld [vmem:[#allocation2 + $0xf9] sm:$0xff] }
 0x17f   : > { %5692 = vst [vmem:[#allocation14_spill] sm:$0xff] %v4813_v7  ;;  %v1416_v38 = vmul.f32 %v4195_v1, %v4743_v47  ;;  %v1646_v17 = vadd.f32 %v1614_v51, %v1546_v40  ;;  %v2247_v23 = vadd.f32 1.0, %v3692_v29  ;;  %v1349_v34 = vadd.f32 %v1317_v56, %v1217_v4 }
 0x180   : > { %v1647_v13 = vadd.f32 %v1615_v58, %v1547_v16  ;;  %v4826_v62 = vadd.f32 %v4823_v21, %v2084_v25  ;;  %v2248_v22 = vadd.f32 1.0, %v3694_v2  ;;  %v1417_v15 = vmul.f32 %v4195_v1, %v1381_v61  ;;  %v4842_v2 = vld [vmem:[#allocation2 + $0xfa] sm:$0xff] }
 0x181   : > { %v1715_v26 = vmul.f32 %v4234_v18, %v1381_v61  ;;  %v1714_v52 = vmul.f32 %v4234_v18, %v4743_v47  ;;  %v1182_v44 = vld [vmem:[#allocation2 + $0xf0] sm:$0xff]  ;;  %v2382_v55 = vsel %vm1071_vm1, %v4813_v7, 0.0  ;;  %3695 = vpow2.f32 %v3284_v60  ;;  %v1183_v16 = vld [vmem:[#allocation2 + $0xf8] sm:$0xff] }
 0x182   : > { %v1448_v31 = vadd.f32 %v1416_v38, %v1348_v10  ;;  %v2046_v4 = vadd.f32 %v2014_v8, %v1946_v63  ;;  %v1282_v40 = vld [vmem:[#allocation2 + $0xf1] sm:$0xff]  ;;  %v4834_v14 = vadd.f32 %v2382_v55, %v2381_v3  ;;  %3697 = vpow2.f32 %v3285_v36 }
 0x183   : > { %v1746_v59 = vadd.f32 %v1714_v52, %v1646_v17  ;;  %v1516_v25 = vmul.f32 %v4208_v19, %v1182_v44  ;;  %3699 = vrcp.f32 %v2247_v23  ;;  %v3286_v61 = vmul.f32 -1.442695, %v4826_v62  ;;  %v1382_v17 = vld [vmem:[#allocation2 + $0xf2] sm:$0xff] }
 0x184   : > { %v1449_v47 = vadd.f32 %v1417_v15, %v1349_v34  ;;  %v1747_v29 = vadd.f32 %v1715_v26, %v1647_v13  ;;  %3701 = vrcp.f32 %v2248_v22  ;;  %v1218_v56 = vmul.f32 %v4185_v50, %v1182_v44 }
 0x185   : > { %v1318_v58 = vmul.f32 %v4180_v49, %v1282_v40  ;;  %v3265_v8 = vmul.f32 -1.442695, %v4685_v28  ;;  %v2085_v51 = vmul.f32 %v4801_v11, %v2046_v4  ;;  %v1815_v60 = vmul.f32 %v4240_v35, %v1182_v44  ;;  %v4960_v9 = vld [vmem:[#allocation2 + $0x122] sm:$0xff] }
 0x186   : > { %v1816_v10 = vmul.f32 %v4240_v35, %v1183_v16  ;;  %v3268_v63 = vmul.f32 -1.442695, %v4758_v6  ;;  %v1319_v3 = vmul.f32 %v4180_v49, %v1283_v48  ;;  %v1916_v36 = vmul.f32 %v4255_v46, %v1283_v48 }
 0x187   : > { %v1219_v38 = vmul.f32 %v4185_v50, %v1183_v16  ;;  %v1548_v23 = vadd.f32 %v1516_v25, %v1448_v31  ;;  %3703 = vpow2.f32 %v3286_v61  ;;  %v1847_v34 = vadd.f32 %v1815_v60, %v1746_v59  ;;  %v4857_v31 = vld [vmem:[#allocation2 + $0x108] sm:$0xff] }
 0x188   : > { %v1848_v13 = vadd.f32 %v1816_v10, %v1747_v29  ;;  %v1915_v22 = vmul.f32 %v4255_v46, %v1282_v40  ;;  %v2016_v15 = vmul.f32 %v4766_v43, %v4842_v2  ;;  %v1350_v26 = vadd.f32 %v1318_v58, %v1218_v56  ;;  %v1793_v56 = vld [vmem:[#allocation2 + $0x198] sm:$0xff]  ;;  %v4866_v58 = vld [vmem:[#allocation2 + $0x110] sm:$0xff] }
 0x189   : > { %v1616_v52 = vmul.f32 %v4214_v37, %v1282_v40  ;;  %3705 = vpow2.f32 %v4638_v24  ;;  %v1517_v44 = vmul.f32 %v4208_v19, %v1183_v16  ;;  %v2015_v7 = vmul.f32 %v4766_v43, %v1382_v17 }
 0x18a   : > { %v1947_v55 = vadd.f32 %v1915_v22, %v1847_v34  ;;  %v1948_v4 = vadd.f32 %v1916_v36, %v1848_v13  ;;  %v1351_v59 = vadd.f32 %v1319_v3, %v1219_v38  ;;  %v1418_v25 = vmul.f32 %v4195_v1, %v1382_v17 }
 0x18b   : > { %v1648_v61 = vadd.f32 %v1616_v52, %v1548_v23  ;;  %v4862_v29 = vadd.f32 %v4561_v20, %v4688_v42  ;;  %v1419_v24 = vmul.f32 %v4195_v1, %v4842_v2  ;;  %3707 = vpow2.f32 %v4645_v27 }
 0x18c   : > { %v2047_v40 = vadd.f32 %v2015_v7, %v1947_v55  ;;  %v2048_v16 = vadd.f32 %v2016_v15, %v1948_v4  ;;  %v1450_v60 = vadd.f32 %v1418_v25, %v1350_v26  ;;  %v1716_v10 = vmul.f32 %v4234_v18, %v1382_v17  ;;  %v1794_v7 = vld [vmem:[#allocation2 + $0x1a0] sm:$0xff]  ;;  %v4881_v17 = vld [vmem:[#allocation2 + $0x109] sm:$0xff]  ;;  %v4897_v4 = vld [vmem:[#allocation2 + $0x111] sm:$0xff] }
 0x18d   : > { %v1518_v3 = vmul.f32 %v4208_v19, %v4857_v31  ;;  %3709 = vpow2.f32 %v4746_v45  ;;  %v4874_v20 = vadd.f32 %v4823_v21, %v2085_v51  ;;  %v1549_v42 = vadd.f32 %v1517_v44, %v1449_v47 }
 0x18e   : > { %3711 = vpow2.f32 %v4750_v41  ;;  %v4878_v36 = vmul.f32 %v4240_v35, %v1793_v56  ;;  %v3696_v38 = vpop.eup %3695  ;;  %v1748_v27 = vadd.f32 %v1716_v10, %v1648_v61  ;;  %v2086_v23 = vmul.f32 %v4801_v11, %v2047_v40 }
 0x18f   : > { %5693 = vst [vmem:[#allocation15_spill] sm:$0xff] %v4874_v20  ;;  %v1451_v34 = vadd.f32 %v1419_v24, %v1351_v59  ;;  %v1519_v45 = vmul.f32 %v4208_v19, %v4866_v58  ;;  %v3698_v13 = vpop.eup %3697  ;;  %v1617_v51 = vmul.f32 %v4214_v37, %v1283_v48  ;;  %v2087_v47 = vmul.f32 %v4801_v11, %v2048_v16  ;;  %v4899_v59 = vld [vmem:[#allocation2 + $0x10a] sm:$0xff]  ;;  %v1893_v24 = vld [vmem:[#allocation2 + $0x199] sm:$0xff] }
 0x190   : > { %3713 = vpow2.f32 %v4753_v0  ;;  %v3267_v41 = vmul.f32 -1.442695, %v4862_v29  ;;  %v3700_v22 = vpop.eup %3699  ;;  %v1550_v15 = vadd.f32 %v1518_v3, %v1450_v60  ;;  %v1817_v26 = vmul.f32 %v4240_v35, %v4857_v31 }
 0x191   : > { %3715 = vpow2.f32 %v3265_v8  ;;  %v4892_v52 = vmul.f32 %v4240_v35, %v1794_v7  ;;  %v4894_v44 = vpop.eup %3701  ;;  %v3287_v55 = vmul.f32 -1.442695, %v4874_v20  ;;  %v1649_v48 = vadd.f32 %v1617_v51, %v1549_v42 }
 0x192   : > { %v1618_v0 = vmul.f32 %v4214_v37, %v4881_v17  ;;  %3717 = vpow2.f32 %v3268_v63  ;;  %v4904_v25 = vadd.f32 %v4823_v21, %v2086_v23  ;;  %v1551_v8 = vadd.f32 %v1519_v45, %v1451_v34 }
 0x193   : > { %v1849_v61 = vadd.f32 %v1817_v26, %v1748_v27  ;;  %v1917_v56 = vmul.f32 %v4255_v46, %v4881_v17  ;;  %v2249_v40 = vadd.f32 1.0, %v3696_v38  ;;  %v1717_v16 = vmul.f32 %v4234_v18, %v4842_v2  ;;  %v4917_v38 = vld [vmem:[#allocation2 + $0x112] sm:$0xff] }
 0x194   : > { %5694 = vst [vmem:[#allocation16_spill] sm:$0xff] %v4904_v25  ;;  %v4911_v60 = vadd.f32 %v4823_v21, %v2087_v47  ;;  %3719 = vpow2.f32 %v3267_v41  ;;  %v3704_v10 = vpop.eup %3703  ;;  %v1619_v63 = vmul.f32 %v4214_v37, %v4897_v4  ;;  %v1650_v3 = vadd.f32 %v1618_v0, %v1550_v15 }
 0x195   : > { %v1949_v42 = vadd.f32 %v1917_v56, %v1849_v61  ;;  %v2017_v7 = vmul.f32 %v4766_v43, %v4899_v59  ;;  %v2250_v23 = vadd.f32 1.0, %v3698_v13  ;;  %3721 = vpow2.f32 %v3287_v55  ;;  %v4931_v55 = vld [vmem:[#allocation2 + $0x120] sm:$0xff]  ;;  %v4936_v56 = vld [vmem:[#allocation2 + $0x128] sm:$0xff] }
 0x196   : > { %5695 = vst [vmem:[#allocation17_spill] sm:$0xff] %v4911_v60  ;;  %v3706_v27 = vpop.eup %3705  ;;  %v1749_v34 = vadd.f32 %v1717_v16, %v1649_v48  ;;  %v4920_v2 = vmul.f32 %v4255_v46, %v1893_v24  ;;  %v3288_v45 = vmul.f32 -1.442695, %v4904_v25  ;;  %v1651_v51 = vadd.f32 %v1619_v63, %v1551_v8  ;;  %v4940_v63 = vld [vmem:[#allocation2 + $0x121] sm:$0xff] }
 0x197   : > { %v1718_v47 = vmul.f32 %v4234_v18, %v4899_v59  ;;  %v2049_v41 = vadd.f32 %v2017_v7, %v1949_v42  ;;  %v4926_v15 = vmul.f32 %v3700_v22, %v4698_v54  ;;  %3723 = vrcp.f32 %v2249_v40 }
 0x198   : > { %5696 = vst [vmem:[#allocation18_spill] sm:$0xff] %v4920_v2  ;;  %v3289_v13 = vmul.f32 -1.442695, %v4911_v60  ;;  %v1818_v26 = vmul.f32 %v4240_v35, %v4866_v58  ;;  %v3708_v48 = vpop.eup %3707  ;;  %v1719_v0 = vmul.f32 %v4234_v18, %v4917_v38  ;;  %v968_v24 = vadd.f32 1.0, %v3706_v27 }
 0x199   : > { %5697 = vst [vmem:[#allocation19_spill] sm:$0xff] %v4926_v15  ;;  %v1750_v8 = vadd.f32 %v1718_v47, %v1650_v3  ;;  %v2088_v61 = vmul.f32 %v4801_v11, %v2049_v41  ;;  %3725 = vrcp.f32 %v2250_v23  ;;  %v2251_v22 = vadd.f32 1.0, %v3704_v10  ;;  %v4945_v3 = vld [vmem:[#allocation2 + $0x129] sm:$0xff] }
 0x19a   : > { %v3710_v54 = vpop.eup %3709  ;;  %v1918_v40 = vmul.f32 %v4255_v46, %v4897_v4  ;;  %v1850_v16 = vadd.f32 %v1818_v26, %v1749_v34  ;;  %3727 = vpow2.f32 %v3288_v45  ;;  %v1751_v47 = vadd.f32 %v1719_v0, %v1651_v51 }
 0x19b   : > { %v3712_v42 = vpop.eup %3711  ;;  %v4943_v7 = vadd.f32 %v4823_v21, %v2088_v61  ;;  %v1819_v27 = vmul.f32 %v4240_v35, %v4931_v55  ;;  %3729 = vpow2.f32 %v3289_v13  ;;  %v2018_v10 = vmul.f32 %v4766_v43, %v4917_v38 }
 0x19c   : > { %v1220_v23 = vmul.f32 %v4185_v50, %v4857_v31  ;;  %v1820_v34 = vmul.f32 %v4240_v35, %v4936_v56  ;;  %v1919_v51 = vmul.f32 %v4255_v46, %v4940_v63  ;;  %3731 = vrcp.f32 %v968_v24 }
 0x19d   : > { %5698 = vst [vmem:[#allocation20_spill] sm:$0xff] %v4943_v7  ;;  %v3714_v45 = vpop.eup %3713  ;;  %v3290_v41 = vmul.f32 -1.442695, %v4943_v7  ;;  %v1851_v26 = vadd.f32 %v1819_v27, %v1750_v8  ;;  %v1950_v61 = vadd.f32 %v1918_v40, %v1850_v16  ;;  %v1920_v13 = vmul.f32 %v4255_v46, %v4945_v3  ;;  %v4964_v7 = vld [vmem:[#allocation2 + $0x12a] sm:$0xff] }
 0x19e   : > { %v3716_v0 = vpop.eup %3715  ;;  %v1852_v53 = vadd.f32 %v1820_v34, %v1751_v47  ;;  %v967_v31 = vadd.f32 1.0, %v3708_v48  ;;  %v1320_v25 = vmul.f32 %v4180_v49, %v4881_v17  ;;  %v970_v27 = vadd.f32 1.0, %v3710_v54  ;;  %v1894_v54 = vld [vmem:[#allocation2 + $0x1a1] sm:$0xff] }
 0x19f   : > { %v3718_v60 = vpop.eup %3717  ;;  %3733 = vpow2.f32 %v3290_v41  ;;  %v1951_v8 = vadd.f32 %v1919_v51, %v1851_v26  ;;  %v969_v24 = vadd.f32 1.0, %v3712_v42  ;;  %v972_v40 = vadd.f32 1.0, %v3714_v45  ;;  %v1993_v42 = vld [vmem:[#allocation2 + $0x19a] sm:$0xff] }
 0x1a0   : > { %v1952_v20 = vadd.f32 %v1920_v13, %v1852_v53  ;;  %3735 = vrcp.f32 %v967_v31  ;;  %v2384_v2 = vsel %vm1071_vm1, %v4926_v15, 0.0  ;;  %v1221_v48 = vmul.f32 %v4185_v50, %v4866_v58 }
 0x1a1   : > { %v3720_v16 = vpop.eup %3719  ;;  %v2019_v47 = vmul.f32 %v4766_v43, %v4960_v9  ;;  %3737 = vrcp.f32 %v970_v27  ;;  %v2050_v17 = vadd.f32 %v2018_v10, %v1950_v61  ;;  %v2020_v34 = vmul.f32 %v4766_v43, %v4964_v7 }
 0x1a2   : > { %3739 = vrcp.f32 %v969_v24  ;;  %v971_v53 = vadd.f32 1.0, %v3716_v0  ;;  %v3722_v45 = vpop.eup %3721  ;;  %v1321_v41 = vmul.f32 %v4180_v49, %v4897_v4  ;;  %v974_v51 = vadd.f32 1.0, %v3718_v60 }
 0x1a3   : > { %v2051_v26 = vadd.f32 %v2019_v47, %v1951_v8  ;;  %3741 = vrcp.f32 %v972_v40  ;;  %v1352_v58 = vadd.f32 %v1320_v25, %v1220_v23  ;;  %v2052_v13 = vadd.f32 %v2020_v34, %v1952_v20  ;;  %v1994_v23 = vld [vmem:[#allocation2 + $0x1a2] sm:$0xff] }
 0x1a4   : > { %3743 = vrcp.f32 %v2251_v22  ;;  %v973_v31 = vadd.f32 1.0, %v3720_v16  ;;  %v3724_v27 = vpop.eup %3723  ;;  %v4978_v10 = vmul.f32 %v4894_v44, %v4707_v32  ;;  %v1353_v61 = vadd.f32 %v1321_v41, %v1221_v48  ;;  %v5702_v41 = vld [vmem:[#allocation8_spill] sm:$0xff] }
 0x1a5   : > { %v4981_v0 = vmul.f32 %v4255_v46, %v1894_v54  ;;  %v4984_v24 = vmul.f32 %v4766_v43, %v1993_v42  ;;  %v2385_v4 = vadd.f32 %v2384_v2, %v4834_v14  ;;  %v1420_v60 = vmul.f32 %v4195_v1, %v4899_v59 }
 0x1a6   : > { %5699 = vst [vmem:[#allocation21_spill] sm:$0xff] %v4978_v10  ;;  %v2089_v20 = vmul.f32 %v4801_v11, %v2050_v17  ;;  %3745 = vrcp.f32 %v971_v53  ;;  %v3726_v25 = vpop.eup %3725  ;;  %v2252_v22 = vadd.f32 1.0, %v3722_v45  ;;  %v1421_v32 = vmul.f32 %v4195_v1, %v4917_v38 }
 0x1a7   : > { %v2090_v44 = vmul.f32 %v4801_v11, %v2051_v26  ;;  %3747 = vrcp.f32 %v974_v51  ;;  %v3728_v8 = vpop.eup %3727  ;;  %v1452_v40 = vadd.f32 %v1420_v60, %v1352_v58  ;;  %v1520_v14 = vmul.f32 %v4208_v19, %v4931_v55 }
 0x1a8   : > { %3749 = vrcp.f32 %v973_v31  ;;  %v2091_v59 = vmul.f32 %v4801_v11, %v2052_v13  ;;  %v3730_v2 = vpop.eup %3729  ;;  %v4997_v16 = vmul.f32 %v3724_v27, %v4784_v33  ;;  %v2386_v48 = vsel %vm1071_vm1, %v4978_v10, 0.0 }
 0x1a9   : > { %v1453_v38 = vadd.f32 %v1421_v32, %v1353_v61  ;;  %v1521_v47 = vmul.f32 %v4208_v19, %v4936_v56  ;;  %v3732_v17 = vpop.eup %3731  ;;  %v2387_v34 = vadd.f32 %v2386_v48, %v2385_v4  ;;  %v1222_v53 = vmul.f32 %v4185_v50, %v4931_v55 }
 0x1aa   : > { %5700 = vst [vmem:[#allocation22_spill] sm:$0xff] %v4997_v16  ;;  %v5006_v54 = vmul.f32 %v4766_v43, %v1994_v23  ;;  %v5009_v42 = vadd.f32 %v4823_v21, %v2089_v20  ;;  %v1223_v33 = vmul.f32 %v4185_v50, %v4936_v56  ;;  %v1322_v45 = vmul.f32 %v4180_v49, %v4940_v63 }
 0x1ab   : > { %v1064_v26 = vmul.f32 %v3732_v17, %v5702_v41  ;;  %v5017_v51 = vadd.f32 %v4823_v21, %v2090_v44  ;;  %3751 = vrcp.f32 %v2252_v22  ;;  %v2253_v55 = vadd.f32 1.0, %v3728_v8 }
 0x1ac   : > { %5701 = vst [vmem:[#allocation23_spill] sm:$0xff] %v5009_v42  ;;  %v3734_v58 = vpop.eup %3733  ;;  %v1552_v13 = vadd.f32 %v1520_v14, %v1452_v40  ;;  %v5020_v31 = vadd.f32 %v4823_v21, %v2091_v59  ;;  %v2388_v61 = vsel %vm1071_vm1, %v4997_v16, 0.0  ;;  %v2254_v56 = vadd.f32 1.0, %v3730_v2 }
 0x1ad   : > { %5703 = vst [vmem:[#allocation8_spill] sm:$0xff] %v5017_v51  ;;  %v3736_v27 = vpop.eup %3735  ;;  %v1323_v4 = vmul.f32 %v4180_v49, %v4945_v3  ;;  %v1553_v60 = vadd.f32 %v1521_v47, %v1453_v38  ;;  %1153 = vst.msk [vmem:[#allocation2 + $0x141] sm:$0xff] %vm1071_vm1, %v1064_v26  ;;  %v1621_v22 = vmul.f32 %v4214_v37, %v4945_v3  ;;  %v3291_v23 = vmul.f32 -1.442695, %v5009_v42 }
 0x1ae   : > { %5704 = vst [vmem:[#allocation24_spill] sm:$0xff] %v5020_v31  ;;  %v3738_v20 = vpop.eup %3737  ;;  %v1620_v32 = vmul.f32 %v4214_v37, %v4940_v63  ;;  %v1063_v44 = vmul.f32 %v3736_v27, %v4628_v30  ;;  %v1354_v40 = vadd.f32 %v1322_v45, %v1222_v53  ;;  %v3292_v2 = vmul.f32 -1.442695, %v5017_v51 }
 0x1af   : > { %v3740_v8 = vpop.eup %3739  ;;  %v1355_v14 = vadd.f32 %v1323_v4, %v1223_v33  ;;  %v1066_v59 = vmul.f32 %v3738_v20, %v4659_v12  ;;  %3753 = vrcp.f32 %v2253_v55  ;;  %v3293_v63 = vmul.f32 -1.442695, %v5020_v31 }
 0x1b0   : > { %v3742_v48 = vpop.eup %3741  ;;  %v1652_v38 = vadd.f32 %v1620_v32, %v1552_v13  ;;  %1152 = vst.msk [vmem:[#allocation2 + $0x139] sm:$0xff] %vm1071_vm1, %v1063_v44  ;;  %v1065_v3 = vmul.f32 %v3740_v8, %v4664_v5  ;;  %3755 = vrcp.f32 %v2254_v56  ;;  %v2255_v30 = vadd.f32 1.0, %v3734_v58 }
 0x1b1   : > { %v3744_v47 = vpop.eup %3743  ;;  %v1653_v17 = vadd.f32 %v1621_v22, %v1553_v60  ;;  %1155 = vst.msk [vmem:[#allocation2 + $0x159] sm:$0xff] %vm1071_vm1, %v1066_v59  ;;  %v1068_v53 = vmul.f32 %v3742_v48, %v4673_v39  ;;  %v5041_v12 = vmul.f32 %v3726_v25, %v4791_v57  ;;  %v5043_v33 = vadd.f32 %v2388_v61, %v2387_v34 }
 0x1b2   : > { %v1422_v45 = vmul.f32 %v4195_v1, %v4960_v9  ;;  %1154 = vst.msk [vmem:[#allocation2 + $0x151] sm:$0xff] %vm1071_vm1, %v1065_v3  ;;  %3757 = vpow2.f32 %v3291_v23  ;;  %v1423_v41 = vmul.f32 %v4195_v1, %v4964_v7  ;;  %v1721_v26 = vmul.f32 %v4234_v18, %v4964_v7 }
 0x1b3   : > { %5705 = vst [vmem:[#allocation25_spill] sm:$0xff] %v5043_v33  ;;  %v3746_v5 = vpop.eup %3745  ;;  %v1720_v39 = vmul.f32 %v4234_v18, %v4960_v9  ;;  %1157 = vst.msk [vmem:[#allocation2 + $0x171] sm:$0xff] %vm1071_vm1, %v1068_v53  ;;  %3759 = vpow2.f32 %v3292_v2  ;;  %v5056_v25 = vmul.f32 %v3744_v47, %v4826_v62 }
 0x1b4   : > { %v3748_v57 = vpop.eup %3747  ;;  %v1454_v34 = vadd.f32 %v1422_v45, %v1354_v40  ;;  %v1289_v58 = vld [vmem:[#allocation2 + $0x141] sm:$0xff]  ;;  %v1067_v13 = vmul.f32 %v3746_v5, %v4685_v28  ;;  %3761 = vpow2.f32 %v3293_v63  ;;  %v1455_v7 = vadd.f32 %v1423_v41, %v1355_v14 }
 0x1b5   : > { %5706 = vst [vmem:[#allocation26_spill] sm:$0xff] %v5056_v25  ;;  %v1389_v55 = vld [vmem:[#allocation2 + $0x142] sm:$0xff]  ;;  %v3750_v27 = vpop.eup %3749  ;;  %3763 = vrcp.f32 %v2255_v30  ;;  %v1752_v61 = vadd.f32 %v1720_v39, %v1652_v38  ;;  %v1753_v56 = vadd.f32 %v1721_v26, %v1653_v17  ;;  %v1325_v9 = vmul.f32 %v4180_v49, %v1289_v58 }
 0x1b6   : > { %v1425_v4 = vmul.f32 %v4195_v1, %v1389_v55  ;;  %1156 = vst.msk [vmem:[#allocation2 + $0x169] sm:$0xff] %vm1071_vm1, %v1067_v13  ;;  %v1070_v62 = vmul.f32 %v3748_v57, %v4758_v6  ;;  %v1069_v60 = vmul.f32 %v3750_v27, %v4862_v29  ;;  %v1623_v20 = vmul.f32 %v4214_v37, %v1289_v58 }
 0x1b7   : > { %v5066_v28 = vmul.f32 %v4234_v18, %v1389_v55  ;;  %v1922_v22 = vmul.f32 %v4255_v46, %v1289_v58  ;;  %v5070_v32 = vmul.f32 %v4766_v43, %v1389_v55  ;;  %v1188_v44 = vld [vmem:[#allocation2 + $0x138] sm:$0xff]  ;;  %v1189_v23 = vld [vmem:[#allocation2 + $0x140] sm:$0xff] }
 0x1b8   : > { %v1288_v8 = vld [vmem:[#allocation2 + $0x139] sm:$0xff]  ;;  %v1224_v40 = vmul.f32 %v4185_v50, %v1188_v44  ;;  %v1225_v14 = vmul.f32 %v4185_v50, %v1189_v23  ;;  %v1522_v59 = vmul.f32 %v4208_v19, %v1188_v44  ;;  %1159 = vst.msk [vmem:[#allocation2 + $0x189] sm:$0xff] %vm1071_vm1, %v1070_v62  ;;  %1158 = vst.msk [vmem:[#allocation2 + $0x181] sm:$0xff] %vm1071_vm1, %v1069_v60  ;;  %v5078_v2 = vpop.eup %3751 }
 0x1b9   : > { %v1324_v6 = vmul.f32 %v4180_v49, %v1288_v8  ;;  %v1388_v29 = vld [vmem:[#allocation2 + $0x13a] sm:$0xff]  ;;  %5707 = vst [vmem:[#allocation27_spill] sm:$0xff] %v5078_v2  ;;  %v1523_v38 = vmul.f32 %v4208_v19, %v1189_v23  ;;  %v1622_v3 = vmul.f32 %v4214_v37, %v1288_v8  ;;  %v1821_v45 = vmul.f32 %v4240_v35, %v1188_v44  ;;  %v1190_v62 = vld [vmem:[#allocation2 + $0x150] sm:$0xff] }
 0x1ba   : > { %v1424_v48 = vmul.f32 %v4195_v1, %v1388_v29  ;;  %v1722_v63 = vmul.f32 %v4234_v18, %v1388_v29  ;;  %v1291_v47 = vld [vmem:[#allocation2 + $0x159] sm:$0xff]  ;;  %v1357_v17 = vadd.f32 %v1325_v9, %v1225_v14  ;;  %v1554_v53 = vadd.f32 %v1522_v59, %v1454_v34 }
 0x1bb   : > { %v1356_v30 = vadd.f32 %v1324_v6, %v1224_v40  ;;  %v1391_v5 = vld [vmem:[#allocation2 + $0x15a] sm:$0xff]  ;;  %v1555_v41 = vadd.f32 %v1523_v38, %v1455_v7  ;;  %v1822_v26 = vmul.f32 %v4240_v35, %v1189_v23  ;;  %v1921_v39 = vmul.f32 %v4255_v46, %v1288_v8  ;;  %v1290_v23 = vld [vmem:[#allocation2 + $0x151] sm:$0xff] }
 0x1bc   : > { %v2021_v57 = vmul.f32 %v4766_v43, %v1388_v29  ;;  %v1654_v55 = vadd.f32 %v1622_v3, %v1554_v53  ;;  %v1853_v13 = vadd.f32 %v1821_v45, %v1752_v61  ;;  %v1327_v27 = vmul.f32 %v4180_v49, %v1291_v47  ;;  %v1191_v60 = vld [vmem:[#allocation2 + $0x158] sm:$0xff]  ;;  %v5089_v40 = vpop.eup %3753 }
 0x1bd   : > { %v1456_v58 = vadd.f32 %v1424_v48, %v1356_v30  ;;  %5708 = vst [vmem:[#allocation28_spill] sm:$0xff] %v5089_v40  ;;  %v1655_v34 = vadd.f32 %v1623_v20, %v1555_v41  ;;  %v1854_v9 = vadd.f32 %v1822_v26, %v1753_v56  ;;  %v5092_v44 = vmul.f32 %v4195_v1, %v1391_v5  ;;  %v1390_v8 = vld [vmem:[#allocation2 + $0x152] sm:$0xff]  ;;  %v5097_v14 = vpop.eup %3755  ;;  %v1192_v15 = vld [vmem:[#allocation2 + $0x168] sm:$0xff] }
 0x1be   : > { %v5095_v7 = vmul.f32 %v4214_v37, %v1291_v47  ;;  %5709 = vst [vmem:[#allocation29_spill] sm:$0xff] %v5097_v14  ;;  %v1754_v6 = vadd.f32 %v1722_v63, %v1654_v55  ;;  %v1953_v61 = vadd.f32 %v1921_v39, %v1853_v13  ;;  %v5100_v29 = vmul.f32 %v4234_v18, %v1391_v5  ;;  %v5125_v55 = vld [vmem:[#allocation2 + $0x171] sm:$0xff]  ;;  %v1292_v51 = vld [vmem:[#allocation2 + $0x169] sm:$0xff] }
 0x1bf   : > { %v5103_v59 = vmul.f32 %v4255_v46, %v1291_v47  ;;  %v5105_v20 = vpop.eup %3757  ;;  %v5107_v56 = vadd.f32 %v1922_v22, %v1854_v9  ;;  %v5110_v48 = vmul.f32 %v4766_v43, %v1391_v5  ;;  %v1226_v38 = vmul.f32 %v4185_v50, %v1190_v62  ;;  %v1193_v31 = vld [vmem:[#allocation2 + $0x170] sm:$0xff] }
 0x1c0   : > { %v1227_v3 = vmul.f32 %v4185_v50, %v1191_v60  ;;  %v5114_v30 = vpop.eup %3759  ;;  %v5116_v63 = vadd.f32 %v2021_v57, %v1953_v61  ;;  %v1326_v53 = vmul.f32 %v4180_v49, %v1290_v23  ;;  %v1426_v47 = vmul.f32 %v4195_v1, %v1390_v8  ;;  %v1693_v40 = vld [vmem:[#allocation2 + $0x18a] sm:$0xff] }
 0x1c1   : > { %5710 = vst [vmem:[#allocation30_spill] sm:$0xff] %v5114_v30  ;;  %v1457_v45 = vadd.f32 %v1425_v4, %v1357_v17  ;;  %v5120_v41 = vpop.eup %3761  ;;  %v1524_v26 = vmul.f32 %v4208_v19, %v1190_v62  ;;  %v1525_v5 = vmul.f32 %v4208_v19, %v1191_v60  ;;  %v1624_v39 = vmul.f32 %v4214_v37, %v1290_v23  ;;  %v5132_v17 = vld [vmem:[#allocation2 + $0x172] sm:$0xff]  ;;  %v1692_v30 = vld [vmem:[#allocation2 + $0x182] sm:$0xff] }
 0x1c2   : > { %5711 = vst [vmem:[#allocation31_spill] sm:$0xff] %v5120_v41  ;;  %v1359_v22 = vadd.f32 %v1327_v27, %v1227_v3  ;;  %v5127_v13 = vpop.eup %3763  ;;  %v1358_v57 = vadd.f32 %v1326_v53, %v1226_v38  ;;  %v1724_v9 = vmul.f32 %v4234_v18, %v1390_v8  ;;  %v1755_v61 = vadd.f32 %v5066_v28, %v1655_v34 }
 0x1c3   : > { %5712 = vst [vmem:[#allocation32_spill] sm:$0xff] %v5127_v13  ;;  %v1823_v4 = vmul.f32 %v4240_v35, %v1190_v62  ;;  %v1556_v27 = vadd.f32 %v1524_v26, %v1456_v58  ;;  %v1557_v3 = vadd.f32 %v1525_v5, %v1457_v45  ;;  %v1824_v16 = vmul.f32 %v4240_v35, %v1191_v60  ;;  %v5141_v62 = vld [vmem:[#allocation2 + $0x16a] sm:$0xff]  ;;  %v1492_v45 = vld [vmem:[#allocation2 + $0x180] sm:$0xff] }
 0x1c4   : > { %v1923_v10 = vmul.f32 %v4255_v46, %v1290_v23  ;;  %v1458_v42 = vadd.f32 %v1426_v47, %v1358_v57  ;;  %v5137_v38 = vmul.f32 %v4766_v43, %v1390_v8  ;;  %v1329_v28 = vmul.f32 %v4180_v49, %v5125_v55  ;;  %v1493_v57 = vld [vmem:[#allocation2 + $0x188] sm:$0xff] }
 0x1c5   : > { %v1855_v13 = vadd.f32 %v1823_v4, %v1754_v6  ;;  %v1656_v34 = vadd.f32 %v1624_v39, %v1556_v27  ;;  %v1856_v58 = vadd.f32 %v1824_v16, %v1755_v61  ;;  %v1429_v60 = vmul.f32 %v4195_v1, %v5132_v17  ;;  %v1592_v4 = vld [vmem:[#allocation2 + $0x181] sm:$0xff] }
 0x1c6   : > { %v1627_v23 = vmul.f32 %v4214_v37, %v5125_v55  ;;  %v1228_v6 = vmul.f32 %v4185_v50, %v1192_v15  ;;  %v1229_v8 = vmul.f32 %v4185_v50, %v1193_v31  ;;  %v1328_v47 = vmul.f32 %v4180_v49, %v1292_v51  ;;  %v1593_v49 = vld [vmem:[#allocation2 + $0x189] sm:$0xff] }
 0x1c7   : > { %v5147_v53 = vadd.f32 %v1923_v10, %v1855_v13  ;;  %v1756_v26 = vadd.f32 %v1724_v9, %v1656_v34  ;;  %v1428_v5 = vmul.f32 %v4195_v1, %v5141_v62  ;;  %v1526_v16 = vmul.f32 %v4208_v19, %v1192_v15 }
 0x1c8   : > { %v1527_v39 = vmul.f32 %v4208_v19, %v1193_v31  ;;  %v1360_v61 = vadd.f32 %v1328_v47, %v1228_v6  ;;  %v1626_v10 = vmul.f32 %v4214_v37, %v1292_v51  ;;  %v1726_v13 = vmul.f32 %v4234_v18, %v5141_v62 }
 0x1c9   : > { %v1825_v50 = vmul.f32 %v4240_v35, %v1192_v15  ;;  %v1558_v27 = vadd.f32 %v1526_v16, %v1458_v42  ;;  %v1826_v9 = vmul.f32 %v4240_v35, %v1193_v31  ;;  %v1925_v1 = vmul.f32 %v4255_v46, %v1292_v51 }
 0x1ca   : > { %v1528_v34 = vmul.f32 %v4208_v19, %v1492_v45  ;;  %v1361_v14 = vadd.f32 %v1329_v28, %v1229_v8  ;;  %v1459_v41 = vadd.f32 %v5092_v44, %v1359_v22  ;;  %v1460_v6 = vadd.f32 %v1428_v5, %v1360_v61 }
 0x1cb   : > { %v1529_v47 = vmul.f32 %v4208_v19, %v1493_v57  ;;  %v1628_v2 = vmul.f32 %v4214_v37, %v1592_v4  ;;  %v1629_v15 = vmul.f32 %v4214_v37, %v1593_v49  ;;  %v1657_v42 = vadd.f32 %v5095_v7, %v1557_v3 }
 0x1cc   : > { %v1658_v16 = vadd.f32 %v1626_v10, %v1558_v27  ;;  %v1461_v31 = vadd.f32 %v1429_v60, %v1361_v14  ;;  %v1559_v25 = vadd.f32 %v1527_v39, %v1459_v41  ;;  %v1560_v51 = vadd.f32 %v1528_v34, %v1460_v6 }
 0x1cd   : > { %v1727_v28 = vmul.f32 %v4234_v18, %v5132_v17  ;;  %v1728_v44 = vmul.f32 %v4234_v18, %v1692_v30  ;;  %v1729_v22 = vmul.f32 %v4234_v18, %v1693_v40  ;;  %v1757_v19 = vadd.f32 %v5100_v29, %v1657_v42 }
 0x1ce   : > { %v1758_v8 = vadd.f32 %v1726_v13, %v1658_v16  ;;  %v1561_v5 = vadd.f32 %v1529_v47, %v1461_v31  ;;  %v1659_v61 = vadd.f32 %v1627_v23, %v1559_v25  ;;  %v1660_v33 = vadd.f32 %v1628_v2, %v1560_v51 }
 0x1cf   : > { %v1827_v37 = vmul.f32 %v4240_v35, %v1492_v45  ;;  %v1828_v7 = vmul.f32 %v4240_v35, %v1493_v57  ;;  %v1857_v14 = vadd.f32 %v1825_v50, %v1756_v26  ;;  %v1858_v41 = vadd.f32 %v1826_v9, %v1757_v19 }
 0x1d0   : > { %v1926_v3 = vmul.f32 %v4255_v46, %v5125_v55  ;;  %v1661_v60 = vadd.f32 %v1629_v15, %v1561_v5  ;;  %v1759_v39 = vadd.f32 %v1727_v28, %v1659_v61  ;;  %v1760_v10 = vadd.f32 %v1728_v44, %v1660_v33  ;;  %v5714_v28 = vld [vmem:[#allocation25_spill] sm:$0xff] }
 0x1d1   : > { %v1859_v27 = vadd.f32 %v1827_v37, %v1758_v8  ;;  %v1927_v18 = vmul.f32 %v4255_v46, %v1592_v4  ;;  %v1928_v29 = vmul.f32 %v4255_v46, %v1593_v49  ;;  %v1956_v25 = vadd.f32 %v5103_v59, %v1856_v58  ;;  %v5713_v4 = vld [vmem:[#allocation18_spill] sm:$0xff] }
 0x1d2   : > { %v1957_v2 = vadd.f32 %v1925_v1, %v1857_v14  ;;  %v1761_v23 = vadd.f32 %v1729_v22, %v1661_v60  ;;  %v1860_v45 = vadd.f32 %v1828_v7, %v1759_v39  ;;  %v1861_v35 = vadd.f32 %v4878_v36, %v1760_v10  ;;  %v5715_v37 = vld [vmem:[#allocation26_spill] sm:$0xff]  ;;  %v5716_v39 = vld [vmem:[#allocation15_spill] sm:$0xff] }
 0x1d3   : > { %v1958_v26 = vadd.f32 %v1926_v3, %v1858_v41  ;;  %v1959_v57 = vadd.f32 %v1927_v18, %v1859_v27  ;;  %v2025_v55 = vmul.f32 %v4766_v43, %v5141_v62  ;;  %v2026_v33 = vmul.f32 %v4766_v43, %v5132_v17  ;;  %v5717_v10 = vld [vmem:[#allocation27_spill] sm:$0xff] }
 0x1d4   : > { %v2027_v13 = vmul.f32 %v4766_v43, %v1692_v30  ;;  %v1862_v50 = vadd.f32 %v4892_v52, %v1761_v23  ;;  %v1960_v46 = vadd.f32 %v1928_v29, %v1860_v45  ;;  %v1961_v59 = vadd.f32 %v5713_v4, %v1861_v35  ;;  %v5719_v23 = vld [vmem:[#allocation28_spill] sm:$0xff]  ;;  %v5722_v4 = vld [vmem:[#allocation17_spill] sm:$0xff] }
 0x1d5   : > { %v2028_v58 = vmul.f32 %v4766_v43, %v1693_v40  ;;  %v2054_v36 = vadd.f32 %v5070_v32, %v5107_v56  ;;  %v2055_v49 = vadd.f32 %v5137_v38, %v5147_v53  ;;  %v2056_v62 = vadd.f32 %v5110_v48, %v1956_v25 }
 0x1d6   : > { %v2057_v9 = vadd.f32 %v2025_v55, %v1957_v2  ;;  %v1962_v17 = vadd.f32 %v4981_v0, %v1862_v50  ;;  %v2058_v1 = vadd.f32 %v2026_v33, %v1958_v26  ;;  %v2059_v30 = vadd.f32 %v2027_v13, %v1959_v57  ;;  %v5718_v2 = vld [vmem:[#allocation16_spill] sm:$0xff]  ;;  %v5720_v26 = vld [vmem:[#allocation30_spill] sm:$0xff]  ;;  %v5721_v33 = vld [vmem:[#allocation31_spill] sm:$0xff] }
 0x1d7   : > { %v2060_v34 = vadd.f32 %v2028_v58, %v1960_v46  ;;  %v2061_v52 = vadd.f32 %v4984_v24, %v1961_v59  ;;  %v2092_v6 = vmul.f32 %v4801_v11, %v5116_v63  ;;  %v2093_v43 = vmul.f32 %v4801_v11, %v2054_v36  ;;  %v5723_v59 = vld [vmem:[#allocation29_spill] sm:$0xff] }
 0x1d8   : > { %v2094_v32 = vmul.f32 %v4801_v11, %v2055_v49  ;;  %v2062_v40 = vadd.f32 %v5006_v54, %v1962_v17  ;;  %v2095_v56 = vmul.f32 %v4801_v11, %v2056_v62  ;;  %v2096_v48 = vmul.f32 %v4801_v11, %v2057_v9  ;;  %v5724_v62 = vld [vmem:[#allocation20_spill] sm:$0xff] }
 0x1d9   : > { %v2097_v0 = vmul.f32 %v4801_v11, %v2058_v1  ;;  %v2098_v38 = vmul.f32 %v4801_v11, %v2059_v30  ;;  %v2099_v53 = vmul.f32 %v4801_v11, %v2060_v34  ;;  %v5207_v24 = vadd.f32 %v4823_v21, %v2092_v6  ;;  %v5725_v9 = vld [vmem:[#allocation32_spill] sm:$0xff] }
 0x1da   : > { %v2256_v63 = vadd.f32 1.0, %v5105_v20  ;;  %v2100_v47 = vmul.f32 %v4801_v11, %v2061_v52  ;;  %v5212_v15 = vadd.f32 %v4823_v21, %v2093_v43  ;;  %v5215_v54 = vadd.f32 %v4823_v21, %v2094_v32 }
 0x1db   : > { %v5218_v42 = vadd.f32 %v4823_v21, %v2095_v56  ;;  %v2390_v16 = vsel %vm1071_vm1, %v5041_v12, 0.0  ;;  %v2101_v31 = vmul.f32 %v4801_v11, %v2062_v40  ;;  %v5224_v51 = vadd.f32 %v4823_v21, %v2096_v48 }
 0x1dc   : > { %v5227_v20 = vadd.f32 %v4823_v21, %v2097_v0  ;;  %v2391_v44 = vadd.f32 %v2390_v16, %v5714_v28  ;;  %v5231_v22 = vadd.f32 %v4823_v21, %v2098_v38  ;;  %v3294_v19 = vmul.f32 -1.442695, %v5207_v24 }
 0x1dd   : > { %v3295_v8 = vmul.f32 -1.442695, %v5212_v15  ;;  %v5236_v5 = vadd.f32 %v4823_v21, %v2099_v53  ;;  %v3296_v11 = vmul.f32 -1.442695, %v5215_v54  ;;  %v3297_v61 = vmul.f32 -1.442695, %v5218_v42 }
 0x1de   : > { %3765 = vrcp.f32 %v2256_v63  ;;  %v2392_v7 = vsel %vm1071_vm1, %v5715_v37, 0.0  ;;  %v5243_v14 = vadd.f32 %v4823_v21, %v2100_v47  ;;  %v3298_v41 = vmul.f32 -1.442695, %v5224_v51  ;;  %v5726_v47 = vld [vmem:[#allocation23_spill] sm:$0xff] }
 0x1df   : > { %3767 = vpow2.f32 %v3294_v19  ;;  %v5247_v3 = vadd.f32 %v4823_v21, %v2101_v31  ;;  %v3299_v60 = vmul.f32 -1.442695, %v5227_v20  ;;  %v5252_v27 = vmul.f32 %v5717_v10, %v5716_v39 }
 0x1e0   : > { %3769 = vpow2.f32 %v3295_v8  ;;  %v3300_v18 = vmul.f32 -1.442695, %v5231_v22  ;;  %v2393_v29 = vadd.f32 %v2392_v7, %v2391_v44  ;;  %v3301_v25 = vmul.f32 -1.442695, %v5236_v5 }
 0x1e1   : > { %3771 = vpow2.f32 %v3296_v11  ;;  %v5258_v45 = vmul.f32 %v5719_v23, %v5718_v2  ;;  %v3302_v21 = vmul.f32 -1.442695, %v5243_v14  ;;  %v3303_v35 = vmul.f32 -1.442695, %v5247_v3  ;;  %v5728_v2 = vld [vmem:[#allocation24_spill] sm:$0xff] }
 0x1e2   : > { %3773 = vpow2.f32 %v3297_v61  ;;  %v2257_v57 = vadd.f32 1.0, %v5720_v26  ;;  %v2394_v55 = vsel %vm1071_vm1, %v5252_v27, 0.0  ;;  %v2258_v13 = vadd.f32 1.0, %v5721_v33 }
 0x1e3   : > { %3775 = vpow2.f32 %v3298_v41  ;;  %v2395_v50 = vadd.f32 %v2394_v55, %v2393_v29  ;;  %v2396_v46 = vsel %vm1071_vm1, %v5258_v45, 0.0  ;;  %v5270_v58 = vmul.f32 %v5723_v59, %v5722_v4  ;;  %v5727_v29 = vld [vmem:[#allocation8_spill] sm:$0xff] }
 0x1e4   : > { %3777 = vpow2.f32 %v3299_v60  ;;  %v5274_v17 = vmul.f32 %v5725_v9, %v5724_v62 }
 0x1e5   : > { %3779 = vpow2.f32 %v3300_v18  ;;  %v2397_v36 = vadd.f32 %v2396_v46, %v2395_v50  ;;  %v2398_v52 = vsel %vm1071_vm1, %v5270_v58, 0.0 }
 0x1e6   : > { %3781 = vpow2.f32 %v3301_v25  ;;  %v2400_v48 = vsel %vm1071_vm1, %v5274_v17, 0.0 }
 0x1e7   : > { %3783 = vpow2.f32 %v3302_v21  ;;  %v2399_v32 = vadd.f32 %v2398_v52, %v2397_v36 }
 0x1e8   : > { %3785 = vpow2.f32 %v3303_v35 }
 0x1e9   : > { %3787 = vrcp.f32 %v2257_v57  ;;  %v2401_v44 = vadd.f32 %v2400_v48, %v2399_v32 }
 0x1ea   : > { %3789 = vrcp.f32 %v2258_v13 }
 0x1eb   : > { %v3766_v49 = vpop.eup %3765 }
 0x1ec   : > { %v3768_v1 = vpop.eup %3767  ;;  %v5281_v16 = vmul.f32 %v3766_v49, %v5726_v47 }
 0x1ed   : > { %v3770_v30 = vpop.eup %3769  ;;  %v2259_v34 = vadd.f32 1.0, %v3768_v1 }
 0x1ee   : > { %v3772_v6 = vpop.eup %3771  ;;  %v2260_v43 = vadd.f32 1.0, %v3770_v30  ;;  %v2402_v60 = vsel %vm1071_vm1, %v5281_v16, 0.0 }
 0x1ef   : > { %v3774_v40 = vpop.eup %3773  ;;  %v2261_v56 = vadd.f32 1.0, %v3772_v6  ;;  %3791 = vrcp.f32 %v2259_v34  ;;  %v2403_v10 = vadd.f32 %v2402_v60, %v2401_v44 }
 0x1f0   : > { %v3776_v0 = vpop.eup %3775  ;;  %v2262_v38 = vadd.f32 1.0, %v3774_v40  ;;  %3793 = vrcp.f32 %v2260_v43 }
 0x1f1   : > { %v3778_v53 = vpop.eup %3777  ;;  %v2263_v63 = vadd.f32 1.0, %v3776_v0  ;;  %3795 = vrcp.f32 %v2261_v56 }
 0x1f2   : > { %v3780_v31 = vpop.eup %3779  ;;  %v2264_v28 = vadd.f32 1.0, %v3778_v53  ;;  %3797 = vrcp.f32 %v2262_v38 }
 0x1f3   : > { %v3782_v19 = vpop.eup %3781  ;;  %v2265_v8 = vadd.f32 1.0, %v3780_v31  ;;  %3799 = vrcp.f32 %v2263_v63 }
 0x1f4   : > { %v3784_v11 = vpop.eup %3783  ;;  %v2266_v61 = vadd.f32 1.0, %v3782_v19  ;;  %3801 = vrcp.f32 %v2264_v28 }
 0x1f5   : > { %v3786_v7 = vpop.eup %3785  ;;  %v2267_v41 = vadd.f32 1.0, %v3784_v11  ;;  %3803 = vrcp.f32 %v2265_v8 }
 0x1f6   : > { %v3788_v39 = vpop.eup %3787  ;;  %3805 = vrcp.f32 %v2266_v61  ;;  %v2268_v21 = vadd.f32 1.0, %v3786_v7 }
 0x1f7   : > { %v3790_v18 = vpop.eup %3789  ;;  %v5286_v25 = vmul.f32 %v3788_v39, %v5727_v29  ;;  %3807 = vrcp.f32 %v2267_v41 }
 0x1f8   : > { %v5289_v23 = vmul.f32 %v3790_v18, %v5728_v2  ;;  %3809 = vrcp.f32 %v2268_v21  ;;  %v2519_v18 = vld [vmem:[%s5649_s8] sm:$0x3] }
 0x1f9   : > { %v2404_v35 = vsel %vm1071_vm1, %v5286_v25, 0.0  ;;  %3485 = vmatpush3.msk.msra.mxu1 %vm2524_vm4, %v2519_v18  ;;  %v5743_v18 = vld [vmem:[#allocation22_spill] sm:$0xff] }
 0x1fa   : > { %v2405_v26 = vadd.f32 %v2404_v35, %v2403_v10  ;;  %v2406_v57 = vsel %vm1071_vm1, %v5289_v23, 0.0 }
 0x1fc   : > { %v3792_v55 = vpop.eup %3791  ;;  %v2407_v33 = vadd.f32 %v2406_v57, %v2405_v26 }
 0x1fd   : > { %v3794_v13 = vpop.eup %3793  ;;  %v5296_v50 = vmul.f32 %v3792_v55, %v5207_v24 }
 0x1fe   : > { %v3796_v46 = vpop.eup %3795  ;;  %v5299_v4 = vmul.f32 %v3794_v13, %v5212_v15  ;;  %v2642_v13 = vld [vmem:[%s5650_s9 + $0x10] sm:$0xff] }
 0x1ff   : > { %v3798_v59 = vpop.eup %3797  ;;  %v5302_v36 = vmul.f32 %v3796_v46, %v5215_v54  ;;  %v2408_v49 = vsel %vm1071_vm1, %v5296_v50, 0.0  ;;  %v2641_v46 = vld [vmem:[%s5650_s9 + $0x8] sm:$0xff] }
 0x200   : > { %v3800_v62 = vpop.eup %3799  ;;  %v2409_v9 = vadd.f32 %v2408_v49, %v2407_v33  ;;  %v5307_v30 = vmul.f32 %v3798_v59, %v5218_v42  ;;  %v2410_v15 = vsel %vm1071_vm1, %v5299_v4, 0.0  ;;  %v2643_v33 = vld [vmem:[%s5650_s9 + $0x18] sm:$0xff]  ;;  %v2640_v59 = vld [vmem:[%s5650_s9] sm:$0xff] }
 0x201   : > { %v3802_v1 = vpop.eup %3801  ;;  %v5310_v24 = vmul.f32 %v3800_v62, %v5224_v51  ;;  %v2412_v34 = vsel %vm1071_vm1, %v5302_v36, 0.0  ;;  %3489 = vmatprep.subr.mxu1 %v2643_v33 }
 0x202   : > { %v3804_v54 = vpop.eup %3803  ;;  %v2411_v52 = vadd.f32 %v2410_v15, %v2409_v9  ;;  %v5317_v32 = vmul.f32 %v3802_v1, %v5227_v20  ;;  %v2414_v42 = vsel %vm1071_vm1, %v5307_v30, 0.0 }
 0x203   : > { %v3806_v43 = vpop.eup %3805  ;;  %v5320_v40 = vmul.f32 %v3804_v54, %v5231_v22  ;;  %v2416_v51 = vsel %vm1071_vm1, %v5310_v24, 0.0  ;;  %v5729_v54 = vld [vmem:[#allocation3_spill] sm:$0xff] }
 0x204   : > { %v2413_v6 = vadd.f32 %v2412_v34, %v2411_v52  ;;  %v3808_v56 = vpop.eup %3807  ;;  %v5327_v38 = vmul.f32 %v3806_v43, %v5236_v5  ;;  %v2418_v20 = vsel %vm1071_vm1, %v5317_v32, 0.0  ;;  %v5730_v52 = vsub.s32 0, %v5729_v54  ;;  %v5731_v43 = vld [vmem:[#allocation4_spill] sm:$0xff] }
 0x205   : > { %v5330_v53 = vmul.f32 %v3808_v56, %v5243_v14  ;;  %v2420_v22 = vsel %vm1071_vm1, %v5320_v40, 0.0  ;;  %v3810_v63 = vpop.eup %3809 }
 0x206   : > { %v2415_v48 = vadd.f32 %v2414_v42, %v2413_v6  ;;  %v5337_v28 = vmul.f32 %v3810_v63, %v5247_v3  ;;  %v2422_v44 = vsel %vm1071_vm1, %v5327_v38, 0.0  ;;  %v5735_v63 = vld [vmem:[#allocation9_spill] sm:$0xff] }
 0x207   : > { %v2424_v5 = vsel %vm1071_vm1, %v5330_v53, 0.0 }
 0x208   : > { %v2417_v0 = vadd.f32 %v2416_v51, %v2415_v48  ;;  %v2426_v8 = vsel %vm1071_vm1, %v5337_v28, 0.0  ;;  %v5732_v51 = vld [vmem:[#allocation5_spill] sm:$0xff]  ;;  %v5733_v48 = vld [vmem:[#allocation6_spill] sm:$0xff] }
 0x20a   : > { %v2419_v47 = vadd.f32 %v2418_v20, %v2417_v0  ;;  %v5734_v20 = vld [vmem:[#allocation7_spill] sm:$0xff] }
 0x20c   : > { %v2421_v31 = vadd.f32 %v2420_v22, %v2419_v47 }
 0x20e   : > { %v2423_v14 = vadd.f32 %v2422_v44, %v2421_v31  ;;  %v5736_v31 = vld [vmem:[#allocation10_spill] sm:$0xff] }
 0x210   : > { %v2425_v19 = vadd.f32 %v2424_v5, %v2423_v14  ;;  %v5737_v5 = vld [vmem:[#allocation11_spill] sm:$0xff] }
 0x212   : > { %v2427_v11 = vadd.f32 %v2426_v8, %v2425_v19  ;;  %v5738_v19 = vld [vmem:[#allocation12_spill] sm:$0xff] }
 0x214   : > { %v2428_v61 = vrot.slane %v2427_v11, 4 }
 0x216   : > { %v2429_v7 = vadd.f32 %v2428_v61, %v2427_v11  ;;  %v5739_v11 = vld [vmem:[#allocation13_spill] sm:$0xff] }
 0x218   : > { %v2430_v41 = vrot.slane %v2429_v7, 2 }
 0x21a   : > { %v2431_v60 = vadd.f32 %v2430_v41, %v2429_v7  ;;  %v5740_v7 = vld [vmem:[#allocation14_spill] sm:$0xff] }
 0x21c   : > { %v2432_v39 = vrot.slane %v2431_v60, 1 }
 0x21e   : > { %v2433_v10 = vadd.f32 %v2432_v39, %v2431_v60  ;;  %v5741_v60 = vld [vmem:[#allocation19_spill] sm:$0xff] }
 0x220   : > { %v2434_v3 = vmul.f32 0.00390625, %v2433_v10  ;;  %v5742_v10 = vld [vmem:[#allocation21_spill] sm:$0xff] }
 0x222   : > { %3482 = vmatmul.mubr.msk.f32.vlgmr.msra.gmra.mxu0 %vm1071_vm1, %v2434_v3 }
 0x2e2   : > { %v2508_v29 = vpop.f32.mrf.mxu0 }
 0x2e3   : > { %v3305_v2 = vmul.f32 -1.442695, %v2508_v29 }
 0x2e4   : > { %v3483_v21 = vpop.f32.mrf.mxu0 }
 0x2e5   : > { %3811 = vpow2.f32 %v3305_v2 }
 0x2f2   : > { %v3812_v35 = vpop.eup %3811 }
 0x2f3   : > { %v2515_v26 = vadd.f32 1.0, %v3812_v35 }
 0x2f5   : > { %3813 = vrcp.f32 %v2515_v26 }
 0x302   : > { %v3814_v57 = vpop.eup %3813 }
 0x303   : > { %v2518_v55 = vmul.f32 %v3814_v57, %v2508_v29 }
 0x305   : > { %3487 = vmatmul.mubr.msk.f32.vlgmr.msra.gmra.mxu1 %vm2520_vm5, %v2518_v55  ;;  %v3044_v55 = vld [vmem:[%s3918_s28 + $0x8] sm:$0xff] }
 0x306   : > { %3490 = vmatpush3.msra.mxu1 %v2643_v33 }
 0x307   : > { %3491 = vmatprep.subr.mxu1 %v2642_v13 }
 0x308   : > { %3492 = vmatpush3.msra.mxu1 %v2642_v13 }
 0x309   : > { %3493 = vmatprep.subr.mxu1 %v2641_v46 }
 0x30a   : > { %3494 = vmatpush3.msra.mxu1 %v2641_v46  ;;  %v3043_v46 = vld [vmem:[%s3918_s28] sm:$0xff] }
 0x30b   : > { %3495 = vmatprep.subr.mxu1 %v2640_v59 }
 0x30c   : > { %3496 = vmatpush3.msra.mxu1 %v2640_v59 }
 0x3c5   : > { %v2594_v49 = vpop.f32.mrf.mxu1 }
 0x3c6   : > { %v3308_v62 = vmul.f32 -1.442695, %v2594_v49 }
 0x3c7   : > { %v3488_v9 = vpop.f32.mrf.mxu1 }
 0x3c8   : > { %3815 = vpow2.f32 %v3308_v62 }
 0x3d5   : > { %v3816_v1 = vpop.eup %3815 }
 0x3d6   : > { %v2601_v15 = vadd.f32 1.0, %v3816_v1  ;;  %v3046_v1 = vld [vmem:[%s3918_s28 + $0x18] sm:$0xff] }
 0x3d8   : > { %3817 = vrcp.f32 %v2601_v15 }
 0x3e5   : > { %v3818_v34 = vpop.eup %3817 }
 0x3e6   : > { %v5363_v6 = vrot.slane %v3818_v34, %v5730_v52 }
 0x3e8   : > { %v2608_v42 = vmul.f32 %v5363_v6, %v5731_v43  ;;  %v2609_v56 = vmul.f32 %v5363_v6, %v5732_v51  ;;  %v2610_v0 = vmul.f32 %v5363_v6, %v5733_v48  ;;  %v2611_v22 = vmul.f32 %v5363_v6, %v5734_v20  ;;  %v3048_v48 = vld [vmem:[%s3918_s28 + $0x28] sm:$0xff] }
 0x3e9   : > { %v2612_v47 = vmul.f32 %v5363_v6, %v5735_v63  ;;  %v2613_v44 = vmul.f32 %v5363_v6, %v5736_v31  ;;  %v2614_v14 = vmul.f32 %v5363_v6, %v5737_v5  ;;  %v2615_v8 = vmul.f32 %v5363_v6, %v5738_v19  ;;  %v3050_v19 = vld [vmem:[%s3918_s28 + $0x38] sm:$0xff] }
 0x3ea   : > { %3497 = vmatprep.mubr.msk.f32.mxu1 %vm1071_vm1, %v2608_v42  ;;  %v2616_v61 = vmul.f32 %v5363_v6, %v5739_v11  ;;  %v2617_v41 = vmul.f32 %v5363_v6, %v5740_v7  ;;  %v2618_v39 = vmul.f32 %v5363_v6, %v5741_v60  ;;  %v2619_v3 = vmul.f32 %v5363_v6, %v5742_v10 }
 0x3eb   : > { %3498 = vmatmul.mubr.msk.f32.vlgmr.msra.gmra.mxu1 %vm1071_vm1, %v2609_v56  ;;  %v2620_v29 = vmul.f32 %v5363_v6, %v5743_v18  ;;  %v2621_v2 = vmul.f32 %v5363_v6, %v5041_v12  ;;  %v2622_v21 = vmul.f32 %v5363_v6, %v5715_v37  ;;  %v2623_v35 = vmul.f32 %v5363_v6, %v5252_v27  ;;  %v3052_v18 = vld [vmem:[%s3918_s28 + $0x48] sm:$0xff] }
 0x3ec   : > { %3500 = vmatprep.mubr.msk.f32.mxu1 %vm1071_vm1, %v2610_v0  ;;  %v2624_v26 = vmul.f32 %v5363_v6, %v5258_v45  ;;  %v2625_v12 = vmul.f32 %v5363_v6, %v5270_v58  ;;  %v2626_v37 = vmul.f32 %v5363_v6, %v5274_v17  ;;  %v2627_v27 = vmul.f32 %v5363_v6, %v5281_v16 }
 0x3ed   : > { %v2628_v45 = vmul.f32 %v5363_v6, %v5286_v25  ;;  %v2629_v58 = vmul.f32 %v5363_v6, %v5289_v23  ;;  %v2630_v17 = vmul.f32 %v5363_v6, %v5296_v50  ;;  %v2631_v16 = vmul.f32 %v5363_v6, %v5299_v4 }
 0x3ee   : > { %v2632_v25 = vmul.f32 %v5363_v6, %v5302_v36  ;;  %v2633_v23 = vmul.f32 %v5363_v6, %v5307_v30  ;;  %v2634_v50 = vmul.f32 %v5363_v6, %v5310_v24  ;;  %v2635_v4 = vmul.f32 %v5363_v6, %v5317_v32 }
 0x3ef   : > { %3501 = vmatmul.mubr.msk.f32.gmra.mxu1 %vm1071_vm1, %v2611_v22  ;;  %v2636_v36 = vmul.f32 %v5363_v6, %v5320_v40  ;;  %v2637_v30 = vmul.f32 %v5363_v6, %v5327_v38  ;;  %v2638_v24 = vmul.f32 %v5363_v6, %v5330_v53  ;;  %v2639_v32 = vmul.f32 %v5363_v6, %v5337_v28  ;;  %v5464_v40 = vld [vmem:[%s5651_s10] ss:$0 sm:$0xff]  ;;  %v3045_v6 = vld [vmem:[%s3918_s28 + $0x10] sm:$0xff] }
 0x3f0   : > { %3503 = vmatprep.mubr.msk.f32.mxu1 %vm1071_vm1, %v2612_v47  ;;  %v5469_v38 = vld [vmem:[%s5652_s11] ss:$0 sm:$0xff] }
 0x3f1   : > { %v3047_v47 = vld [vmem:[%s3918_s28 + $0x20] sm:$0xff] }
 0x3f3   : > { %3504 = vmatmul.mubr.msk.f32.gmra.mxu1 %vm1071_vm1, %v2613_v44 }
 0x3f4   : > { %3506 = vmatprep.mubr.msk.f32.mxu1 %vm1071_vm1, %v2614_v14 }
 0x3f7   : > { %3507 = vmatmul.mubr.msk.f32.gmra.mxu1 %vm1071_vm1, %v2615_v8 }
 0x3f8   : > { %3509 = vmatprep.mubr.msk.f32.mxu1 %vm1071_vm1, %v2616_v61 }
 0x3fb   : > { %3510 = vmatmul.mubr.msk.f32.gmra.mxu1 %vm1071_vm1, %v2617_v41  ;;  %v3049_v41 = vld [vmem:[%s3918_s28 + $0x30] sm:$0xff] }
 0x3fc   : > { %3512 = vmatprep.mubr.msk.f32.mxu1 %vm1071_vm1, %v2618_v39 }
 0x3ff   : > { %3513 = vmatmul.mubr.msk.f32.gmra.mxu1 %vm1071_vm1, %v2619_v3 }
 0x400   : > { %3515 = vmatprep.mubr.msk.f32.mxu1 %vm1071_vm1, %v2620_v29 }
 0x403   : > { %3516 = vmatmul.mubr.msk.f32.gmra.mxu1 %vm1071_vm1, %v2621_v2 }
 0x404   : > { %3518 = vmatprep.mubr.msk.f32.mxu1 %vm1071_vm1, %v2622_v21 }
 0x407   : > { %3519 = vmatmul.mubr.msk.f32.gmra.mxu1 %vm1071_vm1, %v2623_v35 }
 0x408   : > { %3521 = vmatprep.mubr.msk.f32.mxu1 %vm1071_vm1, %v2624_v26  ;;  %v3051_v26 = vld [vmem:[%s3918_s28 + $0x40] sm:$0xff] }
 0x40b   : > { %3522 = vmatmul.mubr.msk.f32.gmra.mxu1 %vm1071_vm1, %v2625_v12 }
 0x40c   : > { %3524 = vmatprep.mubr.msk.f32.mxu1 %vm1071_vm1, %v2626_v37 }
 0x40f   : > { %3525 = vmatmul.mubr.msk.f32.gmra.mxu1 %vm1071_vm1, %v2627_v27 }
 0x410   : > { %3527 = vmatprep.mubr.msk.f32.mxu1 %vm1071_vm1, %v2628_v45 }
 0x413   : > { %3528 = vmatmul.mubr.msk.f32.gmra.mxu1 %vm1071_vm1, %v2629_v58  ;;  %v3054_v58 = vld [vmem:[%s3918_s28 + $0x58] sm:$0xff] }
 0x414   : > { %3530 = vmatprep.mubr.msk.f32.mxu1 %vm1071_vm1, %v2630_v17 }
 0x417   : > { %3531 = vmatmul.mubr.msk.f32.gmra.mxu1 %vm1071_vm1, %v2631_v16 }
 0x418   : > { %3533 = vmatprep.mubr.msk.f32.mxu1 %vm1071_vm1, %v2632_v25 }
 0x41b   : > { %3534 = vmatmul.mubr.msk.f32.gmra.mxu1 %vm1071_vm1, %v2633_v23 }
 0x41c   : > { %3536 = vmatprep.mubr.msk.f32.mxu1 %vm1071_vm1, %v2634_v50  ;;  %v3053_v50 = vld [vmem:[%s3918_s28 + $0x50] sm:$0xff] }
 0x41f   : > { %3537 = vmatmul.mubr.msk.f32.gmra.mxu1 %vm1071_vm1, %v2635_v4 }
 0x420   : > { %3539 = vmatprep.mubr.msk.f32.mxu1 %vm1071_vm1, %v2636_v36 }
 0x423   : > { %3540 = vmatmul.mubr.msk.f32.gmra.mxu1 %vm1071_vm1, %v2637_v30 }
 0x424   : > { %3542 = vmatprep.mubr.msk.f32.mxu1 %vm1071_vm1, %v2638_v24 }
 0x427   : > { %3543 = vmatmul.mubr.msk.f32.gmra.mxu1 %vm1071_vm1, %v2639_v32  ;;  %v3056_v32 = vld [vmem:[%s3918_s28 + $0x68] sm:$0xff] }
 0x4ab   : > { %v3499_v57 = vpop.f32.mrf.mxu1 }
 0x4ac   : > { %v2973_v53 = vmul.f32 %v3499_v57, %v5464_v40 }
 0x4ad   : > { %v2806_v33 = vpop.f32.mrf.mxu1 }
 0x4ae   : > { %v3012_v28 = vadd.f32 %v5469_v38, %v2973_v53  ;;  %v2972_v13 = vmul.f32 %v5464_v40, %v2806_v33 }
 0x4af   : > { %v3502_v59 = vpop.f32.mrf.mxu1 }
 0x4b0   : > { %v3076_v49 = vadd.f32 %v3044_v55, %v3012_v28  ;;  %v3011_v62 = vadd.f32 %v5469_v38, %v2972_v13  ;;  %v2975_v9 = vmul.f32 %v3502_v59, %v5464_v40  ;;  %v3055_v28 = vld [vmem:[%s3918_s28 + $0x60] sm:$0xff] }
 0x4b1   : > { %v2816_v15 = vpop.f32.mrf.mxu1 }
 0x4b2   : > { %3108 = vst.msk [vmem:[%s5480_s15 + $0x8] sm:$0xff] %vm447_vm0, %v3076_v49  ;;  %v3075_v34 = vadd.f32 %v3043_v46, %v3011_v62  ;;  %v3014_v54 = vadd.f32 %v5469_v38, %v2975_v9  ;;  %v2974_v52 = vmul.f32 %v5464_v40, %v2816_v15  ;;  %v3058_v62 = vld [vmem:[%s3918_s28 + $0x78] sm:$0xff] }
 0x4b3   : > { %v3505_v43 = vpop.f32.mrf.mxu1 }
 0x4b4   : > { %3107 = vst.msk [vmem:[%s5480_s15] sm:$0xff] %vm447_vm0, %v3075_v34  ;;  %v3078_v42 = vadd.f32 %v3046_v1, %v3014_v54  ;;  %v3013_v51 = vadd.f32 %v5469_v38, %v2974_v52  ;;  %v2977_v56 = vmul.f32 %v3505_v43, %v5464_v40  ;;  %v3057_v54 = vld [vmem:[%s3918_s28 + $0x70] sm:$0xff] }
 0x4b5   : > { %v2826_v0 = vpop.f32.mrf.mxu1 }
 0x4b6   : > { %3110 = vst.msk [vmem:[%s5480_s15 + $0x18] sm:$0xff] %vm447_vm0, %v3078_v42  ;;  %v3077_v20 = vadd.f32 %v3045_v6, %v3013_v51  ;;  %v3016_v22 = vadd.f32 %v5469_v38, %v2977_v56  ;;  %v2976_v63 = vmul.f32 %v5464_v40, %v2826_v0  ;;  %v3060_v51 = vld [vmem:[%s3918_s28 + $0x88] sm:$0xff] }
 0x4b7   : > { %v3508_v31 = vpop.f32.mrf.mxu1 }
 0x4b8   : > { %3109 = vst.msk [vmem:[%s5480_s15 + $0x10] sm:$0xff] %vm447_vm0, %v3077_v20  ;;  %v3080_v44 = vadd.f32 %v3048_v48, %v3016_v22  ;;  %v3015_v5 = vadd.f32 %v5469_v38, %v2976_v63  ;;  %v2979_v14 = vmul.f32 %v3508_v31, %v5464_v40  ;;  %v3059_v22 = vld [vmem:[%s3918_s28 + $0x80] sm:$0xff] }
 0x4b9   : > { %v2836_v8 = vpop.f32.mrf.mxu1 }
 0x4ba   : > { %3112 = vst.msk [vmem:[%s5480_s15 + $0x28] sm:$0xff] %vm447_vm0, %v3080_v44  ;;  %v3079_v11 = vadd.f32 %v3047_v47, %v3015_v5  ;;  %v3018_v61 = vadd.f32 %v5469_v38, %v2979_v14  ;;  %v2978_v7 = vmul.f32 %v5464_v40, %v2836_v8  ;;  %v3062_v5 = vld [vmem:[%s3918_s28 + $0x98] sm:$0xff] }
 0x4bb   : > { %v3511_v60 = vpop.f32.mrf.mxu1 }
 0x4bc   : > { %3111 = vst.msk [vmem:[%s5480_s15 + $0x20] sm:$0xff] %vm447_vm0, %v3079_v11  ;;  %v3082_v39 = vadd.f32 %v3050_v19, %v3018_v61  ;;  %v3017_v10 = vadd.f32 %v5469_v38, %v2978_v7  ;;  %v2981_v3 = vmul.f32 %v3511_v60, %v5464_v40  ;;  %v3061_v61 = vld [vmem:[%s3918_s28 + $0x90] sm:$0xff] }
 0x4bd   : > { %v2846_v29 = vpop.f32.mrf.mxu1 }
 0x4be   : > { %3114 = vst.msk [vmem:[%s5480_s15 + $0x38] sm:$0xff] %vm447_vm0, %v3082_v39  ;;  %v3081_v2 = vadd.f32 %v3049_v41, %v3017_v10  ;;  %v3020_v21 = vadd.f32 %v5469_v38, %v2981_v3  ;;  %v2980_v35 = vmul.f32 %v5464_v40, %v2846_v29  ;;  %v3064_v10 = vld [vmem:[%s3918_s28 + $0xa8] sm:$0xff] }
 0x4bf   : > { %v3514_v12 = vpop.f32.mrf.mxu1 }
 0x4c0   : > { %3113 = vst.msk [vmem:[%s5480_s15 + $0x30] sm:$0xff] %vm447_vm0, %v3081_v2  ;;  %v3084_v37 = vadd.f32 %v3052_v18, %v3020_v21  ;;  %v3019_v27 = vadd.f32 %v5469_v38, %v2980_v35  ;;  %v2983_v45 = vmul.f32 %v3514_v12, %v5464_v40  ;;  %v3063_v21 = vld [vmem:[%s3918_s28 + $0xa0] sm:$0xff] }
 0x4c1   : > { %v2856_v17 = vpop.f32.mrf.mxu1 }
 0x4c2   : > { %3116 = vst.msk [vmem:[%s5480_s15 + $0x48] sm:$0xff] %vm447_vm0, %v3084_v37  ;;  %v3083_v16 = vadd.f32 %v3051_v26, %v3019_v27  ;;  %v3022_v25 = vadd.f32 %v5469_v38, %v2983_v45  ;;  %v2982_v23 = vmul.f32 %v5464_v40, %v2856_v17  ;;  %v3066_v27 = vld [vmem:[%s3918_s28 + $0xb8] sm:$0xff] }
 0x4c3   : > { %v3517_v4 = vpop.f32.mrf.mxu1 }
 0x4c4   : > { %3115 = vst.msk [vmem:[%s5480_s15 + $0x40] sm:$0xff] %vm447_vm0, %v3083_v16  ;;  %v3086_v36 = vadd.f32 %v3054_v58, %v3022_v25  ;;  %v3021_v30 = vadd.f32 %v5469_v38, %v2982_v23  ;;  %v2985_v24 = vmul.f32 %v3517_v4, %v5464_v40  ;;  %v3065_v25 = vld [vmem:[%s3918_s28 + $0xb0] sm:$0xff] }
 0x4c5   : > { %v2866_v57 = vpop.f32.mrf.mxu1 }
 0x4c6   : > { %3118 = vst.msk [vmem:[%s5480_s15 + $0x58] sm:$0xff] %vm447_vm0, %v3086_v36  ;;  %v3085_v53 = vadd.f32 %v3053_v50, %v3021_v30  ;;  %v3024_v55 = vadd.f32 %v5469_v38, %v2985_v24  ;;  %v2984_v33 = vmul.f32 %v5464_v40, %v2866_v57  ;;  %v3068_v30 = vld [vmem:[%s3918_s28 + $0xc8] sm:$0xff] }
 0x4c7   : > { %v3520_v13 = vpop.f32.mrf.mxu1 }
 0x4c8   : > { %3117 = vst.msk [vmem:[%s5480_s15 + $0x50] sm:$0xff] %vm447_vm0, %v3085_v53  ;;  %v3088_v46 = vadd.f32 %v3056_v32, %v3024_v55  ;;  %v3023_v59 = vadd.f32 %v5469_v38, %v2984_v33  ;;  %v2987_v49 = vmul.f32 %v3520_v13, %v5464_v40  ;;  %v3067_v55 = vld [vmem:[%s3918_s28 + $0xc0] sm:$0xff] }
 0x4c9   : > { %v2876_v9 = vpop.f32.mrf.mxu1 }
 0x4ca   : > { %3120 = vst.msk [vmem:[%s5480_s15 + $0x68] sm:$0xff] %vm447_vm0, %v3088_v46  ;;  %v3087_v1 = vadd.f32 %v3055_v28, %v3023_v59  ;;  %v3026_v15 = vadd.f32 %v5469_v38, %v2987_v49  ;;  %v2986_v34 = vmul.f32 %v5464_v40, %v2876_v9  ;;  %v3070_v59 = vld [vmem:[%s3918_s28 + $0xd8] sm:$0xff] }
 0x4cb   : > { %v3523_v52 = vpop.f32.mrf.mxu1 }
 0x4cc   : > { %3119 = vst.msk [vmem:[%s5480_s15 + $0x60] sm:$0xff] %vm447_vm0, %v3087_v1  ;;  %v3090_v6 = vadd.f32 %v3058_v62, %v3026_v15  ;;  %v3025_v43 = vadd.f32 %v5469_v38, %v2986_v34  ;;  %v2989_v42 = vmul.f32 %v3523_v52, %v5464_v40  ;;  %v3069_v15 = vld [vmem:[%s3918_s28 + $0xd0] sm:$0xff] }
 0x4cd   : > { %v2886_v56 = vpop.f32.mrf.mxu1 }
 0x4ce   : > { %3122 = vst.msk [vmem:[%s5480_s15 + $0x78] sm:$0xff] %vm447_vm0, %v3090_v6  ;;  %v3089_v48 = vadd.f32 %v3057_v54, %v3025_v43  ;;  %v3028_v0 = vadd.f32 %v5469_v38, %v2989_v42  ;;  %v2988_v20 = vmul.f32 %v5464_v40, %v2886_v56  ;;  %v3072_v43 = vld [vmem:[%s3918_s28 + $0xe8] sm:$0xff] }
 0x4cf   : > { %v3526_v63 = vpop.f32.mrf.mxu1 }
 0x4d0   : > { %3121 = vst.msk [vmem:[%s5480_s15 + $0x70] sm:$0xff] %vm447_vm0, %v3089_v48  ;;  %v3092_v47 = vadd.f32 %v3060_v51, %v3028_v0  ;;  %v3027_v31 = vadd.f32 %v5469_v38, %v2988_v20  ;;  %v2991_v44 = vmul.f32 %v3526_v63, %v5464_v40  ;;  %v3071_v0 = vld [vmem:[%s3918_s28 + $0xe0] sm:$0xff] }
 0x4d1   : > { %v2896_v14 = vpop.f32.mrf.mxu1 }
 0x4d2   : > { %3124 = vst.msk [vmem:[%s5480_s15 + $0x88] sm:$0xff] %vm447_vm0, %v3092_v47  ;;  %v3091_v19 = vadd.f32 %v3059_v22, %v3027_v31  ;;  %v3030_v8 = vadd.f32 %v5469_v38, %v2991_v44  ;;  %v2990_v11 = vmul.f32 %v5464_v40, %v2896_v14  ;;  %v3074_v31 = vld [vmem:[%s3918_s28 + $0xf8] sm:$0xff] }
 0x4d3   : > { %v3529_v7 = vpop.f32.mrf.mxu1 }
 0x4d4   : > { %3123 = vst.msk [vmem:[%s5480_s15 + $0x80] sm:$0xff] %vm447_vm0, %v3091_v19  ;;  %v3094_v41 = vadd.f32 %v3062_v5, %v3030_v8  ;;  %v3029_v60 = vadd.f32 %v5469_v38, %v2990_v11  ;;  %v2993_v39 = vmul.f32 %v3529_v7, %v5464_v40  ;;  %v3073_v8 = vld [vmem:[%s3918_s28 + $0xf0] sm:$0xff] }
 0x4d5   : > { %v2906_v3 = vpop.f32.mrf.mxu1 }
 0x4d6   : > { %3126 = vst.msk [vmem:[%s5480_s15 + $0x98] sm:$0xff] %vm447_vm0, %v3094_v41  ;;  %v3093_v18 = vadd.f32 %v3061_v61, %v3029_v60  ;;  %v3032_v29 = vadd.f32 %v5469_v38, %v2993_v39  ;;  %v2992_v2 = vmul.f32 %v5464_v40, %v2906_v3 }
 0x4d7   : > { %v3532_v35 = vpop.f32.mrf.mxu1 }
 0x4d8   : > { %3125 = vst.msk [vmem:[%s5480_s15 + $0x90] sm:$0xff] %vm447_vm0, %v3093_v18  ;;  %v3096_v26 = vadd.f32 %v3064_v10, %v3032_v29  ;;  %v3031_v12 = vadd.f32 %v5469_v38, %v2992_v2  ;;  %v2995_v37 = vmul.f32 %v3532_v35, %v5464_v40 }
 0x4d9   : > { %v2916_v45 = vpop.f32.mrf.mxu1 }
 0x4da   : > { %3128 = vst.msk [vmem:[%s5480_s15 + $0xa8] sm:$0xff] %vm447_vm0, %v3096_v26  ;;  %v3095_v58 = vadd.f32 %v3063_v21, %v3031_v12  ;;  %v3034_v17 = vadd.f32 %v5469_v38, %v2995_v37  ;;  %v2994_v16 = vmul.f32 %v5464_v40, %v2916_v45 }
 0x4db   : > { %v3535_v23 = vpop.f32.mrf.mxu1 }
 0x4dc   : > { %3127 = vst.msk [vmem:[%s5480_s15 + $0xa0] sm:$0xff] %vm447_vm0, %v3095_v58  ;;  %v3098_v50 = vadd.f32 %v3066_v27, %v3034_v17  ;;  %v3033_v4 = vadd.f32 %v5469_v38, %v2994_v16  ;;  %v2997_v36 = vmul.f32 %v3535_v23, %v5464_v40 }
 0x4dd   : > { %v2926_v24 = vpop.f32.mrf.mxu1 }
 0x4de   : > { %3130 = vst.msk [vmem:[%s5480_s15 + $0xb8] sm:$0xff] %vm447_vm0, %v3098_v50  ;;  %v3097_v32 = vadd.f32 %v3065_v25, %v3033_v4  ;;  %v3036_v57 = vadd.f32 %v5469_v38, %v2997_v36  ;;  %v2996_v53 = vmul.f32 %v5464_v40, %v2926_v24 }
 0x4df   : > { %v3538_v33 = vpop.f32.mrf.mxu1 }
 0x4e0   : > { %3129 = vst.msk [vmem:[%s5480_s15 + $0xb0] sm:$0xff] %vm447_vm0, %v3097_v32  ;;  %v3100_v28 = vadd.f32 %v3068_v30, %v3036_v57  ;;  %v3035_v13 = vadd.f32 %v5469_v38, %v2996_v53  ;;  %v2999_v46 = vmul.f32 %v3538_v33, %v5464_v40 }
 0x4e1   : > { %v2936_v49 = vpop.f32.mrf.mxu1 }
 0x4e2   : > { %3132 = vst.msk [vmem:[%s5480_s15 + $0xc8] sm:$0xff] %vm447_vm0, %v3100_v28  ;;  %v3099_v62 = vadd.f32 %v3067_v55, %v3035_v13  ;;  %v3038_v9 = vadd.f32 %v5469_v38, %v2999_v46  ;;  %v2998_v1 = vmul.f32 %v5464_v40, %v2936_v49 }
 0x4e3   : > { %v3541_v34 = vpop.f32.mrf.mxu1 }
 0x4e4   : > { %3131 = vst.msk [vmem:[%s5480_s15 + $0xc0] sm:$0xff] %vm447_vm0, %v3099_v62  ;;  %v3102_v54 = vadd.f32 %v3070_v59, %v3038_v9  ;;  %v3037_v52 = vadd.f32 %v5469_v38, %v2998_v1  ;;  %v3001_v6 = vmul.f32 %v3541_v34, %v5464_v40 }
 0x4e5   : > { %v2946_v42 = vpop.f32.mrf.mxu1 }
 0x4e6   : > { %3134 = vst.msk [vmem:[%s5480_s15 + $0xd8] sm:$0xff] %vm447_vm0, %v3102_v54  ;;  %v3101_v51 = vadd.f32 %v3069_v15, %v3037_v52  ;;  %v3040_v56 = vadd.f32 %v5469_v38, %v3001_v6  ;;  %v3000_v48 = vmul.f32 %v5464_v40, %v2946_v42 }
 0x4e7   : > { %v3544_v20 = vpop.f32.mrf.mxu1 }
 0x4e8   : > { %3133 = vst.msk [vmem:[%s5480_s15 + $0xd0] sm:$0xff] %vm447_vm0, %v3101_v51  ;;  %v3104_v22 = vadd.f32 %v3072_v43, %v3040_v56  ;;  %v3039_v63 = vadd.f32 %v5469_v38, %v3000_v48  ;;  %v3003_v47 = vmul.f32 %v3544_v20, %v5464_v40 }
 0x4e9   : > { %v2956_v44 = vpop.f32.mrf.mxu1 }
 0x4ea   : > { %3136 = vst.msk [vmem:[%s5480_s15 + $0xe8] sm:$0xff] %vm447_vm0, %v3104_v22  ;;  %v3103_v5 = vadd.f32 %v3071_v0, %v3039_v63  ;;  %v3042_v14 = vadd.f32 %v5469_v38, %v3003_v47  ;;  %v3002_v19 = vmul.f32 %v5464_v40, %v2956_v44 }
 0x4ec   : > { %3135 = vst.msk [vmem:[%s5480_s15 + $0xe0] sm:$0xff] %vm447_vm0, %v3103_v5  ;;  %v3106_v11 = vadd.f32 %v3074_v31, %v3042_v14  ;;  %v3041_v61 = vadd.f32 %v5469_v38, %v3002_v19 }
 0x4ee   : > { %3138 = vst.msk [vmem:[%s5480_s15 + $0xf8] sm:$0xff] %vm447_vm0, %v3106_v11  ;;  %v3105_v7 = vadd.f32 %v3073_v8, %v3041_v61 }
 0x4f0   : > { %3137 = vst.msk [vmem:[%s5480_s15 + $0xf0] sm:$0xff] %vm447_vm0, %v3105_v7 }
 0x4f1 PF: > { %s22_s21 = sadd.s32 1, %s3830_s21  }
 0x4f2   : > { %p19_p4 = scmp.ge.s32.totalorder %s22_s21, 4  }
 0x4f4   :  { %21 = sbr.rel (!%p19_p4) target bundleno = 1 (0x1), region = 100 }

</bundles_post_ra>
